<compile_context>
chip_gen: v5e
topology: v5e:2x2
jax: 0.10.0
libtpu: 0.0.40
codegen_flags: <defaults>
</compile_context>

<pallas_src>
import functools
import math

import jax
import jax.numpy as jnp
import numpy as np
from jax import lax
from jax.experimental import pallas as pl
from jax.experimental.pallas import tpu as pltpu


# ---------------------------------------------------------------------------
# In-kernel helpers (operate on values, not refs)
# ---------------------------------------------------------------------------
def _layernorm_f32(y, gamma, beta, eps=1e-5):
    mean = jnp.mean(y, axis=-1, keepdims=True)
    centered = y - mean
    var = jnp.mean(centered * centered, axis=-1, keepdims=True)
    return centered * lax.rsqrt(var + eps) * gamma + beta


def _mha_fused(q_in, k_in, v_in, wq_bd, wk_bd, wv_bd, wo, bo, mask, n_heads):
    """Multi-head attention with lane-dense projections and fused Wo.

    q_in/k_in/v_in: (S*, D) f32 activations.
    wq_bd/wk_bd/wv_bd: (D, D) bf16 block-diagonal per-head projection weights.
    wo: (D, D) bf16; bo: (1, D) f32.  mask: (Sq, Sk) f32 or None.
    Returns (Sq, D) f32 = concat_heads(softmax(mask(q k^T)/sqrt(hd)) @ v) @ wo + bo.
    """
    d_model = q_in.shape[-1]
    hd = d_model // n_heads
    inv_sqrt_hd = 1.0 / math.sqrt(hd)

    # One MXU-native (K = D = 128) matmul per projection instead of 8 tiny ones.
    q = jnp.dot(q_in.astype(jnp.bfloat16), wq_bd, preferred_element_type=jnp.float32)
    k = jnp.dot(k_in.astype(jnp.bfloat16), wk_bd, preferred_element_type=jnp.float32)
    v = jnp.dot(v_in.astype(jnp.bfloat16), wv_bd, preferred_element_type=jnp.float32)

    masked_out = None if mask is None else (mask == 0.0)   # hoisted out of the head loop

    # Per-head scores / PV are (8,8)-sized; a static unrolled loop on lane
    # slices avoids in-kernel relayouts while the heavy matmuls above/below
    # stay lane-dense.  Wo is fused here so the output is written at full
    # 128-lane width (no (B,H,S,hd) intermediate, no wrapper transposes).
    acc = jnp.zeros((q_in.shape[0], d_model), jnp.float32)
    for h in range(n_heads):
        sl = slice(h * hd, (h + 1) * hd)
        qh, kh, vh = q[:, sl], k[:, sl], v[:, sl]
        s = lax.dot_general(qh, kh, (((1,), (1,)), ((), ())),
                            preferred_element_type=jnp.float32)        # (Sq, Sk)
        if masked_out is not None:
            s = jnp.where(masked_out, -1e20, s)
        s = s * inv_sqrt_hd                       # mask-then-scale, as in the module
        s = s - jnp.max(s, axis=-1, keepdims=True)
        p = jnp.exp(s)
        p = p * pl.reciprocal(jnp.sum(p, axis=-1, keepdims=True), approx=True)
        oh = jnp.dot(p, vh, preferred_element_type=jnp.float32)        # (Sq, hd)
        acc = acc + jnp.dot(oh.astype(jnp.bfloat16), wo[sl, :],
                            preferred_element_type=jnp.float32)        # (Sq, D)
    return acc + bo


# ---------------------------------------------------------------------------
# Fused decoder-block kernel (one grid step per batch element)
# ---------------------------------------------------------------------------
def decoder_block_kernel(
        x_ref, key_ref, query_ref, mask_ref,
        wq1_ref, wk1_ref, wv1_ref, wo1_ref, bo1_ref, gd_ref, bd_ref,
        wq2_ref, wk2_ref, wv2_ref, wo2_ref, bo2_ref, g1_ref, b1_ref,
        w_ff1_ref, b_ff1_ref, w_ff2_ref, b_ff2_ref, g2_ref, b2_ref,
        o_ref, *, n_heads):
    x = x_ref[0]            # (S, D) f32
    key_in = key_ref[0]
    query_in = query_ref[0]

    # 1) masked self-attention on x  ->  Add & Norm.
    a1 = _mha_fused(x, x, x, wq1_ref[...], wk1_ref[...], wv1_ref[...],
                    wo1_ref[...], bo1_ref[...], mask_ref[...], n_heads)
    # TODO(synk): nn.Dropout treated as inference-mode identity; train-mode RNG dropout not implemented.
    value = _layernorm_f32(a1 + x, gd_ref[...], bd_ref[...])

    # 2) cross-attention (q from `query`, k from `key`, v = value; no mask) -> Add & Norm.
    a2 = _mha_fused(query_in, key_in, value,
                    wq2_ref[...], wk2_ref[...], wv2_ref[...],
                    wo2_ref[...], bo2_ref[...], None, n_heads)
    n1 = _layernorm_f32(a2 + value, g1_ref[...], b1_ref[...])

    # 3) feed-forward (Linear -> ReLU -> Linear) -> Add & Norm.
    hdn = jnp.dot(n1.astype(jnp.bfloat16), w_ff1_ref[...],
                  preferred_element_type=jnp.float32) + b_ff1_ref[...]
    hdn = jnp.maximum(hdn, 0.0)
    ff = jnp.dot(hdn.astype(jnp.bfloat16), w_ff2_ref[...],
                 preferred_element_type=jnp.float32) + b_ff2_ref[...]
    out = _layernorm_f32(ff + n1, g2_ref[...], b2_ref[...])

    o_ref[0] = out.astype(o_ref.dtype)


# ---------------------------------------------------------------------------
# Wrapper
# ---------------------------------------------------------------------------
def _block_diag_heads(w, n_heads):
    """(hd, hd) shared per-head weight -> (D, D) block-diagonal matrix so the
    per-head projection becomes one lane-dense matmul on the concatenated-head
    layout (head h occupies columns [h*hd, (h+1)*hd))."""
    return jnp.kron(jnp.eye(n_heads, dtype=w.dtype), w)


def decoder_block_forward(key_in, query_in, x, mask, p, n_heads):
    B, S, D = x.shape
    assert D % n_heads == 0
    wdt = jnp.bfloat16   # MXU operand dtype for weight matmuls (f32 accumulation)

    mask_arr = (jnp.ones((S, S), jnp.float32) if mask is None
                else mask.astype(jnp.float32))

    consts = [
        mask_arr,
        _block_diag_heads(p["wq1"], n_heads).astype(wdt),
        _block_diag_heads(p["wk1"], n_heads).astype(wdt),
        _block_diag_heads(p["wv1"], n_heads).astype(wdt),
        p["wo1"].astype(wdt), p["bo1"], p["g_dec"], p["b_dec"],
        _block_diag_heads(p["wq2"], n_heads).astype(wdt),
        _block_diag_heads(p["wk2"], n_heads).astype(wdt),
        _block_diag_heads(p["wv2"], n_heads).astype(wdt),
        p["wo2"].astype(wdt), p["bo2"], p["g1"], p["b1"],
        p["w_ff1"].astype(wdt), p["b_ff1"], p["w_ff2"].astype(wdt), p["b_ff2"],
        p["g2"], p["b2"],
    ]

    tok_spec = pl.BlockSpec((1, S, D), lambda b: (b, 0, 0))

    def const_spec(arr):
        # Full array resident in VMEM across the (parallel) batch grid.
        return pl.BlockSpec(arr.shape, lambda b: (0, 0))

    kernel = functools.partial(decoder_block_kernel, n_heads=n_heads)
    return pl.pallas_call(
        kernel,
        out_shape=jax.ShapeDtypeStruct((B, S, D), jnp.float32),
        grid_spec=pl.GridSpec(
            grid=(B,),
            in_specs=[tok_spec, tok_spec, tok_spec] + [const_spec(c) for c in consts],
            out_specs=tok_spec,
        ),
        compiler_params=pltpu.CompilerParams(dimension_semantics=("parallel",)),
    )(x, key_in, query_in, *consts)


# ---------------------------------------------------------------------------
# Pure-JAX reference (same math, f32, no Pallas)
# ---------------------------------------------------------------------------
def _mha_ref(query_in, key_in, value_in, wq, wk, wv, wo, bo, mask, n_heads):
    B, Sq, D = query_in.shape
    Sk = key_in.shape[1]
    hd = D // n_heads

    def split(t, s):
        return t.reshape(B, s, n_heads, hd).transpose(0, 2, 1, 3)

    q = split(query_in, Sq) @ wq
    k = split(key_in, Sk) @ wk
    v = split(value_in, Sk) @ wv
    s = jnp.einsum("bhqd,bhkd->bhqk", q, k)
    if mask is not None:
        s = jnp.where(mask[None, None, :, :] == 0, -1e20, s)
    s = s / math.sqrt(hd)
    pw = jax.nn.softmax(s, axis=-1)
    o = jnp.einsum("bhqk,bhkd->bhqd", pw, v)
    concat = o.transpose(0, 2, 1, 3).reshape(B, Sq, D)
    return concat @ wo + bo


def _layernorm_ref(x, g, b, eps=1e-5):
    m = jnp.mean(x, axis=-1, keepdims=True)
    v = jnp.mean((x - m) ** 2, axis=-1, keepdims=True)
    return (x - m) / jnp.sqrt(v + eps) * g + b


def decoder_block_ref(key_in, query_in, x, mask, p, n_heads):
    a1 = _mha_ref(x, x, x, p["wq1"], p["wk1"], p["wv1"], p["wo1"], p["bo1"], mask, n_heads)
    value = _layernorm_ref(a1 + x, p["g_dec"], p["b_dec"])
    a2 = _mha_ref(query_in, key_in, value, p["wq2"], p["wk2"], p["wv2"], p["wo2"], p["bo2"],
                  None, n_heads)
    n1 = _layernorm_ref(a2 + value, p["g1"], p["b1"])
    h = jnp.maximum(n1 @ p["w_ff1"] + p["b_ff1"], 0.0)
    ff = h @ p["w_ff2"] + p["b_ff2"]
    return _layernorm_ref(ff + n1, p["g2"], p["b2"])


# ---------------------------------------------------------------------------
# Main
# ---------------------------------------------------------------------------
if __name__ == "__main__":
    B, S, D, H, EXP = 2, 8, 128, 8, 4
    hd, Dff = D // H, EXP * D

    root = jax.random.PRNGKey(0)
    ks = jax.random.split(root, 24)

    def nrm(k, shape, scale):
        return jax.random.normal(k, shape, dtype=jnp.float32) * scale

    p = {
        # masked self-attention (DecoderBlock.attention)
        "wq1": nrm(ks[0], (hd, hd), 1.0 / math.sqrt(hd)),
        "wk1": nrm(ks[1], (hd, hd), 1.0 / math.sqrt(hd)),
        "wv1": nrm(ks[2], (hd, hd), 1.0 / math.sqrt(hd)),
        "wo1": nrm(ks[3], (D, D), 1.0 / math.sqrt(D)),
        "bo1": nrm(ks[4], (1, D), 0.02),
        "g_dec": 1.0 + nrm(ks[5], (1, D), 0.05),
        "b_dec": nrm(ks[6], (1, D), 0.05),
        # cross-attention (TransformerBlock.attention)
        "wq2": nrm(ks[7], (hd, hd), 1.0 / math.sqrt(hd)),
        "wk2": nrm(ks[8], (hd, hd), 1.0 / math.sqrt(hd)),
        "wv2": nrm(ks[9], (hd, hd), 1.0 / math.sqrt(hd)),
        "wo2": nrm(ks[10], (D, D), 1.0 / math.sqrt(D)),
        "bo2": nrm(ks[11], (1, D), 0.02),
        "g1": 1.0 + nrm(ks[12], (1, D), 0.05),
        "b1": nrm(ks[13], (1, D), 0.05),
        # feed-forward + final norm
        "w_ff1": nrm(ks[14], (D, Dff), 1.0 / math.sqrt(D)),
        "b_ff1": nrm(ks[15], (1, Dff), 0.02),
        "w_ff2": nrm(ks[16], (Dff, D), 1.0 / math.sqrt(Dff)),
        "b_ff2": nrm(ks[17], (1, D), 0.02),
        "g2": 1.0 + nrm(ks[18], (1, D), 0.05),
        "b2": nrm(ks[19], (1, D), 0.05),
    }

    x = nrm(ks[20], (B, S, D), 1.0)
    key_in = nrm(ks[21], (B, S, D), 1.0)
    query_in = nrm(ks[22], (B, S, D), 1.0)
    mask = jnp.tril(jnp.ones((S, S), dtype=jnp.float32))  # causal decoder mask

    out = decoder_block_forward(key_in, query_in, x, mask, p, H)
    out = jax.block_until_ready(out)
    assert out.shape == (B, S, D)

    with jax.default_matmul_precision("float32"):
        ref = decoder_block_ref(key_in, query_in, x, mask, p, H)

    # Tolerance covers bf16 MXU operands + approximate reciprocal in the kernel
    # vs the f32 reference; structural bugs would show up as O(1) differences.
    np.testing.assert_allclose(np.asarray(out), np.asarray(ref), rtol=3e-2, atol=3e-2)

    print("KERNEL_OK")
</pallas_src>

<mosaic_0001>
module attributes {stable_mosaic.version = 11 : i64} {
  func.func @decoder_block_kernel(%arg0: i32, %arg1: memref<1x8x128xf32, #tpu.memory_space<vmem>>, %arg2: memref<1x8x128xf32, #tpu.memory_space<vmem>>, %arg3: memref<1x8x128xf32, #tpu.memory_space<vmem>>, %arg4: memref<8x8xf32, #tpu.memory_space<vmem>>, %arg5: memref<128x128xbf16, #tpu.memory_space<vmem>>, %arg6: memref<128x128xbf16, #tpu.memory_space<vmem>>, %arg7: memref<128x128xbf16, #tpu.memory_space<vmem>>, %arg8: memref<128x128xbf16, #tpu.memory_space<vmem>>, %arg9: memref<1x128xf32, #tpu.memory_space<vmem>>, %arg10: memref<1x128xf32, #tpu.memory_space<vmem>>, %arg11: memref<1x128xf32, #tpu.memory_space<vmem>>, %arg12: memref<128x128xbf16, #tpu.memory_space<vmem>>, %arg13: memref<128x128xbf16, #tpu.memory_space<vmem>>, %arg14: memref<128x128xbf16, #tpu.memory_space<vmem>>, %arg15: memref<128x128xbf16, #tpu.memory_space<vmem>>, %arg16: memref<1x128xf32, #tpu.memory_space<vmem>>, %arg17: memref<1x128xf32, #tpu.memory_space<vmem>>, %arg18: memref<1x128xf32, #tpu.memory_space<vmem>>, %arg19: memref<128x512xbf16, #tpu.memory_space<vmem>>, %arg20: memref<1x512xf32, #tpu.memory_space<vmem>>, %arg21: memref<512x128xbf16, #tpu.memory_space<vmem>>, %arg22: memref<1x128xf32, #tpu.memory_space<vmem>>, %arg23: memref<1x128xf32, #tpu.memory_space<vmem>>, %arg24: memref<1x128xf32, #tpu.memory_space<vmem>>, %arg25: memref<1x8x128xf32, #tpu.memory_space<vmem>>) attributes {dimension_semantics = [#tpu.dimension_semantics<parallel>], iteration_bounds = array<i64: 2>, scalar_prefetch = 0 : i64, scratch_operands = 0 : i64, tpu.core_type = #tpu.core_type<tc>, window_params = [{transform_indices = @transform_0, window_bounds = array<i64: 1, 8, 128>}, {transform_indices = @transform_1, window_bounds = array<i64: 1, 8, 128>}, {transform_indices = @transform_2, window_bounds = array<i64: 1, 8, 128>}, {pipeline_mode = #tpu.pipeline_mode<synchronous>, transform_indices = @transform_3, window_bounds = array<i64: 8, 8>}, {pipeline_mode = #tpu.pipeline_mode<synchronous>, transform_indices = @transform_4, window_bounds = array<i64: 128, 128>}, {pipeline_mode = #tpu.pipeline_mode<synchronous>, transform_indices = @transform_5, window_bounds = array<i64: 128, 128>}, {pipeline_mode = #tpu.pipeline_mode<synchronous>, transform_indices = @transform_6, window_bounds = array<i64: 128, 128>}, {pipeline_mode = #tpu.pipeline_mode<synchronous>, transform_indices = @transform_7, window_bounds = array<i64: 128, 128>}, {pipeline_mode = #tpu.pipeline_mode<synchronous>, transform_indices = @transform_8, window_bounds = array<i64: 1, 128>}, {pipeline_mode = #tpu.pipeline_mode<synchronous>, transform_indices = @transform_9, window_bounds = array<i64: 1, 128>}, {pipeline_mode = #tpu.pipeline_mode<synchronous>, transform_indices = @transform_10, window_bounds = array<i64: 1, 128>}, {pipeline_mode = #tpu.pipeline_mode<synchronous>, transform_indices = @transform_11, window_bounds = array<i64: 128, 128>}, {pipeline_mode = #tpu.pipeline_mode<synchronous>, transform_indices = @transform_12, window_bounds = array<i64: 128, 128>}, {pipeline_mode = #tpu.pipeline_mode<synchronous>, transform_indices = @transform_13, window_bounds = array<i64: 128, 128>}, {pipeline_mode = #tpu.pipeline_mode<synchronous>, transform_indices = @transform_14, window_bounds = array<i64: 128, 128>}, {pipeline_mode = #tpu.pipeline_mode<synchronous>, transform_indices = @transform_15, window_bounds = array<i64: 1, 128>}, {pipeline_mode = #tpu.pipeline_mode<synchronous>, transform_indices = @transform_16, window_bounds = array<i64: 1, 128>}, {pipeline_mode = #tpu.pipeline_mode<synchronous>, transform_indices = @transform_17, window_bounds = array<i64: 1, 128>}, {pipeline_mode = #tpu.pipeline_mode<synchronous>, transform_indices = @transform_18, window_bounds = array<i64: 128, 512>}, {pipeline_mode = #tpu.pipeline_mode<synchronous>, transform_indices = @transform_19, window_bounds = array<i64: 1, 512>}, {pipeline_mode = #tpu.pipeline_mode<synchronous>, transform_indices = @transform_20, window_bounds = array<i64: 512, 128>}, {pipeline_mode = #tpu.pipeline_mode<synchronous>, transform_indices = @transform_21, window_bounds = array<i64: 1, 128>}, {pipeline_mode = #tpu.pipeline_mode<synchronous>, transform_indices = @transform_22, window_bounds = array<i64: 1, 128>}, {pipeline_mode = #tpu.pipeline_mode<synchronous>, transform_indices = @transform_23, window_bounds = array<i64: 1, 128>}, {transform_indices = @transform_24, window_bounds = array<i64: 1, 8, 128>}]} {
    %c0 = arith.constant 0 : index
    %c0_0 = arith.constant 0 : index
    %c0_1 = arith.constant 0 : index
    %0 = vector.load %arg1[%c0, %c0_0, %c0_1] : memref<1x8x128xf32, #tpu.memory_space<vmem>>, vector<1x8x128xf32>
    %1 = vector.shape_cast %0 : vector<1x8x128xf32> to vector<8x128xf32>
    %c0_2 = arith.constant 0 : index
    %c0_3 = arith.constant 0 : index
    %c0_4 = arith.constant 0 : index
    %2 = vector.load %arg2[%c0_2, %c0_3, %c0_4] : memref<1x8x128xf32, #tpu.memory_space<vmem>>, vector<1x8x128xf32>
    %3 = vector.shape_cast %2 : vector<1x8x128xf32> to vector<8x128xf32>
    %c0_5 = arith.constant 0 : index
    %c0_6 = arith.constant 0 : index
    %c0_7 = arith.constant 0 : index
    %4 = vector.load %arg3[%c0_5, %c0_6, %c0_7] : memref<1x8x128xf32, #tpu.memory_space<vmem>>, vector<1x8x128xf32>
    %5 = vector.shape_cast %4 : vector<1x8x128xf32> to vector<8x128xf32>
    %c0_8 = arith.constant 0 : index
    %c0_9 = arith.constant 0 : index
    %6 = vector.load %arg5[%c0_8, %c0_9] : memref<128x128xbf16, #tpu.memory_space<vmem>>, vector<128x128xbf16>
    %c0_10 = arith.constant 0 : index
    %c0_11 = arith.constant 0 : index
    %7 = vector.load %arg6[%c0_10, %c0_11] : memref<128x128xbf16, #tpu.memory_space<vmem>>, vector<128x128xbf16>
    %c0_12 = arith.constant 0 : index
    %c0_13 = arith.constant 0 : index
    %8 = vector.load %arg7[%c0_12, %c0_13] : memref<128x128xbf16, #tpu.memory_space<vmem>>, vector<128x128xbf16>
    %c0_14 = arith.constant 0 : index
    %c0_15 = arith.constant 0 : index
    %9 = vector.load %arg8[%c0_14, %c0_15] : memref<128x128xbf16, #tpu.memory_space<vmem>>, vector<128x128xbf16>
    %c0_16 = arith.constant 0 : index
    %c0_17 = arith.constant 0 : index
    %10 = vector.load %arg9[%c0_16, %c0_17] : memref<1x128xf32, #tpu.memory_space<vmem>>, vector<1x128xf32>
    %c0_18 = arith.constant 0 : index
    %c0_19 = arith.constant 0 : index
    %11 = vector.load %arg4[%c0_18, %c0_19] : memref<8x8xf32, #tpu.memory_space<vmem>>, vector<8x8xf32>
    %12 = arith.truncf %1 : vector<8x128xf32> to vector<8x128xbf16>
    %cst = arith.constant dense<0.000000e+00> : vector<8x128xf32>
    %13 = tpu.matmul %12, %6, %cst {dimension_numbers = #tpu.dot_dimension_numbers<[1], [0], [0], [1], [0, 0, 1, 1], [], []>} : vector<8x128xbf16>, vector<128x128xbf16>, vector<8x128xf32> -> vector<8x128xf32>
    %14 = arith.truncf %1 : vector<8x128xf32> to vector<8x128xbf16>
    %cst_20 = arith.constant dense<0.000000e+00> : vector<8x128xf32>
    %15 = tpu.matmul %14, %7, %cst_20 {dimension_numbers = #tpu.dot_dimension_numbers<[1], [0], [0], [1], [0, 0, 1, 1], [], []>} : vector<8x128xbf16>, vector<128x128xbf16>, vector<8x128xf32> -> vector<8x128xf32>
    %16 = arith.truncf %1 : vector<8x128xf32> to vector<8x128xbf16>
    %cst_21 = arith.constant dense<0.000000e+00> : vector<8x128xf32>
    %17 = tpu.matmul %16, %8, %cst_21 {dimension_numbers = #tpu.dot_dimension_numbers<[1], [0], [0], [1], [0, 0, 1, 1], [], []>} : vector<8x128xbf16>, vector<128x128xbf16>, vector<8x128xf32> -> vector<8x128xf32>
    %cst_22 = arith.constant 0.000000e+00 : f32
    %18 = vector.broadcast %cst_22 : f32 to vector<8x8xf32>
    %19 = arith.cmpf oeq, %11, %18 : vector<8x8xf32>
    %cst_23 = arith.constant 0.000000e+00 : f32
    %20 = vector.broadcast %cst_23 : f32 to vector<8x128xf32>
    %21 = vector.extract_strided_slice %13 {offsets = [0, 0], sizes = [8, 16], strides = [1, 1]} : vector<8x128xf32> to vector<8x16xf32>
    %22 = vector.extract_strided_slice %15 {offsets = [0, 0], sizes = [8, 16], strides = [1, 1]} : vector<8x128xf32> to vector<8x16xf32>
    %23 = vector.extract_strided_slice %17 {offsets = [0, 0], sizes = [8, 16], strides = [1, 1]} : vector<8x128xf32> to vector<8x16xf32>
    %cst_24 = arith.constant dense<0.000000e+00> : vector<8x8xf32>
    %24 = tpu.matmul %21, %22, %cst_24 {dimension_numbers = #tpu.dot_dimension_numbers<[1], [1], [0], [0], [0, 0, 1, 0], [], []>} : vector<8x16xf32>, vector<8x16xf32>, vector<8x8xf32> -> vector<8x8xf32>
    %cst_25 = arith.constant -1.000000e+20 : f32
    %25 = vector.broadcast %cst_25 : f32 to vector<8x8xf32>
    %26 = arith.select %19, %25, %24 : vector<8x8xi1>, vector<8x8xf32>
    %cst_26 = arith.constant 2.500000e-01 : f32
    %27 = vector.broadcast %cst_26 : f32 to vector<8x8xf32>
    %28 = arith.mulf %26, %27 : vector<8x8xf32>
    %cst_27 = arith.constant dense<0xFF800000> : vector<8xf32>
    %29 = vector.multi_reduction <maximumf>, %28, %cst_27 [1] : vector<8x8xf32> to vector<8xf32>
    %30 = vector.shape_cast %29 : vector<8xf32> to vector<8x1xf32>
    %31 = vector.broadcast %30 : vector<8x1xf32> to vector<8x8xf32>
    %32 = arith.subf %28, %31 : vector<8x8xf32>
    %33 = math.exp %32 : vector<8x8xf32>
    %cst_28 = arith.constant dense<0.000000e+00> : vector<8xf32>
    %34 = vector.multi_reduction <add>, %33, %cst_28 [1] : vector<8x8xf32> to vector<8xf32>
    %35 = vector.shape_cast %34 : vector<8xf32> to vector<8x1xf32>
    %36 = tpu.reciprocal %35 {approx = true} : vector<8x1xf32> -> vector<8x1xf32>
    %37 = vector.broadcast %36 : vector<8x1xf32> to vector<8x8xf32>
    %38 = arith.mulf %33, %37 : vector<8x8xf32>
    %cst_29 = arith.constant dense<0.000000e+00> : vector<8x16xf32>
    %39 = tpu.matmul %38, %23, %cst_29 {dimension_numbers = #tpu.dot_dimension_numbers<[1], [0], [0], [1], [0, 0, 1, 1], [], []>} : vector<8x8xf32>, vector<8x16xf32>, vector<8x16xf32> -> vector<8x16xf32>
    %40 = arith.truncf %39 : vector<8x16xf32> to vector<8x16xbf16>
    %41 = vector.extract_strided_slice %9 {offsets = [0, 0], sizes = [16, 128], strides = [1, 1]} : vector<128x128xbf16> to vector<16x128xbf16>
    %cst_30 = arith.constant dense<0.000000e+00> : vector<8x128xf32>
    %42 = tpu.matmul %40, %41, %cst_30 {dimension_numbers = #tpu.dot_dimension_numbers<[1], [0], [0], [1], [0, 0, 1, 1], [], []>} : vector<8x16xbf16>, vector<16x128xbf16>, vector<8x128xf32> -> vector<8x128xf32>
    %43 = arith.addf %20, %42 : vector<8x128xf32>
    %44 = vector.extract_strided_slice %13 {offsets = [0, 16], sizes = [8, 16], strides = [1, 1]} : vector<8x128xf32> to vector<8x16xf32>
    %45 = vector.extract_strided_slice %15 {offsets = [0, 16], sizes = [8, 16], strides = [1, 1]} : vector<8x128xf32> to vector<8x16xf32>
    %46 = vector.extract_strided_slice %17 {offsets = [0, 16], sizes = [8, 16], strides = [1, 1]} : vector<8x128xf32> to vector<8x16xf32>
    %cst_31 = arith.constant dense<0.000000e+00> : vector<8x8xf32>
    %47 = tpu.matmul %44, %45, %cst_31 {dimension_numbers = #tpu.dot_dimension_numbers<[1], [1], [0], [0], [0, 0, 1, 0], [], []>} : vector<8x16xf32>, vector<8x16xf32>, vector<8x8xf32> -> vector<8x8xf32>
    %cst_32 = arith.constant -1.000000e+20 : f32
    %48 = vector.broadcast %cst_32 : f32 to vector<8x8xf32>
    %49 = arith.select %19, %48, %47 : vector<8x8xi1>, vector<8x8xf32>
    %cst_33 = arith.constant 2.500000e-01 : f32
    %50 = vector.broadcast %cst_33 : f32 to vector<8x8xf32>
    %51 = arith.mulf %49, %50 : vector<8x8xf32>
    %cst_34 = arith.constant dense<0xFF800000> : vector<8xf32>
    %52 = vector.multi_reduction <maximumf>, %51, %cst_34 [1] : vector<8x8xf32> to vector<8xf32>
    %53 = vector.shape_cast %52 : vector<8xf32> to vector<8x1xf32>
    %54 = vector.broadcast %53 : vector<8x1xf32> to vector<8x8xf32>
    %55 = arith.subf %51, %54 : vector<8x8xf32>
    %56 = math.exp %55 : vector<8x8xf32>
    %cst_35 = arith.constant dense<0.000000e+00> : vector<8xf32>
    %57 = vector.multi_reduction <add>, %56, %cst_35 [1] : vector<8x8xf32> to vector<8xf32>
    %58 = vector.shape_cast %57 : vector<8xf32> to vector<8x1xf32>
    %59 = tpu.reciprocal %58 {approx = true} : vector<8x1xf32> -> vector<8x1xf32>
    %60 = vector.broadcast %59 : vector<8x1xf32> to vector<8x8xf32>
    %61 = arith.mulf %56, %60 : vector<8x8xf32>
    %cst_36 = arith.constant dense<0.000000e+00> : vector<8x16xf32>
    %62 = tpu.matmul %61, %46, %cst_36 {dimension_numbers = #tpu.dot_dimension_numbers<[1], [0], [0], [1], [0, 0, 1, 1], [], []>} : vector<8x8xf32>, vector<8x16xf32>, vector<8x16xf32> -> vector<8x16xf32>
    %63 = arith.truncf %62 : vector<8x16xf32> to vector<8x16xbf16>
    %64 = vector.extract_strided_slice %9 {offsets = [16, 0], sizes = [16, 128], strides = [1, 1]} : vector<128x128xbf16> to vector<16x128xbf16>
    %cst_37 = arith.constant dense<0.000000e+00> : vector<8x128xf32>
    %65 = tpu.matmul %63, %64, %cst_37 {dimension_numbers = #tpu.dot_dimension_numbers<[1], [0], [0], [1], [0, 0, 1, 1], [], []>} : vector<8x16xbf16>, vector<16x128xbf16>, vector<8x128xf32> -> vector<8x128xf32>
    %66 = arith.addf %43, %65 : vector<8x128xf32>
    %67 = vector.extract_strided_slice %13 {offsets = [0, 32], sizes = [8, 16], strides = [1, 1]} : vector<8x128xf32> to vector<8x16xf32>
    %68 = vector.extract_strided_slice %15 {offsets = [0, 32], sizes = [8, 16], strides = [1, 1]} : vector<8x128xf32> to vector<8x16xf32>
    %69 = vector.extract_strided_slice %17 {offsets = [0, 32], sizes = [8, 16], strides = [1, 1]} : vector<8x128xf32> to vector<8x16xf32>
    %cst_38 = arith.constant dense<0.000000e+00> : vector<8x8xf32>
    %70 = tpu.matmul %67, %68, %cst_38 {dimension_numbers = #tpu.dot_dimension_numbers<[1], [1], [0], [0], [0, 0, 1, 0], [], []>} : vector<8x16xf32>, vector<8x16xf32>, vector<8x8xf32> -> vector<8x8xf32>
    %cst_39 = arith.constant -1.000000e+20 : f32
    %71 = vector.broadcast %cst_39 : f32 to vector<8x8xf32>
    %72 = arith.select %19, %71, %70 : vector<8x8xi1>, vector<8x8xf32>
    %cst_40 = arith.constant 2.500000e-01 : f32
    %73 = vector.broadcast %cst_40 : f32 to vector<8x8xf32>
    %74 = arith.mulf %72, %73 : vector<8x8xf32>
    %cst_41 = arith.constant dense<0xFF800000> : vector<8xf32>
    %75 = vector.multi_reduction <maximumf>, %74, %cst_41 [1] : vector<8x8xf32> to vector<8xf32>
    %76 = vector.shape_cast %75 : vector<8xf32> to vector<8x1xf32>
    %77 = vector.broadcast %76 : vector<8x1xf32> to vector<8x8xf32>
    %78 = arith.subf %74, %77 : vector<8x8xf32>
    %79 = math.exp %78 : vector<8x8xf32>
    %cst_42 = arith.constant dense<0.000000e+00> : vector<8xf32>
    %80 = vector.multi_reduction <add>, %79, %cst_42 [1] : vector<8x8xf32> to vector<8xf32>
    %81 = vector.shape_cast %80 : vector<8xf32> to vector<8x1xf32>
    %82 = tpu.reciprocal %81 {approx = true} : vector<8x1xf32> -> vector<8x1xf32>
    %83 = vector.broadcast %82 : vector<8x1xf32> to vector<8x8xf32>
    %84 = arith.mulf %79, %83 : vector<8x8xf32>
    %cst_43 = arith.constant dense<0.000000e+00> : vector<8x16xf32>
    %85 = tpu.matmul %84, %69, %cst_43 {dimension_numbers = #tpu.dot_dimension_numbers<[1], [0], [0], [1], [0, 0, 1, 1], [], []>} : vector<8x8xf32>, vector<8x16xf32>, vector<8x16xf32> -> vector<8x16xf32>
    %86 = arith.truncf %85 : vector<8x16xf32> to vector<8x16xbf16>
    %87 = vector.extract_strided_slice %9 {offsets = [32, 0], sizes = [16, 128], strides = [1, 1]} : vector<128x128xbf16> to vector<16x128xbf16>
    %cst_44 = arith.constant dense<0.000000e+00> : vector<8x128xf32>
    %88 = tpu.matmul %86, %87, %cst_44 {dimension_numbers = #tpu.dot_dimension_numbers<[1], [0], [0], [1], [0, 0, 1, 1], [], []>} : vector<8x16xbf16>, vector<16x128xbf16>, vector<8x128xf32> -> vector<8x128xf32>
    %89 = arith.addf %66, %88 : vector<8x128xf32>
    %90 = vector.extract_strided_slice %13 {offsets = [0, 48], sizes = [8, 16], strides = [1, 1]} : vector<8x128xf32> to vector<8x16xf32>
    %91 = vector.extract_strided_slice %15 {offsets = [0, 48], sizes = [8, 16], strides = [1, 1]} : vector<8x128xf32> to vector<8x16xf32>
    %92 = vector.extract_strided_slice %17 {offsets = [0, 48], sizes = [8, 16], strides = [1, 1]} : vector<8x128xf32> to vector<8x16xf32>
    %cst_45 = arith.constant dense<0.000000e+00> : vector<8x8xf32>
    %93 = tpu.matmul %90, %91, %cst_45 {dimension_numbers = #tpu.dot_dimension_numbers<[1], [1], [0], [0], [0, 0, 1, 0], [], []>} : vector<8x16xf32>, vector<8x16xf32>, vector<8x8xf32> -> vector<8x8xf32>
    %cst_46 = arith.constant -1.000000e+20 : f32
    %94 = vector.broadcast %cst_46 : f32 to vector<8x8xf32>
    %95 = arith.select %19, %94, %93 : vector<8x8xi1>, vector<8x8xf32>
    %cst_47 = arith.constant 2.500000e-01 : f32
    %96 = vector.broadcast %cst_47 : f32 to vector<8x8xf32>
    %97 = arith.mulf %95, %96 : vector<8x8xf32>
    %cst_48 = arith.constant dense<0xFF800000> : vector<8xf32>
    %98 = vector.multi_reduction <maximumf>, %97, %cst_48 [1] : vector<8x8xf32> to vector<8xf32>
    %99 = vector.shape_cast %98 : vector<8xf32> to vector<8x1xf32>
    %100 = vector.broadcast %99 : vector<8x1xf32> to vector<8x8xf32>
    %101 = arith.subf %97, %100 : vector<8x8xf32>
    %102 = math.exp %101 : vector<8x8xf32>
    %cst_49 = arith.constant dense<0.000000e+00> : vector<8xf32>
    %103 = vector.multi_reduction <add>, %102, %cst_49 [1] : vector<8x8xf32> to vector<8xf32>
    %104 = vector.shape_cast %103 : vector<8xf32> to vector<8x1xf32>
    %105 = tpu.reciprocal %104 {approx = true} : vector<8x1xf32> -> vector<8x1xf32>
    %106 = vector.broadcast %105 : vector<8x1xf32> to vector<8x8xf32>
    %107 = arith.mulf %102, %106 : vector<8x8xf32>
    %cst_50 = arith.constant dense<0.000000e+00> : vector<8x16xf32>
    %108 = tpu.matmul %107, %92, %cst_50 {dimension_numbers = #tpu.dot_dimension_numbers<[1], [0], [0], [1], [0, 0, 1, 1], [], []>} : vector<8x8xf32>, vector<8x16xf32>, vector<8x16xf32> -> vector<8x16xf32>
    %109 = arith.truncf %108 : vector<8x16xf32> to vector<8x16xbf16>
    %110 = vector.extract_strided_slice %9 {offsets = [48, 0], sizes = [16, 128], strides = [1, 1]} : vector<128x128xbf16> to vector<16x128xbf16>
    %cst_51 = arith.constant dense<0.000000e+00> : vector<8x128xf32>
    %111 = tpu.matmul %109, %110, %cst_51 {dimension_numbers = #tpu.dot_dimension_numbers<[1], [0], [0], [1], [0, 0, 1, 1], [], []>} : vector<8x16xbf16>, vector<16x128xbf16>, vector<8x128xf32> -> vector<8x128xf32>
    %112 = arith.addf %89, %111 : vector<8x128xf32>
    %113 = vector.extract_strided_slice %13 {offsets = [0, 64], sizes = [8, 16], strides = [1, 1]} : vector<8x128xf32> to vector<8x16xf32>
    %114 = vector.extract_strided_slice %15 {offsets = [0, 64], sizes = [8, 16], strides = [1, 1]} : vector<8x128xf32> to vector<8x16xf32>
    %115 = vector.extract_strided_slice %17 {offsets = [0, 64], sizes = [8, 16], strides = [1, 1]} : vector<8x128xf32> to vector<8x16xf32>
    %cst_52 = arith.constant dense<0.000000e+00> : vector<8x8xf32>
    %116 = tpu.matmul %113, %114, %cst_52 {dimension_numbers = #tpu.dot_dimension_numbers<[1], [1], [0], [0], [0, 0, 1, 0], [], []>} : vector<8x16xf32>, vector<8x16xf32>, vector<8x8xf32> -> vector<8x8xf32>
    %cst_53 = arith.constant -1.000000e+20 : f32
    %117 = vector.broadcast %cst_53 : f32 to vector<8x8xf32>
    %118 = arith.select %19, %117, %116 : vector<8x8xi1>, vector<8x8xf32>
    %cst_54 = arith.constant 2.500000e-01 : f32
    %119 = vector.broadcast %cst_54 : f32 to vector<8x8xf32>
    %120 = arith.mulf %118, %119 : vector<8x8xf32>
    %cst_55 = arith.constant dense<0xFF800000> : vector<8xf32>
    %121 = vector.multi_reduction <maximumf>, %120, %cst_55 [1] : vector<8x8xf32> to vector<8xf32>
    %122 = vector.shape_cast %121 : vector<8xf32> to vector<8x1xf32>
    %123 = vector.broadcast %122 : vector<8x1xf32> to vector<8x8xf32>
    %124 = arith.subf %120, %123 : vector<8x8xf32>
    %125 = math.exp %124 : vector<8x8xf32>
    %cst_56 = arith.constant dense<0.000000e+00> : vector<8xf32>
    %126 = vector.multi_reduction <add>, %125, %cst_56 [1] : vector<8x8xf32> to vector<8xf32>
    %127 = vector.shape_cast %126 : vector<8xf32> to vector<8x1xf32>
    %128 = tpu.reciprocal %127 {approx = true} : vector<8x1xf32> -> vector<8x1xf32>
    %129 = vector.broadcast %128 : vector<8x1xf32> to vector<8x8xf32>
    %130 = arith.mulf %125, %129 : vector<8x8xf32>
    %cst_57 = arith.constant dense<0.000000e+00> : vector<8x16xf32>
    %131 = tpu.matmul %130, %115, %cst_57 {dimension_numbers = #tpu.dot_dimension_numbers<[1], [0], [0], [1], [0, 0, 1, 1], [], []>} : vector<8x8xf32>, vector<8x16xf32>, vector<8x16xf32> -> vector<8x16xf32>
    %132 = arith.truncf %131 : vector<8x16xf32> to vector<8x16xbf16>
    %133 = vector.extract_strided_slice %9 {offsets = [64, 0], sizes = [16, 128], strides = [1, 1]} : vector<128x128xbf16> to vector<16x128xbf16>
    %cst_58 = arith.constant dense<0.000000e+00> : vector<8x128xf32>
    %134 = tpu.matmul %132, %133, %cst_58 {dimension_numbers = #tpu.dot_dimension_numbers<[1], [0], [0], [1], [0, 0, 1, 1], [], []>} : vector<8x16xbf16>, vector<16x128xbf16>, vector<8x128xf32> -> vector<8x128xf32>
    %135 = arith.addf %112, %134 : vector<8x128xf32>
    %136 = vector.extract_strided_slice %13 {offsets = [0, 80], sizes = [8, 16], strides = [1, 1]} : vector<8x128xf32> to vector<8x16xf32>
    %137 = vector.extract_strided_slice %15 {offsets = [0, 80], sizes = [8, 16], strides = [1, 1]} : vector<8x128xf32> to vector<8x16xf32>
    %138 = vector.extract_strided_slice %17 {offsets = [0, 80], sizes = [8, 16], strides = [1, 1]} : vector<8x128xf32> to vector<8x16xf32>
    %cst_59 = arith.constant dense<0.000000e+00> : vector<8x8xf32>
    %139 = tpu.matmul %136, %137, %cst_59 {dimension_numbers = #tpu.dot_dimension_numbers<[1], [1], [0], [0], [0, 0, 1, 0], [], []>} : vector<8x16xf32>, vector<8x16xf32>, vector<8x8xf32> -> vector<8x8xf32>
    %cst_60 = arith.constant -1.000000e+20 : f32
    %140 = vector.broadcast %cst_60 : f32 to vector<8x8xf32>
    %141 = arith.select %19, %140, %139 : vector<8x8xi1>, vector<8x8xf32>
    %cst_61 = arith.constant 2.500000e-01 : f32
    %142 = vector.broadcast %cst_61 : f32 to vector<8x8xf32>
    %143 = arith.mulf %141, %142 : vector<8x8xf32>
    %cst_62 = arith.constant dense<0xFF800000> : vector<8xf32>
    %144 = vector.multi_reduction <maximumf>, %143, %cst_62 [1] : vector<8x8xf32> to vector<8xf32>
    %145 = vector.shape_cast %144 : vector<8xf32> to vector<8x1xf32>
    %146 = vector.broadcast %145 : vector<8x1xf32> to vector<8x8xf32>
    %147 = arith.subf %143, %146 : vector<8x8xf32>
    %148 = math.exp %147 : vector<8x8xf32>
    %cst_63 = arith.constant dense<0.000000e+00> : vector<8xf32>
    %149 = vector.multi_reduction <add>, %148, %cst_63 [1] : vector<8x8xf32> to vector<8xf32>
    %150 = vector.shape_cast %149 : vector<8xf32> to vector<8x1xf32>
    %151 = tpu.reciprocal %150 {approx = true} : vector<8x1xf32> -> vector<8x1xf32>
    %152 = vector.broadcast %151 : vector<8x1xf32> to vector<8x8xf32>
    %153 = arith.mulf %148, %152 : vector<8x8xf32>
    %cst_64 = arith.constant dense<0.000000e+00> : vector<8x16xf32>
    %154 = tpu.matmul %153, %138, %cst_64 {dimension_numbers = #tpu.dot_dimension_numbers<[1], [0], [0], [1], [0, 0, 1, 1], [], []>} : vector<8x8xf32>, vector<8x16xf32>, vector<8x16xf32> -> vector<8x16xf32>
    %155 = arith.truncf %154 : vector<8x16xf32> to vector<8x16xbf16>
    %156 = vector.extract_strided_slice %9 {offsets = [80, 0], sizes = [16, 128], strides = [1, 1]} : vector<128x128xbf16> to vector<16x128xbf16>
    %cst_65 = arith.constant dense<0.000000e+00> : vector<8x128xf32>
    %157 = tpu.matmul %155, %156, %cst_65 {dimension_numbers = #tpu.dot_dimension_numbers<[1], [0], [0], [1], [0, 0, 1, 1], [], []>} : vector<8x16xbf16>, vector<16x128xbf16>, vector<8x128xf32> -> vector<8x128xf32>
    %158 = arith.addf %135, %157 : vector<8x128xf32>
    %159 = vector.extract_strided_slice %13 {offsets = [0, 96], sizes = [8, 16], strides = [1, 1]} : vector<8x128xf32> to vector<8x16xf32>
    %160 = vector.extract_strided_slice %15 {offsets = [0, 96], sizes = [8, 16], strides = [1, 1]} : vector<8x128xf32> to vector<8x16xf32>
    %161 = vector.extract_strided_slice %17 {offsets = [0, 96], sizes = [8, 16], strides = [1, 1]} : vector<8x128xf32> to vector<8x16xf32>
    %cst_66 = arith.constant dense<0.000000e+00> : vector<8x8xf32>
    %162 = tpu.matmul %159, %160, %cst_66 {dimension_numbers = #tpu.dot_dimension_numbers<[1], [1], [0], [0], [0, 0, 1, 0], [], []>} : vector<8x16xf32>, vector<8x16xf32>, vector<8x8xf32> -> vector<8x8xf32>
    %cst_67 = arith.constant -1.000000e+20 : f32
    %163 = vector.broadcast %cst_67 : f32 to vector<8x8xf32>
    %164 = arith.select %19, %163, %162 : vector<8x8xi1>, vector<8x8xf32>
    %cst_68 = arith.constant 2.500000e-01 : f32
    %165 = vector.broadcast %cst_68 : f32 to vector<8x8xf32>
    %166 = arith.mulf %164, %165 : vector<8x8xf32>
    %cst_69 = arith.constant dense<0xFF800000> : vector<8xf32>
    %167 = vector.multi_reduction <maximumf>, %166, %cst_69 [1] : vector<8x8xf32> to vector<8xf32>
    %168 = vector.shape_cast %167 : vector<8xf32> to vector<8x1xf32>
    %169 = vector.broadcast %168 : vector<8x1xf32> to vector<8x8xf32>
    %170 = arith.subf %166, %169 : vector<8x8xf32>
    %171 = math.exp %170 : vector<8x8xf32>
    %cst_70 = arith.constant dense<0.000000e+00> : vector<8xf32>
    %172 = vector.multi_reduction <add>, %171, %cst_70 [1] : vector<8x8xf32> to vector<8xf32>
    %173 = vector.shape_cast %172 : vector<8xf32> to vector<8x1xf32>
    %174 = tpu.reciprocal %173 {approx = true} : vector<8x1xf32> -> vector<8x1xf32>
    %175 = vector.broadcast %174 : vector<8x1xf32> to vector<8x8xf32>
    %176 = arith.mulf %171, %175 : vector<8x8xf32>
    %cst_71 = arith.constant dense<0.000000e+00> : vector<8x16xf32>
    %177 = tpu.matmul %176, %161, %cst_71 {dimension_numbers = #tpu.dot_dimension_numbers<[1], [0], [0], [1], [0, 0, 1, 1], [], []>} : vector<8x8xf32>, vector<8x16xf32>, vector<8x16xf32> -> vector<8x16xf32>
    %178 = arith.truncf %177 : vector<8x16xf32> to vector<8x16xbf16>
    %179 = vector.extract_strided_slice %9 {offsets = [96, 0], sizes = [16, 128], strides = [1, 1]} : vector<128x128xbf16> to vector<16x128xbf16>
    %cst_72 = arith.constant dense<0.000000e+00> : vector<8x128xf32>
    %180 = tpu.matmul %178, %179, %cst_72 {dimension_numbers = #tpu.dot_dimension_numbers<[1], [0], [0], [1], [0, 0, 1, 1], [], []>} : vector<8x16xbf16>, vector<16x128xbf16>, vector<8x128xf32> -> vector<8x128xf32>
    %181 = arith.addf %158, %180 : vector<8x128xf32>
    %182 = vector.extract_strided_slice %13 {offsets = [0, 112], sizes = [8, 16], strides = [1, 1]} : vector<8x128xf32> to vector<8x16xf32>
    %183 = vector.extract_strided_slice %15 {offsets = [0, 112], sizes = [8, 16], strides = [1, 1]} : vector<8x128xf32> to vector<8x16xf32>
    %184 = vector.extract_strided_slice %17 {offsets = [0, 112], sizes = [8, 16], strides = [1, 1]} : vector<8x128xf32> to vector<8x16xf32>
    %cst_73 = arith.constant dense<0.000000e+00> : vector<8x8xf32>
    %185 = tpu.matmul %182, %183, %cst_73 {dimension_numbers = #tpu.dot_dimension_numbers<[1], [1], [0], [0], [0, 0, 1, 0], [], []>} : vector<8x16xf32>, vector<8x16xf32>, vector<8x8xf32> -> vector<8x8xf32>
    %cst_74 = arith.constant -1.000000e+20 : f32
    %186 = vector.broadcast %cst_74 : f32 to vector<8x8xf32>
    %187 = arith.select %19, %186, %185 : vector<8x8xi1>, vector<8x8xf32>
    %cst_75 = arith.constant 2.500000e-01 : f32
    %188 = vector.broadcast %cst_75 : f32 to vector<8x8xf32>
    %189 = arith.mulf %187, %188 : vector<8x8xf32>
    %cst_76 = arith.constant dense<0xFF800000> : vector<8xf32>
    %190 = vector.multi_reduction <maximumf>, %189, %cst_76 [1] : vector<8x8xf32> to vector<8xf32>
    %191 = vector.shape_cast %190 : vector<8xf32> to vector<8x1xf32>
    %192 = vector.broadcast %191 : vector<8x1xf32> to vector<8x8xf32>
    %193 = arith.subf %189, %192 : vector<8x8xf32>
    %194 = math.exp %193 : vector<8x8xf32>
    %cst_77 = arith.constant dense<0.000000e+00> : vector<8xf32>
    %195 = vector.multi_reduction <add>, %194, %cst_77 [1] : vector<8x8xf32> to vector<8xf32>
    %196 = vector.shape_cast %195 : vector<8xf32> to vector<8x1xf32>
    %197 = tpu.reciprocal %196 {approx = true} : vector<8x1xf32> -> vector<8x1xf32>
    %198 = vector.broadcast %197 : vector<8x1xf32> to vector<8x8xf32>
    %199 = arith.mulf %194, %198 : vector<8x8xf32>
    %cst_78 = arith.constant dense<0.000000e+00> : vector<8x16xf32>
    %200 = tpu.matmul %199, %184, %cst_78 {dimension_numbers = #tpu.dot_dimension_numbers<[1], [0], [0], [1], [0, 0, 1, 1], [], []>} : vector<8x8xf32>, vector<8x16xf32>, vector<8x16xf32> -> vector<8x16xf32>
    %201 = arith.truncf %200 : vector<8x16xf32> to vector<8x16xbf16>
    %202 = vector.extract_strided_slice %9 {offsets = [112, 0], sizes = [16, 128], strides = [1, 1]} : vector<128x128xbf16> to vector<16x128xbf16>
    %cst_79 = arith.constant dense<0.000000e+00> : vector<8x128xf32>
    %203 = tpu.matmul %201, %202, %cst_79 {dimension_numbers = #tpu.dot_dimension_numbers<[1], [0], [0], [1], [0, 0, 1, 1], [], []>} : vector<8x16xbf16>, vector<16x128xbf16>, vector<8x128xf32> -> vector<8x128xf32>
    %204 = arith.addf %181, %203 : vector<8x128xf32>
    %205 = vector.broadcast %10 : vector<1x128xf32> to vector<8x128xf32>
    %206 = arith.addf %204, %205 : vector<8x128xf32>
    %207 = arith.addf %206, %1 : vector<8x128xf32>
    %c0_80 = arith.constant 0 : index
    %c0_81 = arith.constant 0 : index
    %208 = vector.load %arg10[%c0_80, %c0_81] : memref<1x128xf32, #tpu.memory_space<vmem>>, vector<1x128xf32>
    %c0_82 = arith.constant 0 : index
    %c0_83 = arith.constant 0 : index
    %209 = vector.load %arg11[%c0_82, %c0_83] : memref<1x128xf32, #tpu.memory_space<vmem>>, vector<1x128xf32>
    %cst_84 = arith.constant dense<0.000000e+00> : vector<8xf32>
    %210 = vector.multi_reduction <add>, %207, %cst_84 [1] : vector<8x128xf32> to vector<8xf32>
    %211 = vector.shape_cast %210 : vector<8xf32> to vector<8x1xf32>
    %cst_85 = arith.constant 1.280000e+02 : f32
    %212 = vector.broadcast %cst_85 : f32 to vector<8x1xf32>
    %213 = arith.divf %211, %212 : vector<8x1xf32>
    %214 = vector.broadcast %213 : vector<8x1xf32> to vector<8x128xf32>
    %215 = arith.subf %207, %214 : vector<8x128xf32>
    %216 = arith.mulf %215, %215 : vector<8x128xf32>
    %cst_86 = arith.constant dense<0.000000e+00> : vector<8xf32>
    %217 = vector.multi_reduction <add>, %216, %cst_86 [1] : vector<8x128xf32> to vector<8xf32>
    %218 = vector.shape_cast %217 : vector<8xf32> to vector<8x1xf32>
    %cst_87 = arith.constant 1.280000e+02 : f32
    %219 = vector.broadcast %cst_87 : f32 to vector<8x1xf32>
    %220 = arith.divf %218, %219 : vector<8x1xf32>
    %cst_88 = arith.constant 9.99999974E-6 : f32
    %221 = vector.broadcast %cst_88 : f32 to vector<8x1xf32>
    %222 = arith.addf %220, %221 : vector<8x1xf32>
    %223 = math.rsqrt %222 : vector<8x1xf32>
    %224 = vector.broadcast %223 : vector<8x1xf32> to vector<8x128xf32>
    %225 = arith.mulf %215, %224 : vector<8x128xf32>
    %226 = vector.broadcast %208 : vector<1x128xf32> to vector<8x128xf32>
    %227 = arith.mulf %225, %226 : vector<8x128xf32>
    %228 = vector.broadcast %209 : vector<1x128xf32> to vector<8x128xf32>
    %229 = arith.addf %227, %228 : vector<8x128xf32>
    %c0_89 = arith.constant 0 : index
    %c0_90 = arith.constant 0 : index
    %230 = vector.load %arg12[%c0_89, %c0_90] : memref<128x128xbf16, #tpu.memory_space<vmem>>, vector<128x128xbf16>
    %c0_91 = arith.constant 0 : index
    %c0_92 = arith.constant 0 : index
    %231 = vector.load %arg13[%c0_91, %c0_92] : memref<128x128xbf16, #tpu.memory_space<vmem>>, vector<128x128xbf16>
    %c0_93 = arith.constant 0 : index
    %c0_94 = arith.constant 0 : index
    %232 = vector.load %arg14[%c0_93, %c0_94] : memref<128x128xbf16, #tpu.memory_space<vmem>>, vector<128x128xbf16>
    %c0_95 = arith.constant 0 : index
    %c0_96 = arith.constant 0 : index
    %233 = vector.load %arg15[%c0_95, %c0_96] : memref<128x128xbf16, #tpu.memory_space<vmem>>, vector<128x128xbf16>
    %c0_97 = arith.constant 0 : index
    %c0_98 = arith.constant 0 : index
    %234 = vector.load %arg16[%c0_97, %c0_98] : memref<1x128xf32, #tpu.memory_space<vmem>>, vector<1x128xf32>
    %235 = arith.truncf %5 : vector<8x128xf32> to vector<8x128xbf16>
    %cst_99 = arith.constant dense<0.000000e+00> : vector<8x128xf32>
    %236 = tpu.matmul %235, %230, %cst_99 {dimension_numbers = #tpu.dot_dimension_numbers<[1], [0], [0], [1], [0, 0, 1, 1], [], []>} : vector<8x128xbf16>, vector<128x128xbf16>, vector<8x128xf32> -> vector<8x128xf32>
    %237 = arith.truncf %3 : vector<8x128xf32> to vector<8x128xbf16>
    %cst_100 = arith.constant dense<0.000000e+00> : vector<8x128xf32>
    %238 = tpu.matmul %237, %231, %cst_100 {dimension_numbers = #tpu.dot_dimension_numbers<[1], [0], [0], [1], [0, 0, 1, 1], [], []>} : vector<8x128xbf16>, vector<128x128xbf16>, vector<8x128xf32> -> vector<8x128xf32>
    %239 = arith.truncf %229 : vector<8x128xf32> to vector<8x128xbf16>
    %cst_101 = arith.constant dense<0.000000e+00> : vector<8x128xf32>
    %240 = tpu.matmul %239, %232, %cst_101 {dimension_numbers = #tpu.dot_dimension_numbers<[1], [0], [0], [1], [0, 0, 1, 1], [], []>} : vector<8x128xbf16>, vector<128x128xbf16>, vector<8x128xf32> -> vector<8x128xf32>
    %cst_102 = arith.constant 0.000000e+00 : f32
    %241 = vector.broadcast %cst_102 : f32 to vector<8x128xf32>
    %242 = vector.extract_strided_slice %236 {offsets = [0, 0], sizes = [8, 16], strides = [1, 1]} : vector<8x128xf32> to vector<8x16xf32>
    %243 = vector.extract_strided_slice %238 {offsets = [0, 0], sizes = [8, 16], strides = [1, 1]} : vector<8x128xf32> to vector<8x16xf32>
    %244 = vector.extract_strided_slice %240 {offsets = [0, 0], sizes = [8, 16], strides = [1, 1]} : vector<8x128xf32> to vector<8x16xf32>
    %cst_103 = arith.constant dense<0.000000e+00> : vector<8x8xf32>
    %245 = tpu.matmul %242, %243, %cst_103 {dimension_numbers = #tpu.dot_dimension_numbers<[1], [1], [0], [0], [0, 0, 1, 0], [], []>} : vector<8x16xf32>, vector<8x16xf32>, vector<8x8xf32> -> vector<8x8xf32>
    %cst_104 = arith.constant 2.500000e-01 : f32
    %246 = vector.broadcast %cst_104 : f32 to vector<8x8xf32>
    %247 = arith.mulf %245, %246 : vector<8x8xf32>
    %cst_105 = arith.constant dense<0xFF800000> : vector<8xf32>
    %248 = vector.multi_reduction <maximumf>, %247, %cst_105 [1] : vector<8x8xf32> to vector<8xf32>
    %249 = vector.shape_cast %248 : vector<8xf32> to vector<8x1xf32>
    %250 = vector.broadcast %249 : vector<8x1xf32> to vector<8x8xf32>
    %251 = arith.subf %247, %250 : vector<8x8xf32>
    %252 = math.exp %251 : vector<8x8xf32>
    %cst_106 = arith.constant dense<0.000000e+00> : vector<8xf32>
    %253 = vector.multi_reduction <add>, %252, %cst_106 [1] : vector<8x8xf32> to vector<8xf32>
    %254 = vector.shape_cast %253 : vector<8xf32> to vector<8x1xf32>
    %255 = tpu.reciprocal %254 {approx = true} : vector<8x1xf32> -> vector<8x1xf32>
    %256 = vector.broadcast %255 : vector<8x1xf32> to vector<8x8xf32>
    %257 = arith.mulf %252, %256 : vector<8x8xf32>
    %cst_107 = arith.constant dense<0.000000e+00> : vector<8x16xf32>
    %258 = tpu.matmul %257, %244, %cst_107 {dimension_numbers = #tpu.dot_dimension_numbers<[1], [0], [0], [1], [0, 0, 1, 1], [], []>} : vector<8x8xf32>, vector<8x16xf32>, vector<8x16xf32> -> vector<8x16xf32>
    %259 = arith.truncf %258 : vector<8x16xf32> to vector<8x16xbf16>
    %260 = vector.extract_strided_slice %233 {offsets = [0, 0], sizes = [16, 128], strides = [1, 1]} : vector<128x128xbf16> to vector<16x128xbf16>
    %cst_108 = arith.constant dense<0.000000e+00> : vector<8x128xf32>
    %261 = tpu.matmul %259, %260, %cst_108 {dimension_numbers = #tpu.dot_dimension_numbers<[1], [0], [0], [1], [0, 0, 1, 1], [], []>} : vector<8x16xbf16>, vector<16x128xbf16>, vector<8x128xf32> -> vector<8x128xf32>
    %262 = arith.addf %241, %261 : vector<8x128xf32>
    %263 = vector.extract_strided_slice %236 {offsets = [0, 16], sizes = [8, 16], strides = [1, 1]} : vector<8x128xf32> to vector<8x16xf32>
    %264 = vector.extract_strided_slice %238 {offsets = [0, 16], sizes = [8, 16], strides = [1, 1]} : vector<8x128xf32> to vector<8x16xf32>
    %265 = vector.extract_strided_slice %240 {offsets = [0, 16], sizes = [8, 16], strides = [1, 1]} : vector<8x128xf32> to vector<8x16xf32>
    %cst_109 = arith.constant dense<0.000000e+00> : vector<8x8xf32>
    %266 = tpu.matmul %263, %264, %cst_109 {dimension_numbers = #tpu.dot_dimension_numbers<[1], [1], [0], [0], [0, 0, 1, 0], [], []>} : vector<8x16xf32>, vector<8x16xf32>, vector<8x8xf32> -> vector<8x8xf32>
    %cst_110 = arith.constant 2.500000e-01 : f32
    %267 = vector.broadcast %cst_110 : f32 to vector<8x8xf32>
    %268 = arith.mulf %266, %267 : vector<8x8xf32>
    %cst_111 = arith.constant dense<0xFF800000> : vector<8xf32>
    %269 = vector.multi_reduction <maximumf>, %268, %cst_111 [1] : vector<8x8xf32> to vector<8xf32>
    %270 = vector.shape_cast %269 : vector<8xf32> to vector<8x1xf32>
    %271 = vector.broadcast %270 : vector<8x1xf32> to vector<8x8xf32>
    %272 = arith.subf %268, %271 : vector<8x8xf32>
    %273 = math.exp %272 : vector<8x8xf32>
    %cst_112 = arith.constant dense<0.000000e+00> : vector<8xf32>
    %274 = vector.multi_reduction <add>, %273, %cst_112 [1] : vector<8x8xf32> to vector<8xf32>
    %275 = vector.shape_cast %274 : vector<8xf32> to vector<8x1xf32>
    %276 = tpu.reciprocal %275 {approx = true} : vector<8x1xf32> -> vector<8x1xf32>
    %277 = vector.broadcast %276 : vector<8x1xf32> to vector<8x8xf32>
    %278 = arith.mulf %273, %277 : vector<8x8xf32>
    %cst_113 = arith.constant dense<0.000000e+00> : vector<8x16xf32>
    %279 = tpu.matmul %278, %265, %cst_113 {dimension_numbers = #tpu.dot_dimension_numbers<[1], [0], [0], [1], [0, 0, 1, 1], [], []>} : vector<8x8xf32>, vector<8x16xf32>, vector<8x16xf32> -> vector<8x16xf32>
    %280 = arith.truncf %279 : vector<8x16xf32> to vector<8x16xbf16>
    %281 = vector.extract_strided_slice %233 {offsets = [16, 0], sizes = [16, 128], strides = [1, 1]} : vector<128x128xbf16> to vector<16x128xbf16>
    %cst_114 = arith.constant dense<0.000000e+00> : vector<8x128xf32>
    %282 = tpu.matmul %280, %281, %cst_114 {dimension_numbers = #tpu.dot_dimension_numbers<[1], [0], [0], [1], [0, 0, 1, 1], [], []>} : vector<8x16xbf16>, vector<16x128xbf16>, vector<8x128xf32> -> vector<8x128xf32>
    %283 = arith.addf %262, %282 : vector<8x128xf32>
    %284 = vector.extract_strided_slice %236 {offsets = [0, 32], sizes = [8, 16], strides = [1, 1]} : vector<8x128xf32> to vector<8x16xf32>
    %285 = vector.extract_strided_slice %238 {offsets = [0, 32], sizes = [8, 16], strides = [1, 1]} : vector<8x128xf32> to vector<8x16xf32>
    %286 = vector.extract_strided_slice %240 {offsets = [0, 32], sizes = [8, 16], strides = [1, 1]} : vector<8x128xf32> to vector<8x16xf32>
    %cst_115 = arith.constant dense<0.000000e+00> : vector<8x8xf32>
    %287 = tpu.matmul %284, %285, %cst_115 {dimension_numbers = #tpu.dot_dimension_numbers<[1], [1], [0], [0], [0, 0, 1, 0], [], []>} : vector<8x16xf32>, vector<8x16xf32>, vector<8x8xf32> -> vector<8x8xf32>
    %cst_116 = arith.constant 2.500000e-01 : f32
    %288 = vector.broadcast %cst_116 : f32 to vector<8x8xf32>
    %289 = arith.mulf %287, %288 : vector<8x8xf32>
    %cst_117 = arith.constant dense<0xFF800000> : vector<8xf32>
    %290 = vector.multi_reduction <maximumf>, %289, %cst_117 [1] : vector<8x8xf32> to vector<8xf32>
    %291 = vector.shape_cast %290 : vector<8xf32> to vector<8x1xf32>
    %292 = vector.broadcast %291 : vector<8x1xf32> to vector<8x8xf32>
    %293 = arith.subf %289, %292 : vector<8x8xf32>
    %294 = math.exp %293 : vector<8x8xf32>
    %cst_118 = arith.constant dense<0.000000e+00> : vector<8xf32>
    %295 = vector.multi_reduction <add>, %294, %cst_118 [1] : vector<8x8xf32> to vector<8xf32>
    %296 = vector.shape_cast %295 : vector<8xf32> to vector<8x1xf32>
    %297 = tpu.reciprocal %296 {approx = true} : vector<8x1xf32> -> vector<8x1xf32>
    %298 = vector.broadcast %297 : vector<8x1xf32> to vector<8x8xf32>
    %299 = arith.mulf %294, %298 : vector<8x8xf32>
    %cst_119 = arith.constant dense<0.000000e+00> : vector<8x16xf32>
    %300 = tpu.matmul %299, %286, %cst_119 {dimension_numbers = #tpu.dot_dimension_numbers<[1], [0], [0], [1], [0, 0, 1, 1], [], []>} : vector<8x8xf32>, vector<8x16xf32>, vector<8x16xf32> -> vector<8x16xf32>
    %301 = arith.truncf %300 : vector<8x16xf32> to vector<8x16xbf16>
    %302 = vector.extract_strided_slice %233 {offsets = [32, 0], sizes = [16, 128], strides = [1, 1]} : vector<128x128xbf16> to vector<16x128xbf16>
    %cst_120 = arith.constant dense<0.000000e+00> : vector<8x128xf32>
    %303 = tpu.matmul %301, %302, %cst_120 {dimension_numbers = #tpu.dot_dimension_numbers<[1], [0], [0], [1], [0, 0, 1, 1], [], []>} : vector<8x16xbf16>, vector<16x128xbf16>, vector<8x128xf32> -> vector<8x128xf32>
    %304 = arith.addf %283, %303 : vector<8x128xf32>
    %305 = vector.extract_strided_slice %236 {offsets = [0, 48], sizes = [8, 16], strides = [1, 1]} : vector<8x128xf32> to vector<8x16xf32>
    %306 = vector.extract_strided_slice %238 {offsets = [0, 48], sizes = [8, 16], strides = [1, 1]} : vector<8x128xf32> to vector<8x16xf32>
    %307 = vector.extract_strided_slice %240 {offsets = [0, 48], sizes = [8, 16], strides = [1, 1]} : vector<8x128xf32> to vector<8x16xf32>
    %cst_121 = arith.constant dense<0.000000e+00> : vector<8x8xf32>
    %308 = tpu.matmul %305, %306, %cst_121 {dimension_numbers = #tpu.dot_dimension_numbers<[1], [1], [0], [0], [0, 0, 1, 0], [], []>} : vector<8x16xf32>, vector<8x16xf32>, vector<8x8xf32> -> vector<8x8xf32>
    %cst_122 = arith.constant 2.500000e-01 : f32
    %309 = vector.broadcast %cst_122 : f32 to vector<8x8xf32>
    %310 = arith.mulf %308, %309 : vector<8x8xf32>
    %cst_123 = arith.constant dense<0xFF800000> : vector<8xf32>
    %311 = vector.multi_reduction <maximumf>, %310, %cst_123 [1] : vector<8x8xf32> to vector<8xf32>
    %312 = vector.shape_cast %311 : vector<8xf32> to vector<8x1xf32>
    %313 = vector.broadcast %312 : vector<8x1xf32> to vector<8x8xf32>
    %314 = arith.subf %310, %313 : vector<8x8xf32>
    %315 = math.exp %314 : vector<8x8xf32>
    %cst_124 = arith.constant dense<0.000000e+00> : vector<8xf32>
    %316 = vector.multi_reduction <add>, %315, %cst_124 [1] : vector<8x8xf32> to vector<8xf32>
    %317 = vector.shape_cast %316 : vector<8xf32> to vector<8x1xf32>
    %318 = tpu.reciprocal %317 {approx = true} : vector<8x1xf32> -> vector<8x1xf32>
    %319 = vector.broadcast %318 : vector<8x1xf32> to vector<8x8xf32>
    %320 = arith.mulf %315, %319 : vector<8x8xf32>
    %cst_125 = arith.constant dense<0.000000e+00> : vector<8x16xf32>
    %321 = tpu.matmul %320, %307, %cst_125 {dimension_numbers = #tpu.dot_dimension_numbers<[1], [0], [0], [1], [0, 0, 1, 1], [], []>} : vector<8x8xf32>, vector<8x16xf32>, vector<8x16xf32> -> vector<8x16xf32>
    %322 = arith.truncf %321 : vector<8x16xf32> to vector<8x16xbf16>
    %323 = vector.extract_strided_slice %233 {offsets = [48, 0], sizes = [16, 128], strides = [1, 1]} : vector<128x128xbf16> to vector<16x128xbf16>
    %cst_126 = arith.constant dense<0.000000e+00> : vector<8x128xf32>
    %324 = tpu.matmul %322, %323, %cst_126 {dimension_numbers = #tpu.dot_dimension_numbers<[1], [0], [0], [1], [0, 0, 1, 1], [], []>} : vector<8x16xbf16>, vector<16x128xbf16>, vector<8x128xf32> -> vector<8x128xf32>
    %325 = arith.addf %304, %324 : vector<8x128xf32>
    %326 = vector.extract_strided_slice %236 {offsets = [0, 64], sizes = [8, 16], strides = [1, 1]} : vector<8x128xf32> to vector<8x16xf32>
    %327 = vector.extract_strided_slice %238 {offsets = [0, 64], sizes = [8, 16], strides = [1, 1]} : vector<8x128xf32> to vector<8x16xf32>
    %328 = vector.extract_strided_slice %240 {offsets = [0, 64], sizes = [8, 16], strides = [1, 1]} : vector<8x128xf32> to vector<8x16xf32>
    %cst_127 = arith.constant dense<0.000000e+00> : vector<8x8xf32>
    %329 = tpu.matmul %326, %327, %cst_127 {dimension_numbers = #tpu.dot_dimension_numbers<[1], [1], [0], [0], [0, 0, 1, 0], [], []>} : vector<8x16xf32>, vector<8x16xf32>, vector<8x8xf32> -> vector<8x8xf32>
    %cst_128 = arith.constant 2.500000e-01 : f32
    %330 = vector.broadcast %cst_128 : f32 to vector<8x8xf32>
    %331 = arith.mulf %329, %330 : vector<8x8xf32>
    %cst_129 = arith.constant dense<0xFF800000> : vector<8xf32>
    %332 = vector.multi_reduction <maximumf>, %331, %cst_129 [1] : vector<8x8xf32> to vector<8xf32>
    %333 = vector.shape_cast %332 : vector<8xf32> to vector<8x1xf32>
    %334 = vector.broadcast %333 : vector<8x1xf32> to vector<8x8xf32>
    %335 = arith.subf %331, %334 : vector<8x8xf32>
    %336 = math.exp %335 : vector<8x8xf32>
    %cst_130 = arith.constant dense<0.000000e+00> : vector<8xf32>
    %337 = vector.multi_reduction <add>, %336, %cst_130 [1] : vector<8x8xf32> to vector<8xf32>
    %338 = vector.shape_cast %337 : vector<8xf32> to vector<8x1xf32>
    %339 = tpu.reciprocal %338 {approx = true} : vector<8x1xf32> -> vector<8x1xf32>
    %340 = vector.broadcast %339 : vector<8x1xf32> to vector<8x8xf32>
    %341 = arith.mulf %336, %340 : vector<8x8xf32>
    %cst_131 = arith.constant dense<0.000000e+00> : vector<8x16xf32>
    %342 = tpu.matmul %341, %328, %cst_131 {dimension_numbers = #tpu.dot_dimension_numbers<[1], [0], [0], [1], [0, 0, 1, 1], [], []>} : vector<8x8xf32>, vector<8x16xf32>, vector<8x16xf32> -> vector<8x16xf32>
    %343 = arith.truncf %342 : vector<8x16xf32> to vector<8x16xbf16>
    %344 = vector.extract_strided_slice %233 {offsets = [64, 0], sizes = [16, 128], strides = [1, 1]} : vector<128x128xbf16> to vector<16x128xbf16>
    %cst_132 = arith.constant dense<0.000000e+00> : vector<8x128xf32>
    %345 = tpu.matmul %343, %344, %cst_132 {dimension_numbers = #tpu.dot_dimension_numbers<[1], [0], [0], [1], [0, 0, 1, 1], [], []>} : vector<8x16xbf16>, vector<16x128xbf16>, vector<8x128xf32> -> vector<8x128xf32>
    %346 = arith.addf %325, %345 : vector<8x128xf32>
    %347 = vector.extract_strided_slice %236 {offsets = [0, 80], sizes = [8, 16], strides = [1, 1]} : vector<8x128xf32> to vector<8x16xf32>
    %348 = vector.extract_strided_slice %238 {offsets = [0, 80], sizes = [8, 16], strides = [1, 1]} : vector<8x128xf32> to vector<8x16xf32>
    %349 = vector.extract_strided_slice %240 {offsets = [0, 80], sizes = [8, 16], strides = [1, 1]} : vector<8x128xf32> to vector<8x16xf32>
    %cst_133 = arith.constant dense<0.000000e+00> : vector<8x8xf32>
    %350 = tpu.matmul %347, %348, %cst_133 {dimension_numbers = #tpu.dot_dimension_numbers<[1], [1], [0], [0], [0, 0, 1, 0], [], []>} : vector<8x16xf32>, vector<8x16xf32>, vector<8x8xf32> -> vector<8x8xf32>
    %cst_134 = arith.constant 2.500000e-01 : f32
    %351 = vector.broadcast %cst_134 : f32 to vector<8x8xf32>
    %352 = arith.mulf %350, %351 : vector<8x8xf32>
    %cst_135 = arith.constant dense<0xFF800000> : vector<8xf32>
    %353 = vector.multi_reduction <maximumf>, %352, %cst_135 [1] : vector<8x8xf32> to vector<8xf32>
    %354 = vector.shape_cast %353 : vector<8xf32> to vector<8x1xf32>
    %355 = vector.broadcast %354 : vector<8x1xf32> to vector<8x8xf32>
    %356 = arith.subf %352, %355 : vector<8x8xf32>
    %357 = math.exp %356 : vector<8x8xf32>
    %cst_136 = arith.constant dense<0.000000e+00> : vector<8xf32>
    %358 = vector.multi_reduction <add>, %357, %cst_136 [1] : vector<8x8xf32> to vector<8xf32>
    %359 = vector.shape_cast %358 : vector<8xf32> to vector<8x1xf32>
    %360 = tpu.reciprocal %359 {approx = true} : vector<8x1xf32> -> vector<8x1xf32>
    %361 = vector.broadcast %360 : vector<8x1xf32> to vector<8x8xf32>
    %362 = arith.mulf %357, %361 : vector<8x8xf32>
    %cst_137 = arith.constant dense<0.000000e+00> : vector<8x16xf32>
    %363 = tpu.matmul %362, %349, %cst_137 {dimension_numbers = #tpu.dot_dimension_numbers<[1], [0], [0], [1], [0, 0, 1, 1], [], []>} : vector<8x8xf32>, vector<8x16xf32>, vector<8x16xf32> -> vector<8x16xf32>
    %364 = arith.truncf %363 : vector<8x16xf32> to vector<8x16xbf16>
    %365 = vector.extract_strided_slice %233 {offsets = [80, 0], sizes = [16, 128], strides = [1, 1]} : vector<128x128xbf16> to vector<16x128xbf16>
    %cst_138 = arith.constant dense<0.000000e+00> : vector<8x128xf32>
    %366 = tpu.matmul %364, %365, %cst_138 {dimension_numbers = #tpu.dot_dimension_numbers<[1], [0], [0], [1], [0, 0, 1, 1], [], []>} : vector<8x16xbf16>, vector<16x128xbf16>, vector<8x128xf32> -> vector<8x128xf32>
    %367 = arith.addf %346, %366 : vector<8x128xf32>
    %368 = vector.extract_strided_slice %236 {offsets = [0, 96], sizes = [8, 16], strides = [1, 1]} : vector<8x128xf32> to vector<8x16xf32>
    %369 = vector.extract_strided_slice %238 {offsets = [0, 96], sizes = [8, 16], strides = [1, 1]} : vector<8x128xf32> to vector<8x16xf32>
    %370 = vector.extract_strided_slice %240 {offsets = [0, 96], sizes = [8, 16], strides = [1, 1]} : vector<8x128xf32> to vector<8x16xf32>
    %cst_139 = arith.constant dense<0.000000e+00> : vector<8x8xf32>
    %371 = tpu.matmul %368, %369, %cst_139 {dimension_numbers = #tpu.dot_dimension_numbers<[1], [1], [0], [0], [0, 0, 1, 0], [], []>} : vector<8x16xf32>, vector<8x16xf32>, vector<8x8xf32> -> vector<8x8xf32>
    %cst_140 = arith.constant 2.500000e-01 : f32
    %372 = vector.broadcast %cst_140 : f32 to vector<8x8xf32>
    %373 = arith.mulf %371, %372 : vector<8x8xf32>
    %cst_141 = arith.constant dense<0xFF800000> : vector<8xf32>
    %374 = vector.multi_reduction <maximumf>, %373, %cst_141 [1] : vector<8x8xf32> to vector<8xf32>
    %375 = vector.shape_cast %374 : vector<8xf32> to vector<8x1xf32>
    %376 = vector.broadcast %375 : vector<8x1xf32> to vector<8x8xf32>
    %377 = arith.subf %373, %376 : vector<8x8xf32>
    %378 = math.exp %377 : vector<8x8xf32>
    %cst_142 = arith.constant dense<0.000000e+00> : vector<8xf32>
    %379 = vector.multi_reduction <add>, %378, %cst_142 [1] : vector<8x8xf32> to vector<8xf32>
    %380 = vector.shape_cast %379 : vector<8xf32> to vector<8x1xf32>
    %381 = tpu.reciprocal %380 {approx = true} : vector<8x1xf32> -> vector<8x1xf32>
    %382 = vector.broadcast %381 : vector<8x1xf32> to vector<8x8xf32>
    %383 = arith.mulf %378, %382 : vector<8x8xf32>
    %cst_143 = arith.constant dense<0.000000e+00> : vector<8x16xf32>
    %384 = tpu.matmul %383, %370, %cst_143 {dimension_numbers = #tpu.dot_dimension_numbers<[1], [0], [0], [1], [0, 0, 1, 1], [], []>} : vector<8x8xf32>, vector<8x16xf32>, vector<8x16xf32> -> vector<8x16xf32>
    %385 = arith.truncf %384 : vector<8x16xf32> to vector<8x16xbf16>
    %386 = vector.extract_strided_slice %233 {offsets = [96, 0], sizes = [16, 128], strides = [1, 1]} : vector<128x128xbf16> to vector<16x128xbf16>
    %cst_144 = arith.constant dense<0.000000e+00> : vector<8x128xf32>
    %387 = tpu.matmul %385, %386, %cst_144 {dimension_numbers = #tpu.dot_dimension_numbers<[1], [0], [0], [1], [0, 0, 1, 1], [], []>} : vector<8x16xbf16>, vector<16x128xbf16>, vector<8x128xf32> -> vector<8x128xf32>
    %388 = arith.addf %367, %387 : vector<8x128xf32>
    %389 = vector.extract_strided_slice %236 {offsets = [0, 112], sizes = [8, 16], strides = [1, 1]} : vector<8x128xf32> to vector<8x16xf32>
    %390 = vector.extract_strided_slice %238 {offsets = [0, 112], sizes = [8, 16], strides = [1, 1]} : vector<8x128xf32> to vector<8x16xf32>
    %391 = vector.extract_strided_slice %240 {offsets = [0, 112], sizes = [8, 16], strides = [1, 1]} : vector<8x128xf32> to vector<8x16xf32>
    %cst_145 = arith.constant dense<0.000000e+00> : vector<8x8xf32>
    %392 = tpu.matmul %389, %390, %cst_145 {dimension_numbers = #tpu.dot_dimension_numbers<[1], [1], [0], [0], [0, 0, 1, 0], [], []>} : vector<8x16xf32>, vector<8x16xf32>, vector<8x8xf32> -> vector<8x8xf32>
    %cst_146 = arith.constant 2.500000e-01 : f32
    %393 = vector.broadcast %cst_146 : f32 to vector<8x8xf32>
    %394 = arith.mulf %392, %393 : vector<8x8xf32>
    %cst_147 = arith.constant dense<0xFF800000> : vector<8xf32>
    %395 = vector.multi_reduction <maximumf>, %394, %cst_147 [1] : vector<8x8xf32> to vector<8xf32>
    %396 = vector.shape_cast %395 : vector<8xf32> to vector<8x1xf32>
    %397 = vector.broadcast %396 : vector<8x1xf32> to vector<8x8xf32>
    %398 = arith.subf %394, %397 : vector<8x8xf32>
    %399 = math.exp %398 : vector<8x8xf32>
    %cst_148 = arith.constant dense<0.000000e+00> : vector<8xf32>
    %400 = vector.multi_reduction <add>, %399, %cst_148 [1] : vector<8x8xf32> to vector<8xf32>
    %401 = vector.shape_cast %400 : vector<8xf32> to vector<8x1xf32>
    %402 = tpu.reciprocal %401 {approx = true} : vector<8x1xf32> -> vector<8x1xf32>
    %403 = vector.broadcast %402 : vector<8x1xf32> to vector<8x8xf32>
    %404 = arith.mulf %399, %403 : vector<8x8xf32>
    %cst_149 = arith.constant dense<0.000000e+00> : vector<8x16xf32>
    %405 = tpu.matmul %404, %391, %cst_149 {dimension_numbers = #tpu.dot_dimension_numbers<[1], [0], [0], [1], [0, 0, 1, 1], [], []>} : vector<8x8xf32>, vector<8x16xf32>, vector<8x16xf32> -> vector<8x16xf32>
    %406 = arith.truncf %405 : vector<8x16xf32> to vector<8x16xbf16>
    %407 = vector.extract_strided_slice %233 {offsets = [112, 0], sizes = [16, 128], strides = [1, 1]} : vector<128x128xbf16> to vector<16x128xbf16>
    %cst_150 = arith.constant dense<0.000000e+00> : vector<8x128xf32>
    %408 = tpu.matmul %406, %407, %cst_150 {dimension_numbers = #tpu.dot_dimension_numbers<[1], [0], [0], [1], [0, 0, 1, 1], [], []>} : vector<8x16xbf16>, vector<16x128xbf16>, vector<8x128xf32> -> vector<8x128xf32>
    %409 = arith.addf %388, %408 : vector<8x128xf32>
    %410 = vector.broadcast %234 : vector<1x128xf32> to vector<8x128xf32>
    %411 = arith.addf %409, %410 : vector<8x128xf32>
    %412 = arith.addf %411, %229 : vector<8x128xf32>
    %c0_151 = arith.constant 0 : index
    %c0_152 = arith.constant 0 : index
    %413 = vector.load %arg17[%c0_151, %c0_152] : memref<1x128xf32, #tpu.memory_space<vmem>>, vector<1x128xf32>
    %c0_153 = arith.constant 0 : index
    %c0_154 = arith.constant 0 : index
    %414 = vector.load %arg18[%c0_153, %c0_154] : memref<1x128xf32, #tpu.memory_space<vmem>>, vector<1x128xf32>
    %cst_155 = arith.constant dense<0.000000e+00> : vector<8xf32>
    %415 = vector.multi_reduction <add>, %412, %cst_155 [1] : vector<8x128xf32> to vector<8xf32>
    %416 = vector.shape_cast %415 : vector<8xf32> to vector<8x1xf32>
    %cst_156 = arith.constant 1.280000e+02 : f32
    %417 = vector.broadcast %cst_156 : f32 to vector<8x1xf32>
    %418 = arith.divf %416, %417 : vector<8x1xf32>
    %419 = vector.broadcast %418 : vector<8x1xf32> to vector<8x128xf32>
    %420 = arith.subf %412, %419 : vector<8x128xf32>
    %421 = arith.mulf %420, %420 : vector<8x128xf32>
    %cst_157 = arith.constant dense<0.000000e+00> : vector<8xf32>
    %422 = vector.multi_reduction <add>, %421, %cst_157 [1] : vector<8x128xf32> to vector<8xf32>
    %423 = vector.shape_cast %422 : vector<8xf32> to vector<8x1xf32>
    %cst_158 = arith.constant 1.280000e+02 : f32
    %424 = vector.broadcast %cst_158 : f32 to vector<8x1xf32>
    %425 = arith.divf %423, %424 : vector<8x1xf32>
    %cst_159 = arith.constant 9.99999974E-6 : f32
    %426 = vector.broadcast %cst_159 : f32 to vector<8x1xf32>
    %427 = arith.addf %425, %426 : vector<8x1xf32>
    %428 = math.rsqrt %427 : vector<8x1xf32>
    %429 = vector.broadcast %428 : vector<8x1xf32> to vector<8x128xf32>
    %430 = arith.mulf %420, %429 : vector<8x128xf32>
    %431 = vector.broadcast %413 : vector<1x128xf32> to vector<8x128xf32>
    %432 = arith.mulf %430, %431 : vector<8x128xf32>
    %433 = vector.broadcast %414 : vector<1x128xf32> to vector<8x128xf32>
    %434 = arith.addf %432, %433 : vector<8x128xf32>
    %435 = arith.truncf %434 : vector<8x128xf32> to vector<8x128xbf16>
    %c0_160 = arith.constant 0 : index
    %c0_161 = arith.constant 0 : index
    %436 = vector.load %arg19[%c0_160, %c0_161] : memref<128x512xbf16, #tpu.memory_space<vmem>>, vector<128x512xbf16>
    %cst_162 = arith.constant dense<0.000000e+00> : vector<8x512xf32>
    %437 = tpu.matmul %435, %436, %cst_162 {dimension_numbers = #tpu.dot_dimension_numbers<[1], [0], [0], [1], [0, 0, 1, 1], [], []>} : vector<8x128xbf16>, vector<128x512xbf16>, vector<8x512xf32> -> vector<8x512xf32>
    %c0_163 = arith.constant 0 : index
    %c0_164 = arith.constant 0 : index
    %438 = vector.load %arg20[%c0_163, %c0_164] : memref<1x512xf32, #tpu.memory_space<vmem>>, vector<1x512xf32>
    %439 = vector.broadcast %438 : vector<1x512xf32> to vector<8x512xf32>
    %440 = arith.addf %437, %439 : vector<8x512xf32>
    %cst_165 = arith.constant 0.000000e+00 : f32
    %441 = vector.broadcast %cst_165 : f32 to vector<8x512xf32>
    %442 = arith.maximumf %440, %441 : vector<8x512xf32>
    %443 = arith.truncf %442 : vector<8x512xf32> to vector<8x512xbf16>
    %c0_166 = arith.constant 0 : index
    %c0_167 = arith.constant 0 : index
    %444 = vector.load %arg21[%c0_166, %c0_167] : memref<512x128xbf16, #tpu.memory_space<vmem>>, vector<512x128xbf16>
    %cst_168 = arith.constant dense<0.000000e+00> : vector<8x128xf32>
    %445 = tpu.matmul %443, %444, %cst_168 {dimension_numbers = #tpu.dot_dimension_numbers<[1], [0], [0], [1], [0, 0, 1, 1], [], []>} : vector<8x512xbf16>, vector<512x128xbf16>, vector<8x128xf32> -> vector<8x128xf32>
    %c0_169 = arith.constant 0 : index
    %c0_170 = arith.constant 0 : index
    %446 = vector.load %arg22[%c0_169, %c0_170] : memref<1x128xf32, #tpu.memory_space<vmem>>, vector<1x128xf32>
    %447 = vector.broadcast %446 : vector<1x128xf32> to vector<8x128xf32>
    %448 = arith.addf %445, %447 : vector<8x128xf32>
    %449 = arith.addf %448, %434 : vector<8x128xf32>
    %c0_171 = arith.constant 0 : index
    %c0_172 = arith.constant 0 : index
    %450 = vector.load %arg23[%c0_171, %c0_172] : memref<1x128xf32, #tpu.memory_space<vmem>>, vector<1x128xf32>
    %c0_173 = arith.constant 0 : index
    %c0_174 = arith.constant 0 : index
    %451 = vector.load %arg24[%c0_173, %c0_174] : memref<1x128xf32, #tpu.memory_space<vmem>>, vector<1x128xf32>
    %cst_175 = arith.constant dense<0.000000e+00> : vector<8xf32>
    %452 = vector.multi_reduction <add>, %449, %cst_175 [1] : vector<8x128xf32> to vector<8xf32>
    %453 = vector.shape_cast %452 : vector<8xf32> to vector<8x1xf32>
    %cst_176 = arith.constant 1.280000e+02 : f32
    %454 = vector.broadcast %cst_176 : f32 to vector<8x1xf32>
    %455 = arith.divf %453, %454 : vector<8x1xf32>
    %456 = vector.broadcast %455 : vector<8x1xf32> to vector<8x128xf32>
    %457 = arith.subf %449, %456 : vector<8x128xf32>
    %458 = arith.mulf %457, %457 : vector<8x128xf32>
    %cst_177 = arith.constant dense<0.000000e+00> : vector<8xf32>
    %459 = vector.multi_reduction <add>, %458, %cst_177 [1] : vector<8x128xf32> to vector<8xf32>
    %460 = vector.shape_cast %459 : vector<8xf32> to vector<8x1xf32>
    %cst_178 = arith.constant 1.280000e+02 : f32
    %461 = vector.broadcast %cst_178 : f32 to vector<8x1xf32>
    %462 = arith.divf %460, %461 : vector<8x1xf32>
    %cst_179 = arith.constant 9.99999974E-6 : f32
    %463 = vector.broadcast %cst_179 : f32 to vector<8x1xf32>
    %464 = arith.addf %462, %463 : vector<8x1xf32>
    %465 = math.rsqrt %464 : vector<8x1xf32>
    %466 = vector.broadcast %465 : vector<8x1xf32> to vector<8x128xf32>
    %467 = arith.mulf %457, %466 : vector<8x128xf32>
    %468 = vector.broadcast %450 : vector<1x128xf32> to vector<8x128xf32>
    %469 = arith.mulf %467, %468 : vector<8x128xf32>
    %470 = vector.broadcast %451 : vector<1x128xf32> to vector<8x128xf32>
    %471 = arith.addf %469, %470 : vector<8x128xf32>
    %c0_180 = arith.constant 0 : index
    %c0_181 = arith.constant 0 : index
    %c0_182 = arith.constant 0 : index
    %472 = vector.load %arg25[%c0_180, %c0_181, %c0_182] : memref<1x8x128xf32, #tpu.memory_space<vmem>>, vector<1x8x128xf32>
    %473 = vector.shape_cast %472 : vector<1x8x128xf32> to vector<8x128xf32>
    %474 = vector.shape_cast %471 : vector<8x128xf32> to vector<1x8x128xf32>
    tpu.vector_store %arg25[%c0_180, %c0_181, %c0_182], %474 {strides = array<i32>} : memref<1x8x128xf32, #tpu.memory_space<vmem>>, vector<1x8x128xf32>,
    return
  }
  func.func @transform_0(%arg0: i32) -> (i32, i32, i32) {
    %c0_i32 = arith.constant 0 : i32
    %c0_i32_0 = arith.constant 0 : i32
    %c0_i32_1 = arith.constant 0 : i32
    return %arg0, %c0_i32, %c0_i32_0 : i32, i32, i32
  }
  func.func @transform_1(%arg0: i32) -> (i32, i32, i32) {
    %c0_i32 = arith.constant 0 : i32
    %c0_i32_0 = arith.constant 0 : i32
    %c0_i32_1 = arith.constant 0 : i32
    return %arg0, %c0_i32, %c0_i32_0 : i32, i32, i32
  }
  func.func @transform_2(%arg0: i32) -> (i32, i32, i32) {
    %c0_i32 = arith.constant 0 : i32
    %c0_i32_0 = arith.constant 0 : i32
    %c0_i32_1 = arith.constant 0 : i32
    return %arg0, %c0_i32, %c0_i32_0 : i32, i32, i32
  }
  func.func @transform_3(%arg0: i32) -> (i32, i32) {
    %c0_i32 = arith.constant 0 : i32
    %c0_i32_0 = arith.constant 0 : i32
    %c0_i32_1 = arith.constant 0 : i32
    return %c0_i32, %c0_i32_0 : i32, i32
  }
  func.func @transform_4(%arg0: i32) -> (i32, i32) {
    %c0_i32 = arith.constant 0 : i32
    %c0_i32_0 = arith.constant 0 : i32
    %c0_i32_1 = arith.constant 0 : i32
    return %c0_i32, %c0_i32_0 : i32, i32
  }
  func.func @transform_5(%arg0: i32) -> (i32, i32) {
    %c0_i32 = arith.constant 0 : i32
    %c0_i32_0 = arith.constant 0 : i32
    %c0_i32_1 = arith.constant 0 : i32
    return %c0_i32, %c0_i32_0 : i32, i32
  }
  func.func @transform_6(%arg0: i32) -> (i32, i32) {
    %c0_i32 = arith.constant 0 : i32
    %c0_i32_0 = arith.constant 0 : i32
    %c0_i32_1 = arith.constant 0 : i32
    return %c0_i32, %c0_i32_0 : i32, i32
  }
  func.func @transform_7(%arg0: i32) -> (i32, i32) {
    %c0_i32 = arith.constant 0 : i32
    %c0_i32_0 = arith.constant 0 : i32
    %c0_i32_1 = arith.constant 0 : i32
    return %c0_i32, %c0_i32_0 : i32, i32
  }
  func.func @transform_8(%arg0: i32) -> (i32, i32) {
    %c0_i32 = arith.constant 0 : i32
    %c0_i32_0 = arith.constant 0 : i32
    %c0_i32_1 = arith.constant 0 : i32
    return %c0_i32, %c0_i32_0 : i32, i32
  }
  func.func @transform_9(%arg0: i32) -> (i32, i32) {
    %c0_i32 = arith.constant 0 : i32
    %c0_i32_0 = arith.constant 0 : i32
    %c0_i32_1 = arith.constant 0 : i32
    return %c0_i32, %c0_i32_0 : i32, i32
  }
  func.func @transform_10(%arg0: i32) -> (i32, i32) {
    %c0_i32 = arith.constant 0 : i32
    %c0_i32_0 = arith.constant 0 : i32
    %c0_i32_1 = arith.constant 0 : i32
    return %c0_i32, %c0_i32_0 : i32, i32
  }
  func.func @transform_11(%arg0: i32) -> (i32, i32) {
    %c0_i32 = arith.constant 0 : i32
    %c0_i32_0 = arith.constant 0 : i32
    %c0_i32_1 = arith.constant 0 : i32
    return %c0_i32, %c0_i32_0 : i32, i32
  }
  func.func @transform_12(%arg0: i32) -> (i32, i32) {
    %c0_i32 = arith.constant 0 : i32
    %c0_i32_0 = arith.constant 0 : i32
    %c0_i32_1 = arith.constant 0 : i32
    return %c0_i32, %c0_i32_0 : i32, i32
  }
  func.func @transform_13(%arg0: i32) -> (i32, i32) {
    %c0_i32 = arith.constant 0 : i32
    %c0_i32_0 = arith.constant 0 : i32
    %c0_i32_1 = arith.constant 0 : i32
    return %c0_i32, %c0_i32_0 : i32, i32
  }
  func.func @transform_14(%arg0: i32) -> (i32, i32) {
    %c0_i32 = arith.constant 0 : i32
    %c0_i32_0 = arith.constant 0 : i32
    %c0_i32_1 = arith.constant 0 : i32
    return %c0_i32, %c0_i32_0 : i32, i32
  }
  func.func @transform_15(%arg0: i32) -> (i32, i32) {
    %c0_i32 = arith.constant 0 : i32
    %c0_i32_0 = arith.constant 0 : i32
    %c0_i32_1 = arith.constant 0 : i32
    return %c0_i32, %c0_i32_0 : i32, i32
  }
  func.func @transform_16(%arg0: i32) -> (i32, i32) {
    %c0_i32 = arith.constant 0 : i32
    %c0_i32_0 = arith.constant 0 : i32
    %c0_i32_1 = arith.constant 0 : i32
    return %c0_i32, %c0_i32_0 : i32, i32
  }
  func.func @transform_17(%arg0: i32) -> (i32, i32) {
    %c0_i32 = arith.constant 0 : i32
    %c0_i32_0 = arith.constant 0 : i32
    %c0_i32_1 = arith.constant 0 : i32
    return %c0_i32, %c0_i32_0 : i32, i32
  }
  func.func @transform_18(%arg0: i32) -> (i32, i32) {
    %c0_i32 = arith.constant 0 : i32
    %c0_i32_0 = arith.constant 0 : i32
    %c0_i32_1 = arith.constant 0 : i32
    return %c0_i32, %c0_i32_0 : i32, i32
  }
  func.func @transform_19(%arg0: i32) -> (i32, i32) {
    %c0_i32 = arith.constant 0 : i32
    %c0_i32_0 = arith.constant 0 : i32
    %c0_i32_1 = arith.constant 0 : i32
    return %c0_i32, %c0_i32_0 : i32, i32
  }
  func.func @transform_20(%arg0: i32) -> (i32, i32) {
    %c0_i32 = arith.constant 0 : i32
    %c0_i32_0 = arith.constant 0 : i32
    %c0_i32_1 = arith.constant 0 : i32
    return %c0_i32, %c0_i32_0 : i32, i32
  }
  func.func @transform_21(%arg0: i32) -> (i32, i32) {
    %c0_i32 = arith.constant 0 : i32
    %c0_i32_0 = arith.constant 0 : i32
    %c0_i32_1 = arith.constant 0 : i32
    return %c0_i32, %c0_i32_0 : i32, i32
  }
  func.func @transform_22(%arg0: i32) -> (i32, i32) {
    %c0_i32 = arith.constant 0 : i32
    %c0_i32_0 = arith.constant 0 : i32
    %c0_i32_1 = arith.constant 0 : i32
    return %c0_i32, %c0_i32_0 : i32, i32
  }
  func.func @transform_23(%arg0: i32) -> (i32, i32) {
    %c0_i32 = arith.constant 0 : i32
    %c0_i32_0 = arith.constant 0 : i32
    %c0_i32_1 = arith.constant 0 : i32
    return %c0_i32, %c0_i32_0 : i32, i32
  }
  func.func @transform_24(%arg0: i32) -> (i32, i32, i32) {
    %c0_i32 = arith.constant 0 : i32
    %c0_i32_0 = arith.constant 0 : i32
    %c0_i32_1 = arith.constant 0 : i32
    return %arg0, %c0_i32, %c0_i32_0 : i32, i32, i32
  }
}

</mosaic_0001>

<bundles_post_ra>
// kernel: tpu_custom_call.1
= control target key start
LH: loop header
LB: loop body
LE: loop exit
PB: predicated region body
PF: predicated region fallthrough
CT: control target
= control target key end

     0   :  { %s6110_s0 = inlined_call_operand.hbm [shape: f32[2,8,128], index: 0, kind: input, shape index: {}]   ;;  %s6111_s1 = inlined_call_operand.hbm [shape: f32[2,8,128], index: 1, kind: input, shape index: {}]   ;;  %s6112_s2 = inlined_call_operand.hbm [shape: f32[2,8,128], index: 2, kind: input, shape index: {}]   ;;  %s6113_s3 = inlined_call_operand.hbm [shape: f32[8,8], index: 3, kind: input, shape index: {}]   ;;  %s6114_s4 = inlined_call_operand.hbm [shape: bf16[128,128], index: 4, kind: input, shape index: {}]   ;;  %s6115_s5 = inlined_call_operand.hbm [shape: bf16[128,128], index: 5, kind: input, shape index: {}]   ;;  %s6116_s6 = inlined_call_operand.hbm [shape: bf16[128,128], index: 6, kind: input, shape index: {}]   ;;  %s6117_s7 = inlined_call_operand.hbm [shape: bf16[128,128], index: 7, kind: input, shape index: {}]   ;;  %s6118_s8 = inlined_call_operand.vmem [shape: f32[1,128], index: 8, kind: input, shape index: {}]   ;;  %s6119_s9 = inlined_call_operand.vmem [shape: f32[1,128], index: 9, kind: input, shape index: {}]   ;;  %s6120_s10 = inlined_call_operand.vmem [shape: f32[1,128], index: 10, kind: input, shape index: {}]   ;;  %s6121_s11 = inlined_call_operand.hbm [shape: bf16[128,128], index: 11, kind: input, shape index: {}]   ;;  %s6122_s12 = inlined_call_operand.hbm [shape: bf16[128,128], index: 12, kind: input, shape index: {}]   ;;  %s6123_s13 = inlined_call_operand.hbm [shape: bf16[128,128], index: 13, kind: input, shape index: {}]   ;;  %s6124_s14 = inlined_call_operand.hbm [shape: bf16[128,128], index: 14, kind: input, shape index: {}]   ;;  %s6125_s15 = inlined_call_operand.vmem [shape: f32[1,128], index: 15, kind: input, shape index: {}]   ;;  %s6126_s16 = inlined_call_operand.vmem [shape: f32[1,128], index: 16, kind: input, shape index: {}]   ;;  %s6127_s17 = inlined_call_operand.vmem [shape: f32[1,128], index: 17, kind: input, shape index: {}]   ;;  %s6128_s18 = inlined_call_operand.hbm [shape: bf16[128,512], index: 18, kind: input, shape index: {}]   ;;  %s6129_s19 = inlined_call_operand.vmem [shape: f32[1,512], index: 19, kind: input, shape index: {}]   ;;  %s6130_s20 = inlined_call_operand.hbm [shape: bf16[512,128], index: 20, kind: input, shape index: {}]   ;;  %s6131_s21 = inlined_call_operand.vmem [shape: f32[1,128], index: 21, kind: input, shape index: {}]   ;;  %s6132_s22 = inlined_call_operand.vmem [shape: f32[1,128], index: 22, kind: input, shape index: {}]   ;;  %s6133_s23 = inlined_call_operand.vmem [shape: f32[1,128], index: 23, kind: input, shape index: {}]   ;;  %s6134_s24 = inlined_call_operand.hbm [shape: f32[2,8,128], index: 24, kind: output, shape index: {}]  }
   0x1   :  { %6153 = sst [smem:[#allocation41_spill]] %s6110_s0 }
   0x2   :  { %6154 = sst [smem:[#allocation42_spill]] %s6111_s1 }
   0x3   :  { %6155 = sst [smem:[#allocation43_spill]] %s6112_s2 }
   0x4   :  { %6156 = sst [smem:[#allocation44_spill]] %s6113_s3 }
   0x5   :  { %6157 = sst [smem:[#allocation45_spill]] %s6114_s4 }
   0x6   :  { %6158 = sst [smem:[#allocation46_spill]] %s6115_s5 }
   0x7   :  { %6159 = sst [smem:[#allocation47_spill]] %s6116_s6 }
   0x8   :  { %6160 = sst [smem:[#allocation48_spill]] %s6117_s7 }
   0x9   :  { %6161 = sst [smem:[#allocation49_spill]] %s6118_s8 }
   0xa   :  { %6162 = sst [smem:[#allocation50_spill]] %s6121_s11 }
   0xb   :  { %6163 = sst [smem:[#allocation51_spill]] %s6122_s12 }
   0xc   :  { %6164 = sst [smem:[#allocation52_spill]] %s6124_s14 }
   0xd   :  { %6165 = sst [smem:[#allocation53_spill]] %s6125_s15 }
   0xe   :  { %6166 = sst [smem:[#allocation54_spill]] %s6126_s16 }
   0xf   :  { %6167 = sst [smem:[#allocation55_spill]] %s6127_s17 }
  0x10   :  { %6168 = sst [smem:[#allocation56_spill]] %s6129_s19 }
  0x11   :  { %6169 = sst [smem:[#allocation57_spill]] %s6131_s21 }
  0x12   :  { %6170 = sst [smem:[#allocation58_spill]] %s6132_s22 }
  0x13   :  { %6171 = sst [smem:[#allocation59_spill]] %s6133_s23 }
  0x14   :  { %6172 = sst [smem:[#allocation60_spill]] %s6134_s24 }
  0x15   :  { %29 = vsyncpa [#allocation3], 0 }
  0x16   :  { %31 = vsyncpa [#allocation3 + $0x1], 0 }
  0x17   :  { %32 = vsyncpa [#allocation6], 0 }
  0x18   :  { %34 = vsyncpa [#allocation6 + $0x1], 0 }
  0x19   :  { %35 = vsyncpa [#allocation9], 0 }
  0x1a   :  { %36 = vsyncpa [#allocation12], 0 }
  0x1b   :  { %37 = vsyncpa [#allocation15], 0 }
  0x1c   :  { %38 = vsyncpa [#allocation18], 0 }
  0x1d   :  { %39 = vsyncpa [#allocation21], 0 }
  0x1e   :  { %40 = vsyncpa [#allocation24], 0 }
  0x1f   :  { %41 = vsyncpa [#allocation4], 0 }
  0x20   :  { %43 = vsyncpa [#allocation4 + $0x1], 0  ;;  %s5540_s5 = smov 0   ;;  %s5542_s26 = smov 0  }
  0x21   :  { %s5544_s27 = smov 0   ;;  %s5546_s28 = smov 0  }
  0x22 LB: > { %6173 = sst [smem:[#allocation35_spill]] %s5378_s5  ;;  %s5564_s7 = sadd.s32 4294967295, %s5390_s28   ;;  %s5390_s28 = sphi %s5546_s28, %s6225_s28   ;;  %s5386_s27 = sphi %s5544_s27, %s6229_s27   ;;  %s5382_s26 = sphi %s5542_s26, %s6228_s26   ;;  %s5378_s5 = sphi %s5540_s5, %s6227_s5  }
  0x23   : > { %6174 = sst [smem:[#allocation36_spill]] %s5390_s28  ;;  %p3873_p0 = scmp.ge.s32.totalorder %s5390_s28, 1 }
  0x24   : > { %s6175_s29 = sld [smem:[#allocation44_spill]]  ;;  %p6151_p1 = scmp.eq.s32.totalorder %s5564_s7, 0 }
  0x25   : > { %p599_p2 = scmp.lt.s32.totalorder %s5390_s28, 3  ;;  %s5392_s3 = smov [#allocation8]  }
  0x26   : > { %s613_s25 = sshll.u32 %s5392_s3, 4  ;;  %s6177_s1 = sld [smem:[#allocation46_spill]]  ;;  %s614_s25 = int_to_ptr.vmem [resolvable:$true] %s613_s25 }
  0x27   : > { %p5569_p3 = pnand %p3873_p0, %p599_p2  ;;  %s6179_s3 = sld [smem:[#allocation48_spill]] }
  0x28   : > { %s5393_s22 = smov [#allocation11]   ;;  %s6139_s8 = smov 64  }
  0x29   : > { %p4668_p5 = pneg %p5569_p3  ;;  %s638_s21 = sshll.u32 %s5393_s22, 4  ;;  %s639_s21 = int_to_ptr.vmem [resolvable:$true] %s638_s21 }
  0x2a   : > { %s611_s0 = sshll.u32 %s6175_s29, 4  ;;  %s6141_s4 = smov 4   ;;  %s612_s0 = int_to_ptr.hbm [resolvable:$true] %s611_s0 }
  0x2b   : > { %p5581_p6 = pnand %p4668_p5, %p6151_p1  ;;  %s6180_s12 = sld [smem:[#allocation51_spill]] }
  0x2c   : > { %s636_s6 = sshll.u32 %s6177_s1, 4  ;;  %s5396_s29 = smov [#allocation14]   ;;  %s637_s6 = int_to_ptr.hbm [resolvable:$true] %s636_s6 }
  0x2d   : > { %s664_s24 = sshll.u32 %s6179_s3, 4  ;;  %s666_s22 = sshll.u32 %s5396_s29, 4  ;;  %s665_s24 = int_to_ptr.hbm [resolvable:$true] %s664_s24  ;;  %s667_s22 = int_to_ptr.vmem [resolvable:$true] %s666_s22 }
  0x2e   : > { %4671 = dma.hbm_to_vmem [thread:$0]  (!%p5581_p6), %s612_s0, 128, %s614_s25, [#allocation9]  }
  0x2f   : > { %4677 = dma.hbm_to_vmem [thread:$0]  (!%p5581_p6), %s637_s6, 1024, %s639_s21, [#allocation12], %s6139_s8, %s6139_s8, %s6141_s4  }
  0x30   : > { %4683 = dma.hbm_to_vmem [thread:$0]  (!%p5581_p6), %s665_s24, 1024, %s667_s22, [#allocation15], %s6139_s8, %s6139_s8, %s6141_s4  }
  0x31   : > { %s701_s23 = sshll.u32 %s6180_s12, 4  ;;  %s5397_s21 = smov [#allocation17]   ;;  %s702_s23 = int_to_ptr.hbm [resolvable:$true] %s701_s23 }
  0x32   : > { %s703_s19 = sshll.u32 %s5397_s21, 4  ;;  %s6181_s14 = sld [smem:[#allocation52_spill]]  ;;  %s704_s19 = int_to_ptr.vmem [resolvable:$true] %s703_s19 }
  0x33   : > { %4689 = dma.hbm_to_vmem [thread:$0]  (!%p5581_p6), %s702_s23, 1024, %s704_s19, [#allocation18], %s6139_s8, %s6139_s8, %s6141_s4  }
  0x34   : > { %s5398_s24 = smov [#allocation20]   ;;  %s3872_s1 = sadd.s32 4294967294, %s5390_s28  }
  0x35   : > { %s731_s3 = sshll.u32 %s5398_s24, 4  ;;  %s5618_s29 = sadd.s32 1, %s5390_s28   ;;  %s732_s3 = int_to_ptr.vmem [resolvable:$true] %s731_s3 }
  0x36   : > { %6182 = sst [smem:[#allocation37_spill]] %s5618_s29  ;;  %s56_s22 = sadd.s32 1, %s5386_s27 }
  0x37   : > { %s53_s21 = ssub.s32 %s5390_s28, %s5618_s29  ;;  %p63_p7 = scmp.ne.s32.totalorder %s5386_s27, %s5382_s26 }
  0x38   : > { %s729_s6 = sshll.u32 %s6181_s14, 4  ;;  %p54_p8 = scmp.eq.s32.totalorder %s53_s21, 0  ;;  %s730_s6 = int_to_ptr.hbm [resolvable:$true] %s729_s6 }
  0x39   : > { %4695 = dma.hbm_to_vmem [thread:$0]  (!%p5581_p6), %s730_s6, 1024, %s732_s3, [#allocation21], %s6139_s8, %s6139_s8, %s6141_s4  }
  0x3a   : > { %p64_p9 = scmp.eq.s32.totalorder %s5390_s28, 0  ;;  %p69_p10 = scmp.ne.s32.totalorder %s5382_s26, %s5378_s5 }
  0x3b   : > { %p586_p11 = scmp.eq.s32.totalorder %s5564_s7, 1  ;;  %p592_p2 = scmp.eq.s32.totalorder %s3872_s1, 1 }
  0x3c   : > { %s5630_s23 = scalar_select %p54_p8, %s5386_s27, %s56_s22  }
  0x3d   : > { %p65_p12 = por %p64_p9, %p63_p7  ;;  %p5634_p13 = por %p6151_p1, %p69_p10 }
  0x3e   : > { %6183 = sst [smem:[#allocation38_spill]] %s5630_s23  ;;  %p5638_p0 = por %p586_p11, %p63_p7 }
  0x3f   : > { %p4727_p5 = scmp.lt.s32.totalorder %s5390_s28, 2  ;;  %s6145_s25 = sand.u32 1, %s5386_s27  }
  0x40   : > { %s6185_s0 = scalar_select %p5638_p0, 1, 0 }
  0x41   : > { %p5644_p4 = por %p592_p2, %p69_p10  ;;  %s5650_s24 = sshll.u32 %s6145_s25, 3 }
  0x42   : > { %6186 = sst [smem:[#allocation39_spill]] %s6185_s0  ;;  %s5653_s3 = sshll.u32 %s5390_s28, 3 }
  0x43   : > { %s6187_s6 = scalar_select %p5644_p4, 1, 0 }
  0x44   : > { %p5655_p8 = pnand %p4727_p5, %p65_p12  ;;  %s813_s1 = sand.u32 1, %s5390_s28  }
  0x45   : > { %6188 = sst [smem:[#allocation40_spill]] %s6187_s6  ;;  %s817_s14 = scalar_lea.vmem [#allocation5], %s5650_s24 }
  0x46   : > { %s6190_s4 = sld [smem:[#allocation42_spill]]  ;;  %s825_s23 = sshll.u32 %s817_s14, 4  ;;  %s826_s23 = int_to_ptr.vmem [resolvable:$true] %s825_s23 }
  0x47   : > { %s6191_s5 = sld [smem:[#allocation45_spill]]  ;;  %s5668_s17 = scalar_lea.sflag [#allocation6], %s813_s1 }
  0x48   : > { %p5030_p9 = pneg %p5655_p8 }
  0x4c   : > { %s821_s12 = scalar_lea.hbm %s6190_s4, %s5653_s3  ;;  %s5033_s8 = scalar_lea.hbm %s6190_s4, 16 }
  0x4d   : > { %s823_s29 = sshll.u32 %s821_s12, 4  ;;  %s622_s0 = sshll.u32 %s6191_s5, 4  ;;  %s824_s29 = int_to_ptr.hbm [resolvable:$true] %s823_s29  ;;  %s623_s0 = int_to_ptr.hbm [resolvable:$true] %s622_s0 }
  0x4e   : > { %s5026_s16 = sshra.s32 %s824_s29, 4  ;;  %s5027_s16 = int_to_ptr.hbm [resolvable:$true] %s5026_s16 }
  0x4f   : > { %s5028_s15 = scalar_lea.hbm %s5027_s16, 8  ;;  %p5034_p12 = scmp.lt.s32.totalorder %s5027_s16, %s6190_s4 }
  0x50   : > { %p5029_p7 = scmp.ne.s32.totalorder %s5027_s16, %s5028_s15  ;;  %p5035_p2 = scmp.lt.s32.totalorder %s5033_s8, %s5028_s15 }
  0x52   : > { %p5031_p10 = pnand %p5030_p9, %p5029_p7  ;;  %p5036_p5 = por %p5035_p2, %p5034_p12 }
  0x54   : > { %p5032_p11 = pneg %p5031_p10 }
  0x56   : > { %p5037_p1 = pnand %p5036_p5, %p5032_p11 }
  0x58   : > { %5040 = shalt.err (!%p5037_p1)
}
  0x59   : > { %4708 = dma.hbm_to_vmem [thread:$0]  (!%p5655_p8), %s824_s29, 128, %s826_s23, %s5668_s17  }
  0x5a   : > { %s5399_s5 = smov [#allocation10]   ;;  %s6192_s14 = sld [smem:[#allocation47_spill]] }
  0x5b   : > { %s624_s25 = sshll.u32 %s5399_s5, 4  ;;  %s6193_s15 = smov 4   ;;  %s625_s25 = int_to_ptr.vmem [resolvable:$true] %s624_s25 }
  0x5c   : > { %s6194_s16 = smov 64   ;;  %s6195_s11 = sld [smem:[#allocation50_spill]] }
  0x5d   : > { %4674 = dma.hbm_to_vmem [thread:$0]  (!%p5581_p6), %s623_s0, 1024, %s625_s25, [#allocation9], %s6194_s16, %s6194_s16, %s6193_s15  }
  0x5e   : > { %s5400_s29 = smov [#allocation13]   ;;  %s5401_s5 = smov [#allocation16]  }
  0x5f   : > { %s652_s23 = sshll.u32 %s5400_s29, 4  ;;  %s689_s6 = sshll.u32 %s5401_s5, 4  ;;  %s653_s23 = int_to_ptr.vmem [resolvable:$true] %s652_s23  ;;  %s690_s6 = int_to_ptr.vmem [resolvable:$true] %s689_s6 }
  0x60   : > { %s650_s12 = sshll.u32 %s6192_s14, 4  ;;  %s715_s0 = sshll.u32 %s6123_s13, 4  ;;  %s651_s12 = int_to_ptr.hbm [resolvable:$true] %s650_s12  ;;  %s716_s0 = int_to_ptr.hbm [resolvable:$true] %s715_s0 }
  0x61   : > { %4680 = dma.hbm_to_vmem [thread:$0]  (!%p5581_p6), %s651_s12, 1024, %s653_s23, [#allocation12], %s6194_s16, %s6194_s16, %s6193_s15  }
  0x62   : > { %s687_s21 = sshll.u32 %s6195_s11, 4  ;;  %s752_s8 = sshll.u32 %s6128_s18, 4  ;;  %s688_s21 = int_to_ptr.hbm [resolvable:$true] %s687_s21  ;;  %s753_s8 = int_to_ptr.hbm [resolvable:$true] %s752_s8 }
  0x63   : > { %4686 = dma.hbm_to_vmem [thread:$0]  (!%p5581_p6), %s688_s21, 1024, %s690_s6, [#allocation15], %s6194_s16, %s6194_s16, %s6193_s15  }
  0x64   : > { %s5402_s29 = smov [#allocation19]   ;;  %s5403_s23 = smov [#allocation22]  }
  0x65   : > { %s717_s12 = sshll.u32 %s5402_s29, 4  ;;  %s754_s5 = sshll.u32 %s5403_s23, 4  ;;  %s718_s12 = int_to_ptr.vmem [resolvable:$true] %s717_s12  ;;  %s755_s5 = int_to_ptr.vmem [resolvable:$true] %s754_s5 }
  0x66   : > { %4692 = dma.hbm_to_vmem [thread:$0]  (!%p5581_p6), %s716_s0, 1024, %s718_s12, [#allocation18], %s6194_s16, %s6194_s16, %s6193_s15  }
  0x67   : > { %s5404_s21 = smov 256   ;;  %s5405_s6 = smov 16  }
  0x68   : > { %4698 = dma.hbm_to_vmem [thread:$0]  (!%p5581_p6), %s753_s8, 4096, %s755_s5, [#allocation21], %s5404_s21, %s5404_s21, %s5405_s6  }
  0x69   : > { %s769_s25 = sshll.u32 %s6130_s20, 4  ;;  %s5406_s28 = smov [#allocation23]   ;;  %s770_s25 = int_to_ptr.hbm [resolvable:$true] %s769_s25 }
  0x6a   : > { %s771_s29 = sshll.u32 %s5406_s28, 4  ;;  %s6196_s23 = sld [smem:[#allocation41_spill]]  ;;  %s772_s29 = int_to_ptr.vmem [resolvable:$true] %s771_s29 }
  0x6b   : > { %4701 = dma.hbm_to_vmem [thread:$0]  (!%p5581_p6), %s770_s25, 4096, %s772_s29, [#allocation24], %s6194_s16, %s6194_s16, %s6193_s15  }
  0x6c   : > { %s798_s8 = scalar_lea.vmem [#allocation2], %s5650_s24  ;;  %s6197_s21 = sand.u32 1, %s5386_s27  }
  0x6d   : > { %s806_s5 = sshll.u32 %s798_s8, 4  ;;  %s795_s6 = scalar_lea.sflag [#allocation3], %s6197_s21  ;;  %s807_s5 = int_to_ptr.vmem [resolvable:$true] %s806_s5 }
  0x70   : > { %s802_s4 = scalar_lea.hbm %s6196_s23, %s5653_s3  ;;  %s5243_s16 = scalar_lea.hbm %s6196_s23, 16 }
  0x71   : > { %s804_s11 = sshll.u32 %s802_s4, 4  ;;  %s805_s11 = int_to_ptr.hbm [resolvable:$true] %s804_s11 }
  0x72   : > { %s5236_s1 = sshra.s32 %s805_s11, 4  ;;  %s5237_s1 = int_to_ptr.hbm [resolvable:$true] %s5236_s1 }
  0x73   : > { %s5238_s14 = scalar_lea.hbm %s5237_s1, 8  ;;  %p5244_p6 = scmp.lt.s32.totalorder %s5237_s1, %s6196_s23 }
  0x74   : > { %p5239_p1 = scmp.ne.s32.totalorder %s5237_s1, %s5238_s14  ;;  %p5245_p11 = scmp.lt.s32.totalorder %s5243_s16, %s5238_s14 }
  0x76   : > { %p5241_p7 = pnand %p5239_p1, %p5030_p9  ;;  %p5246_p12 = por %p5245_p11, %p5244_p6 }
  0x78   : > { %p5242_p10 = pneg %p5241_p7 }
  0x7a   : > { %p5247_p2 = pnand %p5246_p12, %p5242_p10 }
  0x7c   : > { %5250 = shalt.err (!%p5247_p2)
}
  0x7d   : > { %4705 = dma.hbm_to_vmem [thread:$0]  (!%p5655_p8), %s805_s11, 128, %s807_s5, %s795_s6  }
  0x7e   : > { %s6198_s0 = sld [smem:[#allocation43_spill]]  ;;  %s836_s21 = scalar_lea.vmem [#allocation7], %s5650_s24 }
  0x7f   : > { %s844_s2 = sshll.u32 %s836_s21, 4  ;;  %s845_s2 = int_to_ptr.vmem [resolvable:$true] %s844_s2 }
  0x84   : > { %s840_s12 = scalar_lea.hbm %s6198_s0, %s5653_s3  ;;  %s5273_s11 = scalar_lea.hbm %s6198_s0, 16 }
  0x85   : > { %s842_s8 = sshll.u32 %s840_s12, 4  ;;  %s843_s8 = int_to_ptr.hbm [resolvable:$true] %s842_s8 }
  0x86   : > { %s5266_s1 = sshra.s32 %s843_s8, 4  ;;  %s5267_s1 = int_to_ptr.hbm [resolvable:$true] %s5266_s1 }
  0x87   : > { %s5268_s14 = scalar_lea.hbm %s5267_s1, 8  ;;  %p5274_p10 = scmp.lt.s32.totalorder %s5267_s1, %s6198_s0 }
  0x88   : > { %p5269_p5 = scmp.ne.s32.totalorder %s5267_s1, %s5268_s14  ;;  %p5275_p6 = scmp.lt.s32.totalorder %s5273_s11, %s5268_s14 }
  0x8a   : > { %p5271_p1 = pnand %p5269_p5, %p5030_p9  ;;  %p5276_p11 = por %p5275_p6, %p5274_p10 }
  0x8c   : > { %p5272_p7 = pneg %p5271_p1 }
  0x8e   : > { %p5277_p12 = pnand %p5276_p11, %p5272_p7 }
  0x90   : > { %5280 = shalt.err (!%p5277_p12)
}
  0x91   : > { %4711 = dma.hbm_to_vmem [thread:$0]  (!%p5655_p8), %s843_s8, 128, %s845_s2, %s5668_s17  }
  0x92   : > { %853 = sbr.rel (%p5569_p3) target bundleno = 3808 (0xee0), region = 116  ;;  %s5764_s24 = sand.u32 (!%p5569_p3), 1, %s5382_s26  }
  0x93   : > { %s5767_s3 = sshll.u32 (!%p5569_p3), %s5764_s24, 3  ;;  %s856_s25 = scalar_lea.sflag (!%p5569_p3), [#allocation3], %s5764_s24 }
  0x94   : > { %s859_s4 = scalar_lea.vmem (!%p5569_p3), [#allocation2], %s5767_s3 }
  0x97   : > { %5341 = dma.done.wait (%p5634_p13), %s856_s25, 128  }
  0x98   : > { %5343 = vsyncadd (%p5634_p13), %s856_s25, 4294967168  ;;  %s865_s17 = sand.u32 1, %s5564_s7   ;;  %s869_s22 = scalar_lea.vmem [#allocation5], %s5767_s3 }
  0x99   : > { %s866_s30 = scalar_lea.sflag [#allocation6], %s865_s17 }
  0x9a   : > { %5345 = dma.done.wait (%p5634_p13), %s866_s30, 256  }
  0x9b   : > { %5347 = vsyncadd (%p5634_p13), %s866_s30, 4294967040  ;;  %s879_s28 = scalar_lea.vmem [#allocation7], %s5767_s3  ;;  %p6199_p3 = scmp.eq.s32.totalorder %s5564_s7, 0 }
  0x9d   : > { %5349 = dma.done.wait (%p6199_p3), [#allocation9], 1152   ;;  %p6200_p8 = pmov %p6199_p3 }
  0x9e   : > { %p6201_p9 = pmov %p6199_p3 }
  0x9f   : > { %5351 = vsyncadd (%p6200_p8), [#allocation9], 4294966144 }
  0xa0   : > { %5353 = dma.done.wait (%p6201_p9), [#allocation12], 2048   ;;  %p6202_p2 = pmov %p6199_p3 }
  0xa2   : > { %5355 = vsyncadd (%p6202_p2), [#allocation12], 4294965248  ;;  %p6203_p5 = pmov %p6202_p2 }
  0xa3   : > { %p6204_p1 = pmov %p6202_p2 }
  0xa4   : > { %5357 = dma.done.wait (%p6203_p5), [#allocation15], 2048  }
  0xa5   : > { %5359 = vsyncadd (%p6204_p1), [#allocation15], 4294965248  ;;  %p6205_p13 = pmov %p6204_p1 }
  0xa6   : > { %p6206_p7 = pmov %p6204_p1 }
  0xa7   : > { %5361 = dma.done.wait (%p6205_p13), [#allocation18], 2048  }
  0xa8   : > { %5363 = vsyncadd (%p6206_p7), [#allocation18], 4294965248  ;;  %p6207_p10 = pmov %p6204_p1 }
  0xa9   : > { %p6208_p6 = pmov %p6204_p1 }
  0xaa   : > { %5365 = dma.done.wait (%p6207_p10), [#allocation21], 5120  }
  0xab   : > { %5367 = vsyncadd (%p6208_p6), [#allocation21], 4294962176  ;;  %p6209_p11 = pmov %p6204_p1 }
  0xac   : > { %p6210_p12 = pmov %p6204_p1 }
  0xad   : > { %5369 = dma.done.wait (%p6209_p11), [#allocation24], 4096  }
  0xae   : > { %5371 = vsyncadd (%p6210_p12), [#allocation24], 4294963200  ;;  %v4495_v0 = vld [vmem:[#allocation10 + $0x38] sm:$0xff]  ;;  %v4494_v2 = vld [vmem:[#allocation10 + $0x30] sm:$0xff]  ;;  %vm1265_vm0 = vcmask 130048   ;;  %s5407_s19 = smov 96  }
  0xaf   : > { %v4503_v1 = vld [vmem:[#allocation11 + $0x38] sm:$0xff]  ;;  %1129 = vmatpush.bf16.msra.mxu0 %v4495_v0  ;;  %v4502_v3 = vld [vmem:[#allocation11 + $0x30] sm:$0xff]  ;;  %v4493_v5 = vld [vmem:[#allocation10 + $0x28] sm:$0xff]  ;;  %s5408_s29 = smov 112   ;;  %s5409_s12 = smov 64   ;;  %vm1294_vm2 = vcmask 64512  }
  0xb0   : > { %1190 = vmatpush.bf16.msra.mxu1 %v4503_v1  ;;  %v4511_v4 = vld [vmem:[#allocation13 + $0x38] sm:$0xff]  ;;  %v4501_v6 = vld [vmem:[#allocation11 + $0x28] sm:$0xff]  ;;  %v4510_v7 = vld [vmem:[#allocation13 + $0x30] sm:$0xff]  ;;  %s5410_s8 = smov 80   ;;  %s5411_s21 = smov 48  }
  0xb1   : > { %1251 = vmatpush.bf16.msra.mxu2 %v4511_v4  ;;  %v4492_v8 = vld [vmem:[#allocation10 + $0x20] sm:$0xff]  ;;  %v4509_v10 = vld [vmem:[#allocation13 + $0x28] sm:$0xff]  ;;  %v4491_v11 = vld [vmem:[#allocation10 + $0x18] sm:$0xff]  ;;  %s5412_s2 = smov 32   ;;  %s5413_s1 = smov 16  }
  0xb2   : > { %v4500_v9 = vld [vmem:[#allocation11 + $0x20] sm:$0xff]  ;;  %v4499_v12 = vld [vmem:[#allocation11 + $0x18] sm:$0xff]  ;;  %v4490_v14 = vld [vmem:[#allocation10 + $0x10] sm:$0xff]  ;;  %s6211_s16 = sld [smem:[#allocation49_spill]]  ;;  %s4485_s11 = sshll.u32 %s5564_s7, 3 }
  0xb3   : > { %1130 = vmatpush.bf16.msra.mxu0 %v4494_v2  ;;  %v4508_v13 = vld [vmem:[#allocation13 + $0x20] sm:$0xff]  ;;  %v4498_v15 = vld [vmem:[#allocation11 + $0x10] sm:$0xff]  ;;  %v4507_v16 = vld [vmem:[#allocation13 + $0x18] sm:$0xff]  ;;  %s6212_s30 = sld [smem:[#allocation53_spill]]  ;;  %s1009_s7 = scalar_lea.vmem [#allocation25], %s5767_s3 }
  0xb4   : > { %1191 = vmatpush.bf16.msra.mxu1 %v4502_v3  ;;  %v4489_v17 = vld [vmem:[#allocation10 + $0x8] sm:$0xff]  ;;  %v4506_v19 = vld [vmem:[#allocation13 + $0x10] sm:$0xff]  ;;  %v4488_v20 = vld [vmem:[#allocation10] sm:$0xff]  ;;  %s6217_s25 = sld [smem:[#allocation58_spill]] }
  0xb5   : > { %1252 = vmatpush.bf16.msra.mxu2 %v4510_v7  ;;  %v4497_v18 = vld [vmem:[#allocation11 + $0x8] sm:$0xff]  ;;  %v4496_v21 = vld [vmem:[#allocation11] sm:$0xff]  ;;  %v5832_v35 = vld [vmem:[#allocation8] sm:$0xff] }
  0xb6   : > { %v5808_v22 = vld [vmem:[%s859_s4] sm:$0xff]  ;;  %v4504_v25 = vld [vmem:[#allocation13] sm:$0xff]  ;;  %vm1264_vm1 = vcmp.eq.f32.partialorder %v5832_v35, 0.0 }
  0xb7   : > { %1131 = vmatpush.bf16.msra.mxu0 %v4493_v5  ;;  %v4505_v23 = vld [vmem:[#allocation13 + $0x8] sm:$0xff]  ;;  %v1080_v24 = vpack.c.bf16 %v5808_v22, %v5808_v22  ;;  %v4512_v63 = vld [vmem:[#allocation14] sm:$0xff] }
  0xb8   : > { %1192 = vmatpush.bf16.msra.mxu1 %v4501_v6 }
  0xb9   : > { %1253 = vmatpush.bf16.msra.mxu2 %v4509_v10 }
  0xbb   : > { %1132 = vmatpush.bf16.msra.mxu0 %v4492_v8 }
  0xbc   : > { %1193 = vmatpush.bf16.msra.mxu1 %v4500_v9 }
  0xbd   : > { %1254 = vmatpush.bf16.msra.mxu2 %v4508_v13 }
  0xbf   : > { %1133 = vmatpush.bf16.msra.mxu0 %v4491_v11 }
  0xc0   : > { %1194 = vmatpush.bf16.msra.mxu1 %v4499_v12 }
  0xc1   : > { %1255 = vmatpush.bf16.msra.mxu2 %v4507_v16 }
  0xc3   : > { %1134 = vmatpush.bf16.msra.mxu0 %v4490_v14 }
  0xc4   : > { %1195 = vmatpush.bf16.msra.mxu1 %v4498_v15 }
  0xc5   : > { %1256 = vmatpush.bf16.msra.mxu2 %v4506_v19 }
  0xc7   : > { %1135 = vmatpush.bf16.msra.mxu0 %v4489_v17 }
  0xc8   : > { %1196 = vmatpush.bf16.msra.mxu1 %v4497_v18 }
  0xc9   : > { %1257 = vmatpush.bf16.msra.mxu2 %v4505_v23 }
  0xcb   : > { %1136 = vmatpush.bf16.msra.mxu0 %v4488_v20 }
  0xcc   : > { %1197 = vmatpush.bf16.msra.mxu1 %v4496_v21 }
  0xcd   : > { %1258 = vmatpush.bf16.msra.mxu2 %v4504_v25 }
  0xce   : > { %1137 = vmatmul.bf16.vlgmr.msra.gmra.mxu0 %v1080_v24 }
  0xcf   : > { %1198 = vmatmul.bf16.vlgmr.msra.gmra.mxu1 %v1080_v24  ;;  %1437 = vmatpush.bf16.msrb.mxu0 %v4512_v63 }
  0xd0   : > { %1259 = vmatmul.bf16.vlgmr.msra.gmra.mxu2 %v1080_v24 }
 0x14b   : > { %v1138_v26 = vpop.f32.mrf.mxu0 }
 0x14c   : > { %v1199_v27 = vpop.f32.mrf.mxu1 }
 0x14d   : > { %1445 = vrot.lane.b32.xlu2 %v1199_v27, %s5407_s19  ;;  %1332 = vrot.lane.b32.xlu1 %v1199_v27, %s5408_s29 }
 0x14e   : > { %4004 = vmatpush.xpose.msk.msra.mxu3 %vm1265_vm0, %v1199_v27 }
 0x151   : > { %4005 = vmatmul.msk.f32.vlgmr.msra.gmra.mxu3 %vm1265_vm0, %v1138_v26 }
 0x153   : > { %v1140_v28 = vpop.f32.mrf.mxu0  ;;  %v5826_v30 = vpop.f32.mrf.mxu2 }
 0x154   : > { %v1201_v29 = vpop.f32.mrf.mxu1  ;;  %1324 = vmatpush.msrb.mxu3 %v5826_v30 }
 0x155   : > { %1443 = vrot.lane.b32.xlu2 %v1138_v26, %s5407_s19  ;;  %1330 = vrot.lane.b32.xlu1 %v1138_v26, %s5408_s29 }
 0x15b   : > { %v1262_v31 = vpop.f32.mrf.mxu2 }
 0x15d   : > { %1627 = vrot.lane.b32.xlu2 %v1199_v27, %s5409_s12  ;;  %1534 = vrot.lane.b32.xlu1 %v1138_v26, %s5410_s8 }
 0x165   : > { %1718 = vrot.lane.b32.xlu2 %v1199_v27, %s5411_s21  ;;  %1625 = vrot.lane.b32.xlu1 %v1138_v26, %s5409_s12 }
 0x16d   : > { %1809 = vrot.lane.b32.xlu2 %v1199_v27, %s5412_s2  ;;  %1716 = vrot.lane.b32.xlu1 %v1138_v26, %s5411_s21 }
 0x175   : > { %1898 = vrot.lane.b32.xlu2 %v1138_v26, %s5413_s1  ;;  %1900 = vrot.lane.b32.xlu1 %v1199_v27, %s5413_s1 }
 0x1a7   : > { %v1446_v32 = vpop.permute.xlu2 %1445 }
 0x1a8   : > { %4020 = vmatpush.xpose.msk.msrb.mxu1 %vm1265_vm0, %v1446_v32 }
 0x1af   : > { %v1444_v33 = vpop.permute.xlu2 %1443 }
 0x1b0   : > { %4021 = vmatmul.msk.f32.vlgmr.msrb.gmra.mxu1 %vm1265_vm0, %v1444_v33 }
 0x1b7   : > { %v1628_v54 = vpop.permute.xlu2 %1627 }
 0x1bf   : > { %v1333_v34 = vpop.permute.xlu1 %1332  ;;  %v1719_v57 = vpop.permute.xlu2 %1718 }
 0x1c0   : > { %4007 = vmatpush.xpose.msk.msra.mxu3 %vm1265_vm0, %v1333_v34 }
 0x1c7   : > { %v1331_v49 = vpop.permute.xlu1 %1330  ;;  %v1810_v59 = vpop.permute.xlu2 %1809 }
 0x1cf   : > { %v1535_v53 = vpop.permute.xlu1 %1534  ;;  %v1899_v62 = vpop.permute.xlu2 %1898 }
 0x1d4   : > { %v1289_v36 = vpop.f32.mrf.mxu3 }
 0x1d5   : > { %v1292_v37 = vsel %vm1264_vm1, -1e+20, %v1289_v36 }
 0x1d6   : > { %v1293_v38 = vmul.f32 0.25, %v1292_v37 }
 0x1d7   : > { %v1626_v55 = vpop.permute.xlu1 %1625 }
 0x1d8   : > { %v1295_v39 = vsel %vm1294_vm2, %v1293_v38, -inf }
 0x1d9   : > { %1296 = vmax.xlane.f32.xlu0 %v1295_v39 }
 0x1df   : > { %v1717_v58 = vpop.permute.xlu1 %1716 }
 0x1e7   : > { %v1901_v60 = vpop.permute.xlu1 %1900 }
 0x22d   : > { %v1468_v40 = vpop.f32.mrf.mxu1 }
 0x22e   : > { %v1471_v41 = vsel %vm1264_vm1, -1e+20, %v1468_v40 }
 0x22f   : > { %v1472_v42 = vmul.f32 0.25, %v1471_v41 }
 0x231   : > { %v1473_v43 = vsel %vm1294_vm2, %v1472_v42, -inf }
 0x232   : > { %1474 = vmax.xlane.f32.xlu1 %v1473_v43 }
 0x24c   : > { %v1297_v44 = vpop.xlane.xlu0 %1296 }
 0x24d   : > { %v1298_v45 = vsub.f32 %v1293_v38, %v1297_v44 }
 0x24f   : > { %v1299_v46 = vmul.f32 1.442695, %v1298_v45 }
 0x251   : > { %4804 = vpow2.f32 %v1299_v46 }
 0x257   : > { %v4805_v47 = vpop.eup %4804 }
 0x258   : > { %v1301_v48 = vsel %vm1294_vm2, %v4805_v47, 0.0 }
 0x259   : > { %1302 = vadd.xlane.f32.xlu0 %v1301_v48 }
 0x26d   : > { %1536 = vrot.lane.b32.xlu0 %v1199_v27, %s5410_s8 }
 0x275   : > { %1807 = vrot.lane.b32.xlu0 %v1138_v26, %s5412_s2 }
 0x2a5   : > { %v1475_v2 = vpop.xlane.xlu1 %1474 }
 0x2a6   : > { %v1476_v6 = vsub.f32 %v1472_v42, %v1475_v2 }
 0x2a8   : > { %v1477_v8 = vmul.f32 1.442695, %v1476_v6 }
 0x2cc   : > { %v1303_v50 = vpop.xlane.xlu0 %1302 }
 0x2cd   : > { %4806 = vrcp.f32 %v1303_v50 }
 0x2ce   : > { %4808 = vpow2.f32 %v1477_v8 }
 0x2d3   : > { %v4807_v51 = vpop.eup %4806 }
 0x2d4   : > { %v1305_v52 = vmul.f32 %v4807_v51, %v4805_v47  ;;  %v4809_v14 = vpop.eup %4808 }
 0x2d5   : > { %v1479_v18 = vsel %vm1294_vm2, %v4809_v14, 0.0 }
 0x2d6   : > { %4006 = vmatmul.msk.f32.vlgmr.msrb.gmra.mxu3 %vm1294_vm2, %v1305_v52 }
 0x2de   : > { %4008 = vmatmul.msk.f32.vlgmr.msra.gmra.mxu3 %vm1265_vm0, %v1331_v49 }
 0x2df   : > { %v1537_v56 = vpop.permute.xlu0 %1536 }
 0x2e0   : > { %4028 = vmatpush.xpose.msk.msra.mxu1 %vm1265_vm0, %v1537_v56 }
 0x2e3   : > { %4029 = vmatmul.msk.f32.vlgmr.msra.gmra.mxu1 %vm1265_vm0, %v1535_v53 }
 0x2e4   : > { %4036 = vmatpush.xpose.msk.msrb.mxu1 %vm1265_vm0, %v1628_v54 }
 0x2e7   : > { %v1808_v61 = vpop.permute.xlu0 %1807 }
 0x2e8   : > { %4044 = vmatpush.xpose.msk.msra.mxu1 %vm1265_vm0, %v1719_v57 }
 0x2eb   : > { %4037 = vmatmul.msk.f32.vlgmr.msrb.gmra.mxu1 %vm1265_vm0, %v1626_v55 }
 0x2ec   : > { %4052 = vmatpush.xpose.msk.msrb.mxu1 %vm1265_vm0, %v1810_v59 }
 0x2f3   : > { %4045 = vmatmul.msk.f32.vlgmr.msra.gmra.mxu1 %vm1265_vm0, %v1717_v58 }
 0x2f4   : > { %4060 = vmatpush.xpose.msk.msra.mxu1 %vm1265_vm0, %v1901_v60 }
 0x2fb   : > { %4053 = vmatmul.msk.f32.vlgmr.msrb.gmra.mxu1 %vm1265_vm0, %v1808_v61 }
 0x303   : > { %4061 = vmatmul.msk.f32.vlgmr.msra.gmra.mxu1 %vm1265_vm0, %v1899_v62 }
 0x359   : > { %v1326_v0 = vpop.f32.mrf.mxu3 }
 0x35a   : > { %v1329_v1 = vpack.c.bf16 %v1326_v0, %v1326_v0 }
 0x35c   : > { %4019 = vmatmul.msk.bf16.vlgmr.msrb.gmra.mxu0 %vm1265_vm0, %v1329_v1 }
 0x360   : > { %v1559_v3 = vpop.f32.mrf.mxu1 }
 0x361   : > { %v1562_v4 = vsel %vm1264_vm1, -1e+20, %v1559_v3  ;;  %v1355_v16 = vpop.f32.mrf.mxu3 }
 0x362   : > { %v1563_v5 = vmul.f32 0.25, %v1562_v4  ;;  %v1358_v20 = vsel %vm1264_vm1, -1e+20, %v1355_v16 }
 0x363   : > { %v1359_v21 = vmul.f32 0.25, %v1358_v20 }
 0x364   : > { %v1564_v7 = vsel %vm1294_vm2, %v1563_v5, -inf }
 0x365   : > { %1565 = vmax.xlane.f32.xlu2 %v1564_v7  ;;  %v1360_v26 = vsel %vm1294_vm2, %v1359_v21, -inf }
 0x368   : > { %v1650_v9 = vpop.f32.mrf.mxu1 }
 0x369   : > { %v1653_v10 = vsel %vm1264_vm1, -1e+20, %v1650_v9 }
 0x36a   : > { %v1654_v11 = vmul.f32 0.25, %v1653_v10 }
 0x36c   : > { %v1655_v12 = vsel %vm1294_vm2, %v1654_v11, -inf }
 0x36d   : > { %1656 = vmax.xlane.f32.xlu0 %v1655_v12 }
 0x370   : > { %v1741_v13 = vpop.f32.mrf.mxu1 }
 0x371   : > { %v1744_v15 = vsel %vm1264_vm1, -1e+20, %v1741_v13 }
 0x372   : > { %v1745_v17 = vmul.f32 0.25, %v1744_v15 }
 0x374   : > { %v1746_v19 = vsel %vm1294_vm2, %v1745_v17, -inf }
 0x375   : > { %1480 = vadd.xlane.f32.xlu0 %v1479_v18  ;;  %1747 = vmax.xlane.f32.xlu2 %v1746_v19 }
 0x378   : > { %v1832_v23 = vpop.f32.mrf.mxu1 }
 0x379   : > { %v1835_v24 = vsel %vm1264_vm1, -1e+20, %v1832_v23 }
 0x37a   : > { %v1836_v25 = vmul.f32 0.25, %v1835_v24 }
 0x37c   : > { %v1837_v27 = vsel %vm1294_vm2, %v1836_v25, -inf }
 0x37d   : > { %1361 = vmax.xlane.f32.xlu0 %v1360_v26  ;;  %1838 = vmax.xlane.f32.xlu1 %v1837_v27 }
 0x380   : > { %v1923_v28 = vpop.f32.mrf.mxu1 }
 0x381   : > { %v1926_v29 = vsel %vm1264_vm1, -1e+20, %v1923_v28 }
 0x382   : > { %v1927_v31 = vmul.f32 0.25, %v1926_v29  ;;  %v4515_v29 = vld [vmem:[#allocation14 + $0x18] sm:$0xff] }
 0x383   : > { %1618 = vmatpush.bf16.msra.mxu0 %v4515_v29  ;;  %v4543_v29 = vld [vmem:[#allocation19 + $0x38] sm:$0xff] }
 0x384   : > { %v1928_v32 = vsel %vm1294_vm2, %v1927_v31, -inf }
 0x385   : > { %1929 = vmax.xlane.f32.xlu2 %v1928_v32 }
 0x391   : > { %1484 = vrot.lane.b32.xlu0 %v5826_v30, %s5407_s19 }
 0x396   : > { %1372 = vrot.lane.b32.xlu1 %v5826_v30, %s5408_s29 }
 0x3d8   : > { %v1566_v33 = vpop.xlane.xlu2 %1565 }
 0x3d9   : > { %v1567_v34 = vsub.f32 %v1563_v5, %v1566_v33  ;;  %v5880_v36 = vpop.f32.mrf.mxu0  ;;  %v4514_v33 = vld [vmem:[#allocation14 + $0x10] sm:$0xff] }
 0x3db   : > { %v1568_v37 = vmul.f32 1.442695, %v1567_v34 }
 0x3dd   : > { %4810 = vpow2.f32 %v1568_v37 }
 0x3e0   : > { %v1657_v38 = vpop.xlane.xlu0 %1656 }
 0x3e1   : > { %v1658_v39 = vsub.f32 %v1654_v11, %v1657_v38  ;;  %v1441_v35 = vpop.f32.mrf.mxu0  ;;  %v4517_v38 = vld [vmem:[#allocation14 + $0x28] sm:$0xff] }
 0x3e2   : > { %1800 = vmatpush.bf16.msrb.mxu0 %v4517_v38  ;;  %v4516_v35 = vld [vmem:[#allocation14 + $0x20] sm:$0xff] }
 0x3e3   : > { %v4811_v40 = vpop.eup %4810  ;;  %v1659_v41 = vmul.f32 1.442695, %v1658_v39 }
 0x3e4   : > { %v1570_v42 = vsel %vm1294_vm2, %v4811_v40, 0.0 }
 0x3e5   : > { %4812 = vpow2.f32 %v1659_v41  ;;  %1571 = vadd.xlane.f32.xlu2 %v1570_v42  ;;  %v4535_v41 = vld [vmem:[#allocation17 + $0x38] sm:$0xff]  ;;  %v4534_v42 = vld [vmem:[#allocation17 + $0x30] sm:$0xff] }
 0x3e6   : > { %2207 = vmatpush.bf16.msrb.mxu1 %v4535_v41  ;;  %v4540_v41 = vld [vmem:[#allocation19 + $0x20] sm:$0xff] }
 0x3e8   : > { %v1748_v43 = vpop.xlane.xlu2 %1747  ;;  %v1481_v44 = vpop.xlane.xlu0 %1480 }
 0x3e9   : > { %v1749_v45 = vsub.f32 %v1745_v17, %v1748_v43 }
 0x3ea   : > { %2208 = vmatpush.bf16.msrb.mxu1 %v4534_v42  ;;  %v4539_v42 = vld [vmem:[#allocation19 + $0x18] sm:$0xff] }
 0x3eb   : > { %v4813_v46 = vpop.eup %4812  ;;  %v1750_v47 = vmul.f32 1.442695, %v1749_v45  ;;  %v4518_v45 = vld [vmem:[#allocation14 + $0x30] sm:$0xff] }
 0x3ec   : > { %v1661_v48 = vsel %vm1294_vm2, %v4813_v46, 0.0 }
 0x3ed   : > { %4814 = vpow2.f32 %v1750_v47  ;;  %1662 = vadd.xlane.f32.xlu2 %v1661_v48 }
 0x3f0   : > { %v1362_v49 = vpop.xlane.xlu0 %1361  ;;  %v1839_v57 = vpop.xlane.xlu1 %1838 }
 0x3f1   : > { %v1363_v50 = vsub.f32 %v1359_v21, %v1362_v49  ;;  %v1840_v0 = vsub.f32 %v1836_v25, %v1839_v57  ;;  %v4527_v49 = vld [vmem:[#allocation16 + $0x38] sm:$0xff]  ;;  %v4524_v57 = vld [vmem:[#allocation16 + $0x20] sm:$0xff] }
 0x3f3   : > { %v4815_v51 = vpop.eup %4814  ;;  %v1364_v52 = vmul.f32 1.442695, %v1363_v50  ;;  %v1841_v1 = vmul.f32 1.442695, %v1840_v0  ;;  %v4532_v50 = vld [vmem:[#allocation17 + $0x20] sm:$0xff]  ;;  %v4521_v0 = vld [vmem:[#allocation16 + $0x8] sm:$0xff] }
 0x3f4   : > { %v1752_v53 = vsel %vm1294_vm2, %v4815_v51, 0.0 }
 0x3f5   : > { %1753 = vadd.xlane.f32.xlu1 %v1752_v53  ;;  %4816 = vpow2.f32 %v1364_v52  ;;  %v4519_v52 = vld [vmem:[#allocation14 + $0x38] sm:$0xff] }
 0x3f6   : > { %4818 = vrcp.f32 %v1481_v44  ;;  %v4533_v44 = vld [vmem:[#allocation17 + $0x28] sm:$0xff]  ;;  %v4531_v53 = vld [vmem:[#allocation17 + $0x18] sm:$0xff] }
 0x3f7   : > { %2209 = vmatpush.bf16.msrb.mxu1 %v4533_v44  ;;  %v4538_v44 = vld [vmem:[#allocation19 + $0x10] sm:$0xff] }
 0x3f8   : > { %v1930_v61 = vpop.xlane.xlu2 %1929 }
 0x3f9   : > { %v1931_v62 = vsub.f32 %v1927_v31, %v1930_v61  ;;  %v4513_v31 = vld [vmem:[#allocation14 + $0x8] sm:$0xff]  ;;  %v1012_v61 = vld [vmem:[%s869_s22] sm:$0xff] }
 0x3fb   : > { %v4817_v54 = vpop.eup %4816  ;;  %v1932_v63 = vmul.f32 1.442695, %v1931_v62  ;;  %2210 = vmatpush.bf16.msrb.mxu1 %v4532_v50  ;;  %v2158_v62 = vpack.c.bf16 %v1012_v61, %v1012_v61 }
 0x3fc   : > { %v1366_v55 = vsel %vm1294_vm2, %v4817_v54, 0.0  ;;  %v4819_v56 = vpop.eup %4818 }
 0x3fd   : > { %1367 = vadd.xlane.f32.xlu0 %v1366_v55  ;;  %v1483_v59 = vmul.f32 %v4819_v56, %v4809_v14  ;;  %4820 = vpow2.f32 %v1932_v63  ;;  %v4525_v55 = vld [vmem:[#allocation16 + $0x28] sm:$0xff]  ;;  %v4530_v56 = vld [vmem:[#allocation17 + $0x10] sm:$0xff] }
 0x3fe   : > { %4822 = vpow2.f32 %v1841_v1  ;;  %v4522_v63 = vld [vmem:[#allocation16 + $0x10] sm:$0xff]  ;;  %v4520_v1 = vld [vmem:[#allocation16] sm:$0xff] }
 0x3ff   : > { %2211 = vmatpush.bf16.msrb.mxu1 %v4531_v53 }
 0x403   : > { %v1485_v58 = vpop.permute.xlu0 %1484  ;;  %v4821_v2 = vpop.eup %4820  ;;  %2212 = vmatpush.bf16.msrb.mxu1 %v4530_v56 }
 0x404   : > { %1505 = vmatpush.msrb.mxu2 %v1485_v58  ;;  %v1934_v3 = vsel %vm1294_vm2, %v4821_v2, 0.0  ;;  %v4823_v4 = vpop.eup %4822  ;;  %v4529_v58 = vld [vmem:[#allocation17 + $0x8] sm:$0xff] }
 0x405   : > { %1575 = vrot.lane.b32.xlu2 %v5826_v30, %s5410_s8  ;;  %4022 = vmatmul.msk.f32.vlgmr.msrb.gmra.mxu2 %vm1294_vm2, %v1483_v59  ;;  %v1843_v5 = vsel %vm1294_vm2, %v4823_v4, 0.0  ;;  %v4523_v59 = vld [vmem:[#allocation16 + $0x18] sm:$0xff] }
 0x407   : > { %2213 = vmatpush.bf16.msrb.mxu1 %v4529_v58 }
 0x408   : > { %v1373_v60 = vpop.permute.xlu1 %1372 }
 0x409   : > { %1393 = vmatpush.msrb.mxu3 %v1373_v60  ;;  %v4528_v60 = vld [vmem:[#allocation17] sm:$0xff] }
 0x40b   : > { %1415 = vmatpush.bf16.msra.mxu3 %v4513_v31  ;;  %2214 = vmatpush.bf16.msrb.mxu1 %v4528_v60 }
 0x40d   : > { %1757 = vrot.lane.b32.xlu2 %v5826_v30, %s5411_s21 }
 0x40e   : > { %1848 = vrot.lane.b32.xlu1 %v5826_v30, %s5412_s2  ;;  %2215 = vmatmul.bf16.vlgmr.msrb.gmra.mxu1 %v2158_v62 }
 0x411   : > { %1666 = vrot.lane.b32.xlu0 %v5826_v30, %s5409_s12 }
 0x436   : > { %1935 = vadd.xlane.f32.xlu2 %v1934_v3 }
 0x43b   : > { %1844 = vadd.xlane.f32.xlu0 %v1843_v5 }
 0x44f   : > { %1939 = vrot.lane.b32.xlu0 %v5826_v30, %s5413_s1 }
 0x458   : > { %v1572_v6 = vpop.xlane.xlu2 %1571 }
 0x459   : > { %4824 = vrcp.f32 %v1572_v6  ;;  %v1013_v6 = vld [vmem:[%s879_s28] sm:$0xff] }
 0x45f   : > { %v4825_v8 = vpop.eup %4824 }
 0x460   : > { %v1663_v7 = vpop.xlane.xlu2 %1662  ;;  %v1574_v9 = vmul.f32 %v4825_v8, %v4811_v40 }
 0x468   : > { %v1576_v10 = vpop.permute.xlu2 %1575  ;;  %v1754_v14 = vpop.xlane.xlu1 %1753 }
 0x469   : > { %1596 = vmatpush.msra.mxu2 %v1576_v10 }
 0x46a   : > { %4030 = vmatmul.msk.f32.vlgmr.msra.gmra.mxu2 %vm1294_vm2, %v1574_v9 }
 0x470   : > { %v1368_v11 = vpop.xlane.xlu0 %1367  ;;  %v1758_v17 = vpop.permute.xlu2 %1757 }
 0x471   : > { %4826 = vrcp.f32 %v1368_v11 }
 0x472   : > { %4828 = vrcp.f32 %v1663_v7  ;;  %v2096_v7 = vpack.c.bf16 %v1013_v6, %v1013_v6 }
 0x473   : > { %4830 = vrcp.f32 %v1754_v14 }
 0x477   : > { %v4827_v12 = vpop.eup %4826 }
 0x478   : > { %v1370_v13 = vmul.f32 %v4827_v12, %v4817_v54  ;;  %v4829_v15 = vpop.eup %4828  ;;  %v4526_v54 = vld [vmem:[#allocation16 + $0x30] sm:$0xff] }
 0x479   : > { %v1665_v30 = vmul.f32 %v4829_v15, %v4813_v46  ;;  %v4831_v19 = vpop.eup %4830 }
 0x47a   : > { %4009 = vmatmul.msk.f32.vlgmr.msrb.gmra.mxu3 %vm1294_vm2, %v1370_v13  ;;  %v1756_v20 = vmul.f32 %v4831_v19, %v4815_v51 }
 0x47b   : > { %1527 = vmatpush.bf16.msrb.mxu3 %v4514_v33 }
 0x480   : > { %v1849_v18 = vpop.permute.xlu1 %1848 }
 0x483   : > { %v1667_v16 = vpop.permute.xlu0 %1666 }
 0x484   : > { %1687 = vmatpush.msrb.mxu2 %v1667_v16 }
 0x485   : > { %4038 = vmatmul.msk.f32.vlgmr.msrb.gmra.mxu2 %vm1294_vm2, %v1665_v30 }
 0x486   : > { %1778 = vmatpush.msra.mxu2 %v1758_v17 }
 0x488   : > { %1869 = vmatpush.msrb.mxu2 %v1849_v18  ;;  %v1507_v32 = vpop.f32.mrf.mxu2 }
 0x489   : > { %v1510_v46 = vpack.c.bf16 %v1507_v32, %v1507_v32  ;;  %v4542_v32 = vld [vmem:[#allocation19 + $0x30] sm:$0xff] }
 0x48b   : > { %v5916_v17 = vpop.f32.mrf.mxu1 }
 0x48d   : > { %4046 = vmatmul.msk.f32.vlgmr.msra.gmra.mxu2 %vm1294_vm2, %v1756_v20 }
 0x493   : > { %v2218_v19 = vpop.f32.mrf.mxu1 }
 0x4a9   : > { %v1936_v24 = vpop.xlane.xlu2 %1935 }
 0x4ae   : > { %v1845_v21 = vpop.xlane.xlu0 %1844 }
 0x4af   : > { %4832 = vrcp.f32 %v1845_v21 }
 0x4b0   : > { %4834 = vrcp.f32 %v1936_v24 }
 0x4b5   : > { %v4833_v23 = vpop.eup %4832 }
 0x4b6   : > { %v1847_v25 = vmul.f32 %v4833_v23, %v4823_v4  ;;  %v4835_v26 = vpop.eup %4834 }
 0x4b7   : > { %v1938_v27 = vmul.f32 %v4835_v26, %v4821_v2 }
 0x4b8   : > { %4054 = vmatmul.msk.f32.vlgmr.msrb.gmra.mxu2 %vm1294_vm2, %v1847_v25 }
 0x4c1   : > { %v1940_v28 = vpop.permute.xlu0 %1939 }
 0x4c2   : > { %1960 = vmatpush.msra.mxu2 %v1940_v28 }
 0x4c3   : > { %4062 = vmatmul.msk.f32.vlgmr.msra.gmra.mxu2 %vm1294_vm2, %v1938_v27  ;;  %v4795_v27 = vld [vmem:[%s6211_s16] ss:$0 sm:$0xff]  ;;  %s6216_s16 = sld [smem:[#allocation57_spill]] }
 0x4c4   : > { %2269 = vmatpush.bf16.msrb.mxu2 %v4543_v29  ;;  %v4544_v29 = vld [vmem:[#allocation20] sm:$0xff] }
 0x4c5   : > { %2450 = vmatpush.bf16.msra.mxu1 %v4544_v29 }
 0x4c8   : > { %2270 = vmatpush.bf16.msrb.mxu2 %v4542_v32 }
 0x4ed   : > { %v1598_v34 = vpop.f32.mrf.mxu2 }
 0x4ee   : > { %v1601_v37 = vpack.c.bf16 %v1598_v34, %v1598_v34 }
 0x4f0   : > { %4035 = vmatmul.msk.bf16.vlgmr.msra.gmra.mxu0 %vm1265_vm0, %v1601_v37 }
 0x4f1   : > { %1982 = vmatpush.bf16.msra.mxu0 %v4519_v52 }
 0x4fd   : > { %v1395_v39 = vpop.f32.mrf.mxu3 }
 0x4fe   : > { %v1398_v40 = vpack.c.bf16 %v1395_v39, %v1395_v39 }
 0x500   : > { %4014 = vmatmul.msk.bf16.vlgmr.msra.gmra.mxu3 %vm1265_vm0, %v1398_v40  ;;  %v5414_v40 = vmov 128.0  }
 0x501   : > { %1709 = vmatpush.bf16.msra.mxu3 %v4516_v35  ;;  %v4541_v35 = vld [vmem:[#allocation19 + $0x28] sm:$0xff]  ;;  %4836 = vrcp.f32 %v5414_v40 }
 0x502   : > { %2271 = vmatpush.bf16.msrb.mxu2 %v4541_v35 }
 0x506   : > { %2272 = vmatpush.bf16.msrb.mxu2 %v4540_v41 }
 0x508   : > { %v1689_v43 = vpop.f32.mrf.mxu2 }
 0x509   : > { %v1692_v51 = vpack.c.bf16 %v1689_v43, %v1689_v43 }
 0x50a   : > { %2273 = vmatpush.bf16.msrb.mxu2 %v4539_v42 }
 0x50e   : > { %2274 = vmatpush.bf16.msrb.mxu2 %v4538_v44 }
 0x510   : > { %4027 = vmatmul.msk.bf16.vlgmr.msrb.gmra.mxu3 %vm1265_vm0, %v1510_v46  ;;  %v1780_v47 = vpop.f32.mrf.mxu2  ;;  %v4537_v46 = vld [vmem:[#allocation19 + $0x8] sm:$0xff] }
 0x511   : > { %v1783_v48 = vpack.c.bf16 %v1780_v47, %v1780_v47  ;;  %1891 = vmatpush.bf16.msrb.mxu3 %v4518_v45  ;;  %v4536_v47 = vld [vmem:[#allocation19] sm:$0xff] }
 0x512   : > { %2275 = vmatpush.bf16.msrb.mxu2 %v4537_v46 }
 0x513   : > { %4051 = vmatmul.msk.bf16.vlgmr.msrb.gmra.mxu0 %vm1265_vm0, %v1783_v48 }
 0x514   : > { %4164 = vmatpush.xpose.msk.msrb.mxu0 %vm1265_vm0, %v5916_v17 }
 0x516   : > { %2276 = vmatpush.bf16.msrb.mxu2 %v4536_v47 }
 0x520   : > { %4043 = vmatmul.msk.bf16.vlgmr.msra.gmra.mxu3 %vm1265_vm0, %v1692_v51 }
 0x521   : > { %2145 = vmatpush.bf16.msra.mxu3 %v4527_v49 }
 0x525   : > { %2146 = vmatpush.bf16.msra.mxu3 %v4526_v54 }
 0x529   : > { %2147 = vmatpush.bf16.msra.mxu3 %v4525_v55 }
 0x52d   : > { %2148 = vmatpush.bf16.msra.mxu3 %v4524_v57 }
 0x531   : > { %2149 = vmatpush.bf16.msra.mxu3 %v4523_v59 }
 0x535   : > { %2150 = vmatpush.bf16.msra.mxu3 %v4522_v63 }
 0x539   : > { %2151 = vmatpush.bf16.msra.mxu3 %v4521_v0 }
 0x53b   : > { %v1871_v2 = vpop.f32.mrf.mxu2 }
 0x53c   : > { %v1874_v3 = vpack.c.bf16 %v1871_v2, %v1871_v2 }
 0x53d   : > { %2152 = vmatpush.bf16.msra.mxu3 %v4520_v1 }
 0x53e   : > { %4059 = vmatmul.msk.bf16.vlgmr.msrb.gmra.mxu3 %vm1265_vm0, %v1874_v3 }
 0x546   : > { %v1962_v4 = vpop.f32.mrf.mxu2 }
 0x547   : > { %v1965_v5 = vpack.c.bf16 %v1962_v4, %v1962_v4 }
 0x549   : > { %4067 = vmatmul.msk.bf16.vlgmr.msra.gmra.mxu0 %vm1265_vm0, %v1965_v5 }
 0x54e   : > { %2153 = vmatmul.bf16.vlgmr.msra.gmra.mxu3 %v2096_v7  ;;  %v4796_v7 = vld [vmem:[%s6119_s9] ss:$0 sm:$0xff] }
 0x56d   : > { %v1620_v8 = vpop.f32.mrf.mxu0 }
 0x575   : > { %v1622_v9 = vpop.f32.mrf.mxu0 }
 0x583   : > { %v1417_v10 = vpop.f32.mrf.mxu3 }
 0x584   : > { %v1440_v18 = vadd.f32 %v5880_v36, %v1417_v10 }
 0x58b   : > { %v1419_v11 = vpop.f32.mrf.mxu3 }
 0x58c   : > { %v4797_v11 = vld [vmem:[%s6120_s10] ss:$0 sm:$0xff] }
 0x590   : > { %v1802_v12 = vpop.f32.mrf.mxu0 }
 0x593   : > { %v1529_v13 = vpop.f32.mrf.mxu3 }
 0x594   : > { %v1533_v20 = vadd.f32 %v1529_v13, %v1440_v18 }
 0x596   : > { %v1624_v21 = vadd.f32 %v1620_v8, %v1533_v20 }
 0x598   : > { %v1804_v14 = vpop.f32.mrf.mxu0 }
 0x59b   : > { %v1531_v15 = vpop.f32.mrf.mxu3 }
 0x5a3   : > { %v1711_v30 = vpop.f32.mrf.mxu3 }
 0x5a4   : > { %v1715_v23 = vadd.f32 %v1711_v30, %v1624_v21 }
 0x5a6   : > { %v1806_v25 = vadd.f32 %v1802_v12, %v1715_v23 }
 0x5ab   : > { %v1713_v16 = vpop.f32.mrf.mxu3 }
 0x5c1   : > { %v1893_v24 = vpop.f32.mrf.mxu3 }
 0x5c2   : > { %v1897_v26 = vadd.f32 %v1893_v24, %v1806_v25 }
 0x5c6   : > { %v1984_v28 = vpop.f32.mrf.mxu0 }
 0x5c7   : > { %v1988_v31 = vadd.f32 %v1984_v28, %v1897_v26 }
 0x5c9   : > { %v1992_v33 = vadd.f32 %v4795_v27, %v1988_v31  ;;  %v1895_v34 = vpop.f32.mrf.mxu3 }
 0x5cb   : > { %v1993_v36 = vadd.f32 %v1992_v33, %v5808_v22  ;;  %v4837_v22 = vpop.eup %4836 }
 0x5cc   : > { %v1999_v43 = vmul.f32 128.0, %v4837_v22  ;;  %vm2003_vm3 = vweird.f32 %v4837_v22 }
 0x5cd   : > { %1996 = vadd.xlane.f32.xlu1 %v1993_v36 }
 0x5ce   : > { %v1986_v37 = vpop.f32.mrf.mxu0  ;;  %v2000_v45 = vsub.f32 1.0, %v1999_v43 }
 0x5d0   : > { %v2001_v48 = vmul.f32 %v4837_v22, %v2000_v45 }
 0x5d1   : > { %v5925_v38 = vpop.f32.mrf.mxu3 }
 0x5d2   : > { %4165 = vmatmul.msk.f32.vlgmr.msrb.gmra.mxu0 %vm1265_vm0, %v5925_v38  ;;  %v2002_v49 = vadd.f32 %v4837_v22, %v2001_v48 }
 0x5d4   : > { %v5931_v50 = vsel %vm2003_vm3, %v4837_v22, %v2002_v49 }
 0x5d9   : > { %v2156_v39 = vpop.f32.mrf.mxu3 }
 0x5e6   : > { %2458 = vrot.lane.b32.xlu1 %v5916_v17, %s5407_s19 }
 0x640   : > { %v1997_v51 = vpop.xlane.xlu1 %1996 }
 0x641   : > { %v2005_v52 = vmul.f32 %v5931_v50, %v1997_v51 }
 0x643   : > { %v2006_v53 = vsub.f32 %v1993_v36, %v2005_v52 }
 0x645   : > { %v2007_v54 = vmul.f32 %v2006_v53, %v2006_v53 }
 0x647   : > { %2008 = vadd.xlane.f32.xlu2 %v2007_v54 }
 0x64f   : > { %v2305_v55 = vpop.f32.mrf.mxu0 }
 0x650   : > { %v2308_v56 = vmul.f32 0.25, %v2305_v55 }
 0x652   : > { %v2309_v57 = vsel %vm1294_vm2, %v2308_v56, -inf }
 0x653   : > { %2310 = vmax.xlane.f32.xlu0 %v2309_v57 }
 0x658   : > { %v2459_v58 = vpop.permute.xlu1 %2458 }
 0x659   : > { %4180 = vmatpush.xpose.msk.msra.mxu2 %vm1265_vm0, %v2459_v58 }
 0x65f   : > { %2346 = vrot.lane.b32.xlu2 %v5916_v17, %s5408_s29 }
 0x667   : > { %2456 = vrot.lane.b32.xlu0 %v5925_v38, %s5407_s19 }
 0x66f   : > { %2548 = vrot.lane.b32.xlu0 %v5916_v17, %s5410_s8 }
 0x6ba   : > { %v2009_v59 = vpop.xlane.xlu2 %2008 }
 0x6bb   : > { %v2010_v60 = vmul.f32 %v2009_v59, %v5931_v50 }
 0x6bd   : > { %v2011_v61 = vadd.f32 1e-05, %v2010_v60 }
 0x6bf   : > { %4838 = vrsqrt.f32 %v2011_v61  ;;  %vm2018_vm5 = vweird.f32 %v2011_v61 }
 0x6c2   : > { %v2347_v16 = vpop.permute.xlu2 %2346 }
 0x6c5   : > { %v4839_v62 = vpop.eup %4838 }
 0x6c6   : > { %v2013_v63 = vmul.f32 %v4839_v62, %v2011_v61  ;;  %v2311_v0 = vpop.xlane.xlu0 %2310  ;;  %vm2019_vm4 = vweird.f32 %v4839_v62 }
 0x6c7   : > { %v2312_v1 = vsub.f32 %v2308_v56, %v2311_v0  ;;  %vm2020_vm6 = vmor %vm2018_vm5, %vm2019_vm4  ;;  %v4545_v0 = vld [vmem:[#allocation20 + $0x8] sm:$0xff] }
 0x6c8   : > { %v2014_v2 = vmul.f32 %v4839_v62, %v2013_v63 }
 0x6c9   : > { %v2313_v3 = vmul.f32 1.442695, %v2312_v1  ;;  %v4546_v1 = vld [vmem:[#allocation20 + $0x10] sm:$0xff] }
 0x6ca   : > { %v2015_v4 = vmul.f32 0.5, %v2014_v2 }
 0x6cb   : > { %4840 = vpow2.f32 %v2313_v3 }
 0x6cc   : > { %v2016_v5 = vsub.f32 1.5, %v2015_v4 }
 0x6ce   : > { %v2017_v6 = vmul.f32 %v4839_v62, %v2016_v5 }
 0x6d0   : > { %v2021_v8 = vsel %vm2020_vm6, %v4839_v62, %v2017_v6 }
 0x6d1   : > { %v4841_v9 = vpop.eup %4840  ;;  %v2022_v10 = vmul.f32 %v2021_v8, %v2006_v53 }
 0x6d2   : > { %v2315_v12 = vsel %vm1294_vm2, %v4841_v9, 0.0 }
 0x6d3   : > { %2316 = vadd.xlane.f32.xlu2 %v2315_v12  ;;  %v2026_v13 = vmul.f32 %v4796_v7, %v2022_v10 }
 0x6d5   : > { %v5950_v14 = vadd.f32 %v4797_v11, %v2026_v13 }
 0x6d7   : > { %v2220_v15 = vpack.c.bf16 %v5950_v14, %v5950_v14 }
 0x6d9   : > { %2277 = vmatmul.bf16.vlgmr.msrb.gmra.mxu2 %v2220_v15  ;;  %v2457_v30 = vpop.permute.xlu0 %2456 }
 0x6da   : > { %2539 = vmatpush.bf16.msrb.mxu2 %v4546_v1 }
 0x6e1   : > { %v2549_v51 = vpop.permute.xlu0 %2548 }
 0x6e9   : > { %4181 = vmatmul.msk.f32.vlgmr.msra.gmra.mxu2 %vm1265_vm0, %v2457_v30 }
 0x6eb   : > { %2344 = vrot.lane.b32.xlu2 %v5925_v38, %s5408_s29 }
 0x746   : > { %v2317_v18 = vpop.xlane.xlu2 %2316 }
 0x747   : > { %4842 = vrcp.f32 %v2317_v18 }
 0x74d   : > { %v4843_v19 = vpop.eup %4842 }
 0x74e   : > { %v2319_v20 = vmul.f32 %v4843_v19, %v4841_v9  ;;  %v2345_v24 = vpop.permute.xlu2 %2344 }
 0x75c   : > { %v5957_v21 = vpop.f32.mrf.mxu2 }
 0x75d   : > { %2385 = vrot.lane.b32.xlu2 %v5957_v21, %s5408_s29  ;;  %2338 = vmatpush.msra.mxu0 %v5957_v21 }
 0x75e   : > { %4166 = vmatmul.msk.f32.vlgmr.msra.gmra.mxu0 %vm1294_vm2, %v2319_v20 }
 0x75f   : > { %4167 = vmatpush.xpose.msk.msrb.mxu0 %vm1265_vm0, %v2347_v16 }
 0x763   : > { %2428 = vmatpush.bf16.msra.mxu0 %v4545_v0 }
 0x764   : > { %v2280_v23 = vpop.f32.mrf.mxu2 }
 0x765   : > { %2546 = vrot.lane.b32.xlu2 %v5925_v38, %s5410_s8 }
 0x766   : > { %4168 = vmatmul.msk.f32.vlgmr.msrb.gmra.mxu0 %vm1265_vm0, %v2345_v24 }
 0x76c   : > { %v2481_v25 = vpop.f32.mrf.mxu2 }
 0x76d   : > { %v2484_v26 = vmul.f32 0.25, %v2481_v25 }
 0x76f   : > { %v2485_v27 = vsel %vm1294_vm2, %v2484_v26, -inf }
 0x770   : > { %2486 = vmax.xlane.f32.xlu1 %v2485_v27 }
 0x789   : > { %2496 = vrot.lane.b32.xlu1 %v5957_v21, %s5407_s19  ;;  %s6213_s19 = sld [smem:[#allocation54_spill]] }
 0x791   : > { %2728 = vrot.lane.b32.xlu1 %v5916_v17, %s5411_s21 }
 0x799   : > { %2816 = vrot.lane.b32.xlu1 %v5925_v38, %s5412_s2 }
 0x7b7   : > { %v2386_v28 = vpop.permute.xlu2 %2385 }
 0x7b8   : > { %2406 = vmatpush.msrb.mxu3 %v2386_v28 }
 0x7bf   : > { %v2547_v22 = vpop.permute.xlu2 %2546 }
 0x7db   : > { %v2340_v31 = vpop.f32.mrf.mxu0 }
 0x7dc   : > { %v2343_v32 = vpack.c.bf16 %v2340_v31, %v2340_v31 }
 0x7de   : > { %4179 = vmatmul.msk.bf16.vlgmr.msra.gmra.mxu1 %vm1265_vm0, %v2343_v32 }
 0x7e3   : > { %v2369_v33 = vpop.f32.mrf.mxu0  ;;  %v2487_v37 = vpop.xlane.xlu1 %2486 }
 0x7e4   : > { %v2372_v34 = vmul.f32 0.25, %v2369_v33  ;;  %v2488_v35 = vsub.f32 %v2484_v26, %v2487_v37 }
 0x7e6   : > { %v2373_v36 = vsel %vm1294_vm2, %v2372_v34, -inf  ;;  %v2489_v40 = vmul.f32 1.442695, %v2488_v35 }
 0x7e7   : > { %2374 = vmax.xlane.f32.xlu2 %v2373_v36 }
 0x7e8   : > { %4844 = vpow2.f32 %v2489_v40 }
 0x7ee   : > { %v4845_v41 = vpop.eup %4844 }
 0x7ef   : > { %v2491_v42 = vsel %vm1294_vm2, %v4845_v41, 0.0 }
 0x7fb   : > { %v2497_v39 = vpop.permute.xlu1 %2496 }
 0x7fc   : > { %2517 = vmatpush.msra.mxu3 %v2497_v39 }
 0x7ff   : > { %2638 = vrot.lane.b32.xlu2 %v5916_v17, %s5409_s12 }
 0x828   : > { %2492 = vadd.xlane.f32.xlu2 %v2491_v42 }
 0x840   : > { %2726 = vrot.lane.b32.xlu2 %v5925_v38, %s5411_s21 }
 0x848   : > { %2908 = vrot.lane.b32.xlu2 %v5916_v17, %s5413_s1 }
 0x85a   : > { %v2375_v43 = vpop.xlane.xlu2 %2374 }
 0x85b   : > { %v2376_v44 = vsub.f32 %v2372_v34, %v2375_v43  ;;  %v5983_v45 = vpop.f32.mrf.mxu1 }
 0x85d   : > { %v2377_v46 = vmul.f32 1.442695, %v2376_v44 }
 0x85f   : > { %4846 = vpow2.f32 %v2377_v46 }
 0x862   : > { %v2639_v52 = vpop.permute.xlu2 %2638 }
 0x863   : > { %v2454_v47 = vpop.f32.mrf.mxu1 }
 0x865   : > { %v4847_v48 = vpop.eup %4846 }
 0x866   : > { %v2379_v49 = vsel %vm1294_vm2, %v4847_v48, 0.0 }
 0x867   : > { %2380 = vadd.xlane.f32.xlu0 %v2379_v49 }
 0x87b   : > { %2636 = vrot.lane.b32.xlu0 %v5925_v38, %s5409_s12 }
 0x883   : > { %2818 = vrot.lane.b32.xlu0 %v5916_v17, %s5412_s2 }
 0x88b   : > { %2906 = vrot.lane.b32.xlu0 %v5925_v38, %s5413_s1  ;;  %v2729_v38 = vpop.permute.xlu1 %2728 }
 0x893   : > { %v2817_v62 = vpop.permute.xlu1 %2816 }
 0x89b   : > { %v2493_v54 = vpop.xlane.xlu2 %2492 }
 0x8a3   : > { %v2727_v59 = vpop.permute.xlu2 %2726 }
 0x8ab   : > { %v2909_v61 = vpop.permute.xlu2 %2908 }
 0x8da   : > { %v2381_v53 = vpop.xlane.xlu0 %2380 }
 0x8db   : > { %4848 = vrcp.f32 %v2381_v53 }
 0x8dc   : > { %4850 = vrcp.f32 %v2493_v54 }
 0x8e1   : > { %v4849_v55 = vpop.eup %4848 }
 0x8e2   : > { %v2383_v56 = vmul.f32 %v4849_v55, %v4847_v48  ;;  %v4851_v57 = vpop.eup %4850 }
 0x8e3   : > { %v2495_v58 = vmul.f32 %v4851_v57, %v4845_v41 }
 0x8e4   : > { %4169 = vmatmul.msk.f32.vlgmr.msrb.gmra.mxu3 %vm1294_vm2, %v2383_v56 }
 0x8e5   : > { %4188 = vmatpush.xpose.msk.msrb.mxu3 %vm1265_vm0, %v2549_v51 }
 0x8ec   : > { %4182 = vmatmul.msk.f32.vlgmr.msra.gmra.mxu3 %vm1294_vm2, %v2495_v58 }
 0x8ed   : > { %4196 = vmatpush.xpose.msk.msra.mxu3 %vm1265_vm0, %v2639_v52  ;;  %v2637_v17 = vpop.permute.xlu0 %2636 }
 0x8f4   : > { %4189 = vmatmul.msk.f32.vlgmr.msrb.gmra.mxu3 %vm1265_vm0, %v2547_v22 }
 0x8f5   : > { %4204 = vmatpush.xpose.msk.msrb.mxu3 %vm1265_vm0, %v2729_v38  ;;  %v2819_v60 = vpop.permute.xlu0 %2818 }
 0x8fc   : > { %4197 = vmatmul.msk.f32.vlgmr.msra.gmra.mxu3 %vm1265_vm0, %v2637_v17 }
 0x8fd   : > { %4212 = vmatpush.xpose.msk.msra.mxu3 %vm1265_vm0, %v2819_v60  ;;  %v2907_v63 = vpop.permute.xlu0 %2906 }
 0x904   : > { %4205 = vmatmul.msk.f32.vlgmr.msrb.gmra.mxu3 %vm1265_vm0, %v2727_v59 }
 0x905   : > { %4220 = vmatpush.xpose.msk.msrb.mxu3 %vm1265_vm0, %v2909_v61 }
 0x90c   : > { %4213 = vmatmul.msk.f32.vlgmr.msra.gmra.mxu3 %vm1265_vm0, %v2817_v62 }
 0x914   : > { %4221 = vmatmul.msk.f32.vlgmr.msrb.gmra.mxu3 %vm1265_vm0, %v2907_v63 }
 0x967   : > { %v2408_v2 = vpop.f32.mrf.mxu3 }
 0x968   : > { %v2411_v3 = vpack.c.bf16 %v2408_v2, %v2408_v2 }
 0x96a   : > { %4174 = vmatmul.msk.bf16.vlgmr.msra.gmra.mxu0 %vm1265_vm0, %v2411_v3 }
 0x96f   : > { %v2519_v4 = vpop.f32.mrf.mxu3 }
 0x970   : > { %v2522_v5 = vpack.c.bf16 %v2519_v4, %v2519_v4 }
 0x972   : > { %4187 = vmatmul.msk.bf16.vlgmr.msrb.gmra.mxu2 %vm1265_vm0, %v2522_v5 }
 0x977   : > { %v2571_v6 = vpop.f32.mrf.mxu3 }
 0x978   : > { %v2574_v7 = vmul.f32 0.25, %v2571_v6 }
 0x97a   : > { %v2575_v8 = vsel %vm1294_vm2, %v2574_v7, -inf }
 0x97b   : > { %2576 = vmax.xlane.f32.xlu1 %v2575_v8 }
 0x97f   : > { %v2661_v9 = vpop.f32.mrf.mxu3 }
 0x980   : > { %v2664_v10 = vmul.f32 0.25, %v2661_v9 }
 0x982   : > { %v2665_v11 = vsel %vm1294_vm2, %v2664_v10, -inf }
 0x983   : > { %2666 = vmax.xlane.f32.xlu2 %v2665_v11  ;;  %v4548_v11 = vld [vmem:[#allocation20 + $0x20] sm:$0xff] }
 0x984   : > { %2719 = vmatpush.bf16.msra.mxu2 %v4548_v11 }
 0x987   : > { %v2751_v12 = vpop.f32.mrf.mxu3 }
 0x988   : > { %v2754_v13 = vmul.f32 0.25, %v2751_v12  ;;  %v4549_v12 = vld [vmem:[#allocation20 + $0x28] sm:$0xff] }
 0x98a   : > { %v2755_v15 = vsel %vm1294_vm2, %v2754_v13, -inf }
 0x98b   : > { %2756 = vmax.xlane.f32.xlu0 %v2755_v15 }
 0x98f   : > { %v2841_v30 = vpop.f32.mrf.mxu3 }
 0x990   : > { %v2844_v16 = vmul.f32 0.25, %v2841_v30  ;;  %v4550_v30 = vld [vmem:[#allocation20 + $0x30] sm:$0xff] }
 0x991   : > { %2899 = vmatpush.bf16.msrb.mxu2 %v4550_v30 }
 0x992   : > { %v2845_v18 = vsel %vm1294_vm2, %v2844_v16, -inf }
 0x993   : > { %2846 = vmax.xlane.f32.xlu1 %v2845_v18 }
 0x997   : > { %v2931_v19 = vpop.f32.mrf.mxu3 }
 0x998   : > { %v2934_v20 = vmul.f32 0.25, %v2931_v19  ;;  %v4551_v19 = vld [vmem:[#allocation20 + $0x38] sm:$0xff] }
 0x99a   : > { %v2935_v23 = vsel %vm1294_vm2, %v2934_v20, -inf }
 0x99b   : > { %2936 = vmax.xlane.f32.xlu2 %v2935_v23 }
 0x9ac   : > { %2676 = vrot.lane.b32.xlu1 %v5957_v21, %s5409_s12  ;;  %s6220_s12 = sld [smem:[#allocation59_spill]] }
 0x9b3   : > { %2586 = vrot.lane.b32.xlu2 %v5957_v21, %s5410_s8  ;;  %s6214_s8 = sld [smem:[#allocation55_spill]] }
 0x9e7   : > { %v2430_v24 = vpop.f32.mrf.mxu0 }
 0x9e8   : > { %v2453_v29 = vadd.f32 %v5983_v45, %v2430_v24 }
 0x9ee   : > { %v2577_v25 = vpop.xlane.xlu1 %2576 }
 0x9ef   : > { %v2578_v26 = vsub.f32 %v2574_v7, %v2577_v25  ;;  %v2432_v27 = vpop.f32.mrf.mxu0 }
 0x9f1   : > { %v2579_v28 = vmul.f32 1.442695, %v2578_v26 }
 0x9f3   : > { %4852 = vpow2.f32 %v2579_v28 }
 0x9f5   : > { %v2541_v31 = vpop.f32.mrf.mxu2 }
 0x9f6   : > { %v6016_v32 = vadd.f32 %v2541_v31, %v2453_v29  ;;  %v2667_v33 = vpop.xlane.xlu2 %2666 }
 0x9f7   : > { %v2668_v34 = vsub.f32 %v2664_v10, %v2667_v33  ;;  %v4547_v10 = vld [vmem:[#allocation20 + $0x18] sm:$0xff] }
 0x9f8   : > { %2629 = vmatpush.bf16.msrb.mxu1 %v4547_v10  ;;  %v4572_v10 = vld [vmem:[#allocation22 + $0xa4] sm:$0xf] }
 0x9f9   : > { %v4853_v36 = vpop.eup %4852  ;;  %v2669_v37 = vmul.f32 1.442695, %v2668_v34 }
 0x9fa   : > { %v2581_v39 = vsel %vm1294_vm2, %v4853_v36, 0.0 }
 0x9fb   : > { %4854 = vpow2.f32 %v2669_v37  ;;  %2582 = vadd.xlane.f32.xlu0 %v2581_v39 }
 0x9fc   : > { %2809 = vmatpush.bf16.msra.mxu1 %v4549_v12  ;;  %v4312_v12 = vld [vmem:[#allocation22 + $0xb0] sm:$0xf0] }
 0x9fd   : > { %v2543_v35 = vpop.f32.mrf.mxu2  ;;  %v4315_v30 = vor.u32 %v4572_v10, %v4312_v12  ;;  %v4238_v12 = vld [vmem:[#allocation22 + $0x8] sm:$0xf] }
 0x9fe   : > { %v2757_v40 = vpop.xlane.xlu0 %2756 }
 0x9ff   : > { %v2758_v41 = vsub.f32 %v2754_v13, %v2757_v40 }
 0xa01   : > { %v4855_v42 = vpop.eup %4854  ;;  %v2759_v22 = vmul.f32 1.442695, %v2758_v41 }
 0xa02   : > { %v2671_v43 = vsel %vm1294_vm2, %v4855_v42, 0.0 }
 0xa03   : > { %4856 = vpow2.f32 %v2759_v22  ;;  %2672 = vadd.xlane.f32.xlu1 %v2671_v43 }
 0xa06   : > { %v2847_v44 = vpop.xlane.xlu1 %2846 }
 0xa07   : > { %v2848_v45 = vsub.f32 %v2844_v16, %v2847_v44 }
 0xa09   : > { %v4857_v46 = vpop.eup %4856  ;;  %v2849_v47 = vmul.f32 1.442695, %v2848_v45 }
 0xa0a   : > { %v2761_v48 = vsel %vm1294_vm2, %v4857_v46, 0.0 }
 0xa0b   : > { %4858 = vpow2.f32 %v2849_v47  ;;  %2762 = vadd.xlane.f32.xlu0 %v2761_v48  ;;  %v4342_v48 = vld [vmem:[#allocation22 + $0xe0] sm:$0xf] }
 0xa0e   : > { %v2937_v49 = vpop.xlane.xlu2 %2936 }
 0xa0f   : > { %v2938_v51 = vsub.f32 %v2934_v20, %v2937_v49  ;;  %v4582_v49 = vld [vmem:[#allocation22 + $0xec] sm:$0xf0] }
 0xa11   : > { %v4859_v52 = vpop.eup %4858  ;;  %v2939_v53 = vmul.f32 1.442695, %v2938_v51  ;;  %v4580_v51 = vld [vmem:[#allocation22 + $0xe4] sm:$0xf] }
 0xa12   : > { %v2851_v54 = vsel %vm1294_vm2, %v4859_v52, 0.0 }
 0xa13   : > { %4860 = vpow2.f32 %v2939_v53  ;;  %2852 = vadd.xlane.f32.xlu0 %v2851_v54  ;;  %v4350_v53 = vld [vmem:[#allocation22 + $0xe8] sm:$0xf]  ;;  %v4583_v54 = vld [vmem:[#allocation22 + $0xf4] sm:$0xf0] }
 0xa16   : > { %v2587_v55 = vpop.permute.xlu2 %2586 }
 0xa17   : > { %2607 = vmatpush.msrb.mxu0 %v2587_v55 }
 0xa19   : > { %v4861_v56 = vpop.eup %4860 }
 0xa1a   : > { %v2941_v57 = vsel %vm1294_vm2, %v4861_v56, 0.0 }
 0xa1b   : > { %2942 = vadd.xlane.f32.xlu2 %v2941_v57  ;;  %v4581_v57 = vld [vmem:[#allocation22 + $0xec] sm:$0xf] }
 0xa1c   : > { %2856 = vrot.lane.b32.xlu1 %v5957_v21, %s5412_s2  ;;  %s3639_s2 = scalar_lea.sflag [#allocation4], %s5764_s24 }
 0xa1e   : > { %v2677_v58 = vpop.permute.xlu1 %2676 }
 0xa1f   : > { %2697 = vmatpush.msra.mxu0 %v2677_v58  ;;  %v4352_v58 = vld [vmem:[#allocation22 + $0xf8] sm:$0xf0] }
 0xa24   : > { %2946 = vrot.lane.b32.xlu1 %v5957_v21, %s5413_s1  ;;  %s6215_s1 = sld [smem:[#allocation56_spill]] }
 0xa27   : > { %2766 = vrot.lane.b32.xlu0 %v5957_v21, %s5411_s21 }
 0xa6e   : > { %v2583_v17 = vpop.xlane.xlu0 %2582 }
 0xa6f   : > { %4862 = vrcp.f32 %v2583_v17  ;;  %v4355_v17 = vor.u32 %v4581_v57, %v4352_v58  ;;  %v4561_v58 = vld [vmem:[#allocation22 + $0x4c] sm:$0xf] }
 0xa75   : > { %v4863_v38 = vpop.eup %4862 }
 0xa76   : > { %v2585_v59 = vmul.f32 %v4863_v38, %v4853_v36  ;;  %v2673_v60 = vpop.xlane.xlu1 %2672 }
 0xa77   : > { %4864 = vrcp.f32 %v2673_v60 }
 0xa78   : > { %4190 = vmatmul.msk.f32.vlgmr.msrb.gmra.mxu0 %vm1294_vm2, %v2585_v59 }
 0xa7d   : > { %v4865_v61 = vpop.eup %4864 }
 0xa7e   : > { %v2675_v62 = vmul.f32 %v4865_v61, %v4855_v42  ;;  %v2763_v63 = vpop.xlane.xlu0 %2762  ;;  %v4798_v42 = vld [vmem:[%s6212_s30] ss:$0 sm:$0xff]  ;;  %v4326_v61 = vld [vmem:[#allocation22 + $0xc0] sm:$0xf]  ;;  %s6218_s30 = sld [smem:[#allocation60_spill]] }
 0xa7f   : > { %4866 = vrcp.f32 %v2763_v63  ;;  %v4576_v63 = vld [vmem:[#allocation22 + $0xc4] sm:$0xf] }
 0xa80   : > { %4198 = vmatmul.msk.f32.vlgmr.msra.gmra.mxu0 %vm1294_vm2, %v2675_v62  ;;  %v4578_v62 = vld [vmem:[#allocation22 + $0xcc] sm:$0xf0] }
 0xa84   : > { %s3649_s22 = scalar_lea.hbm %s6218_s30, %s4485_s11  ;;  %s5316_s11 = scalar_lea.hbm %s6218_s30, 16 }
 0xa85   : > { %v4867_v2 = vpop.eup %4866  ;;  %s3653_s21 = sshll.u32 %s3649_s22, 4  ;;  %s3654_s21 = int_to_ptr.hbm [resolvable:$true] %s3653_s21 }
 0xa86   : > { %v2853_v0 = vpop.xlane.xlu0 %2852  ;;  %v2765_v3 = vmul.f32 %v4867_v2, %v4857_v46  ;;  %v4334_v2 = vld [vmem:[#allocation22 + $0xc8] sm:$0xf] }
 0xa87   : > { %4868 = vrcp.f32 %v2853_v0  ;;  %v4327_v0 = vor.u32 %v4578_v62, %v4326_v61  ;;  %v4556_v61 = vld [vmem:[#allocation22 + $0x24] sm:$0xf] }
 0xa8d   : > { %v4869_v6 = vpop.eup %4868 }
 0xa8e   : > { %v2857_v1 = vpop.permute.xlu1 %2856  ;;  %v2943_v5 = vpop.xlane.xlu2 %2942  ;;  %v2855_v7 = vmul.f32 %v4869_v6, %v4859_v52  ;;  %v4344_v52 = vld [vmem:[#allocation22 + $0xf0] sm:$0xf0]  ;;  %v4336_v6 = vld [vmem:[#allocation22 + $0xd8] sm:$0xf0] }
 0xa8f   : > { %4870 = vrcp.f32 %v2943_v5  ;;  %v4347_v55 = vor.u32 %v4580_v51, %v4344_v52  ;;  %v4577_v5 = vld [vmem:[#allocation22 + $0xcc] sm:$0xf]  ;;  %v4562_v51 = vld [vmem:[#allocation22 + $0x4c] sm:$0xf0] }
 0xa91   : > { %3247 = vmatpush.bf16.msra.mxu3 %v4347_v55  ;;  %v4563_v55 = vld [vmem:[#allocation22 + $0x54] sm:$0xf0] }
 0xa95   : > { %v4871_v8 = vpop.eup %4870 }
 0xa96   : > { %v2947_v4 = vpop.permute.xlu1 %2946  ;;  %v2945_v9 = vmul.f32 %v4871_v8, %v4861_v56  ;;  %v4351_v56 = vor.u32 %v4583_v54, %v4350_v53  ;;  %v4310_v8 = vld [vmem:[#allocation22 + $0xa0] sm:$0xf]  ;;  %v4264_v53 = vld [vmem:[#allocation22 + $0x50] sm:$0xf0]  ;;  %v4270_v54 = vld [vmem:[#allocation22 + $0x48] sm:$0xf] }
 0xa97   : > { %v4271_v57 = vor.u32 %v4563_v55, %v4270_v54  ;;  %v4799_v54 = vld [vmem:[%s6213_s19] ss:$0 sm:$0xff] }
 0xa99   : > { %v2767_v21 = vpop.permute.xlu0 %2766 }
 0xa9a   : > { %2787 = vmatpush.msrb.mxu0 %v2767_v21 }
 0xa9b   : > { %4206 = vmatmul.msk.f32.vlgmr.msrb.gmra.mxu0 %vm1294_vm2, %v2765_v3  ;;  %v4579_v3 = vld [vmem:[#allocation22 + $0xd4] sm:$0xf0] }
 0xa9c   : > { %2877 = vmatpush.msra.mxu0 %v2857_v1  ;;  %v4328_v1 = vld [vmem:[#allocation22 + $0xd0] sm:$0xf0] }
 0xa9d   : > { %v4331_v21 = vor.u32 %v4576_v63, %v4328_v1  ;;  %v4248_v63 = vld [vmem:[#allocation22 + $0x30] sm:$0xf0]  ;;  %v4559_v1 = vld [vmem:[#allocation22 + $0x34] sm:$0xf0] }
 0xa9e   : > { %2967 = vmatpush.msrb.mxu0 %v2947_v4  ;;  %v4335_v4 = vor.u32 %v4579_v3, %v4334_v2  ;;  %v4251_v2 = vor.u32 %v4556_v61, %v4248_v63  ;;  %v4586_v61 = vld [vmem:[#allocation23 + $0x10] sm:$0xff]  ;;  %v4608_v63 = vld [vmem:[#allocation23 + $0xc0] sm:$0xff] }
 0xa9f   : > { %3248 = vmatpush.bf16.msra.mxu3 %v4331_v21  ;;  %v4557_v21 = vld [vmem:[#allocation22 + $0x2c] sm:$0xf] }
 0xaa3   : > { %4214 = vmatmul.msk.f32.vlgmr.msra.gmra.mxu0 %vm1294_vm2, %v2855_v7  ;;  %v4339_v7 = vor.u32 %v4577_v5, %v4336_v6  ;;  %3249 = vmatpush.bf16.msra.mxu3 %v4315_v30  ;;  %v4230_v5 = vld [vmem:[#allocation22] sm:$0xf] }
 0xaa4   : > { %3260 = vmatpush.bf16.msra.mxu0 %v4351_v56 }
 0xaa8   : > { %3261 = vmatpush.bf16.msra.mxu0 %v4335_v4  ;;  %v4256_v4 = vld [vmem:[#allocation22 + $0x38] sm:$0xf0] }
 0xaa9   : > { %v4259_v6 = vor.u32 %v4557_v21, %v4256_v4  ;;  %v3064_v21 = vld [vmem:[%s6215_s1] sm:$0xf]  ;;  %s5310_s1 = sshra.s32 %s3654_s21, 4  ;;  %s5311_s1 = int_to_ptr.hbm [resolvable:$true] %s5310_s1 }
 0xaaa   : > { %v3068_v4 = vperm.slane %v3064_v21, 2  ;;  %s5312_s14 = scalar_lea.hbm %s5311_s1, 8  ;;  %p5317_p2 = scmp.lt.s32.totalorder %s5311_s1, %s6218_s30 }
 0xaab   : > { %4222 = vmatmul.msk.f32.vlgmr.msrb.gmra.mxu0 %vm1294_vm2, %v2945_v9  ;;  %v4574_v9 = vld [vmem:[#allocation22 + $0xac] sm:$0xf0]  ;;  %p5313_p3 = scmp.ne.s32.totalorder %s5311_s1, %s5312_s14  ;;  %p5318_p5 = scmp.lt.s32.totalorder %s5316_s11, %s5312_s14 }
 0xaac   : > { %v4311_v11 = vor.u32 %v4574_v9, %v4310_v8  ;;  %v4552_v8 = vld [vmem:[#allocation22 + $0x4] sm:$0xf]  ;;  %v4232_v9 = vld [vmem:[#allocation22 + $0x10] sm:$0xf0] }
 0xaad   : > { %p5314_p8 = pnand %p5313_p3, %p5638_p0  ;;  %p5319_p1 = por %p5318_p5, %p5317_p2 }
 0xaaf   : > { %p5315_p9 = pneg %p5314_p8 }
 0xab1   : > { %p5320_p13 = pnand %p5319_p1, %p5315_p9 }
 0xaf5   : > { %v2609_v13 = vpop.f32.mrf.mxu0 }
 0xaf6   : > { %v2612_v15 = vpack.c.bf16 %v2609_v13, %v2609_v13  ;;  %v4318_v13 = vld [vmem:[#allocation22 + $0xa8] sm:$0xf] }
 0xaf8   : > { %4195 = vmatmul.msk.bf16.vlgmr.msrb.gmra.mxu1 %vm1265_vm0, %v2612_v15  ;;  %v4575_v15 = vld [vmem:[#allocation22 + $0xb4] sm:$0xf0] }
 0xaf9   : > { %2989 = vmatpush.bf16.msrb.mxu1 %v4551_v19  ;;  %v4320_v19 = vld [vmem:[#allocation22 + $0xb8] sm:$0xf0] }
 0xafd   : > { %v2699_v16 = vpop.f32.mrf.mxu0 }
 0xafe   : > { %v2702_v18 = vpack.c.bf16 %v2699_v16, %v2699_v16  ;;  %v4319_v16 = vor.u32 %v4575_v15, %v4318_v13  ;;  %v4555_v13 = vld [vmem:[#allocation22 + $0x14] sm:$0xf0]  ;;  %v4553_v15 = vld [vmem:[#allocation22 + $0xc] sm:$0xf] }
 0xaff   : > { %v4239_v30 = vor.u32 %v4555_v13, %v4238_v12 }
 0xb00   : > { %4203 = vmatmul.msk.bf16.vlgmr.msra.gmra.mxu2 %vm1265_vm0, %v2702_v18  ;;  %v4573_v18 = vld [vmem:[#allocation22 + $0xac] sm:$0xf]  ;;  %3262 = vmatpush.bf16.msra.mxu0 %v4319_v16  ;;  %v4240_v16 = vld [vmem:[#allocation22 + $0x18] sm:$0xf0] }
 0xb18   : > { %v2789_v20 = vpop.f32.mrf.mxu0 }
 0xb19   : > { %v2792_v23 = vpack.c.bf16 %v2789_v20, %v2789_v20  ;;  %v4323_v20 = vor.u32 %v4573_v18, %v4320_v19  ;;  %v4243_v18 = vor.u32 %v4553_v15, %v4240_v16 }
 0xb1b   : > { %4211 = vmatmul.msk.bf16.vlgmr.msra.gmra.mxu1 %vm1265_vm0, %v2792_v23  ;;  %v4294_v23 = vld [vmem:[#allocation22 + $0x80] sm:$0xf] }
 0xb1c   : > { %3273 = vmatpush.bf16.msra.mxu1 %v4355_v17  ;;  %v4272_v17 = vld [vmem:[#allocation22 + $0x58] sm:$0xf0] }
 0xb20   : > { %v2879_v24 = vpop.f32.mrf.mxu0  ;;  %3274 = vmatpush.bf16.msra.mxu1 %v4339_v7  ;;  %v4554_v7 = vld [vmem:[#allocation22 + $0xc] sm:$0xf0] }
 0xb21   : > { %v2882_v25 = vpack.c.bf16 %v2879_v24, %v2879_v24  ;;  %v4570_v24 = vld [vmem:[#allocation22 + $0x8c] sm:$0xf0]  ;;  %v4231_v10 = vor.u32 %v4554_v7, %v4230_v5  ;;  %v3069_v5 = vperm.slane %v3064_v21, 3 }
 0xb23   : > { %4219 = vmatmul.msk.bf16.vlgmr.msrb.gmra.mxu2 %vm1265_vm0, %v2882_v25  ;;  %v4568_v25 = vld [vmem:[#allocation22 + $0x84] sm:$0xf] }
 0xb24   : > { %3275 = vmatpush.bf16.msra.mxu1 %v4323_v20  ;;  %v4607_v20 = vld [vmem:[#allocation23 + $0xb8] sm:$0xff] }
 0xb28   : > { %v2969_v26 = vpop.f32.mrf.mxu0 }
 0xb29   : > { %v2972_v27 = vpack.c.bf16 %v2969_v26, %v2969_v26  ;;  %v4295_v26 = vor.u32 %v4570_v24, %v4294_v23  ;;  %v4615_v23 = vld [vmem:[#allocation23 + $0xf8] sm:$0xff] }
 0xb2b   : > { %4227 = vmatmul.msk.bf16.vlgmr.msrb.gmra.mxu1 %vm1265_vm0, %v2972_v27  ;;  %v4296_v27 = vld [vmem:[#allocation22 + $0x90] sm:$0xf0] }
 0xb75   : > { %v2631_v28 = vpop.f32.mrf.mxu1 }
 0xb76   : > { %v2635_v37 = vadd.f32 %v2631_v28, %v6016_v32  ;;  %v4343_v32 = vor.u32 %v4582_v49, %v4342_v48  ;;  %v4302_v28 = vld [vmem:[#allocation22 + $0x88] sm:$0xf]  ;;  %v4262_v49 = vld [vmem:[#allocation22 + $0x40] sm:$0xf] }
 0xb77   : > { %v4263_v52 = vor.u32 %v4562_v51, %v4262_v49 }
 0xb78   : > { %3234 = vmatpush.bf16.msra.mxu2 %v4343_v32  ;;  %v4560_v32 = vld [vmem:[#allocation22 + $0x44] sm:$0xf] }
 0xb79   : > { %v4267_v56 = vor.u32 %v4560_v32, %v4264_v53  ;;  %v4602_v32 = vld [vmem:[#allocation23 + $0x90] sm:$0xff] }
 0xb7c   : > { %3235 = vmatpush.bf16.msra.mxu2 %v4327_v0  ;;  %v4254_v0 = vld [vmem:[#allocation22 + $0x28] sm:$0xf] }
 0xb7d   : > { %v2633_v29 = vpop.f32.mrf.mxu1  ;;  %v4255_v3 = vor.u32 %v4559_v1, %v4254_v0  ;;  %v4585_v0 = vld [vmem:[#allocation23 + $0x8] sm:$0xff] }
 0xb7e   : > { %v4571_v29 = vld [vmem:[#allocation22 + $0x94] sm:$0xf0]  ;;  %v4593_v1 = vld [vmem:[#allocation23 + $0x48] sm:$0xff] }
 0xb80   : > { %3236 = vmatpush.bf16.msra.mxu2 %v4311_v11  ;;  %v4235_v11 = vor.u32 %v4552_v8, %v4232_v9 }
 0xb83   : > { %v2721_v31 = vpop.f32.mrf.mxu2 }
 0xb84   : > { %v2725_v39 = vadd.f32 %v2721_v31, %v2635_v37  ;;  %v4299_v31 = vor.u32 %v4568_v25, %v4296_v27  ;;  %3237 = vmatpush.bf16.msra.mxu2 %v4295_v26  ;;  %v4591_v25 = vld [vmem:[#allocation23 + $0x38] sm:$0xff]  ;;  %v4606_v27 = vld [vmem:[#allocation23 + $0xb0] sm:$0xff] }
 0xb85   : > { %v4599_v26 = vld [vmem:[#allocation23 + $0x78] sm:$0xff] }
 0xb86   : > { %3250 = vmatpush.bf16.msra.mxu3 %v4299_v31  ;;  %v4590_v31 = vld [vmem:[#allocation23 + $0x30] sm:$0xff] }
 0xb8b   : > { %v2723_v33 = vpop.f32.mrf.mxu2 }
 0xb8c   : > { %v4303_v33 = vor.u32 %v4571_v29, %v4302_v28  ;;  %v4614_v28 = vld [vmem:[#allocation23 + $0xf0] sm:$0xff] }
 0xb8e   : > { %3263 = vmatpush.bf16.msra.mxu0 %v4303_v33  ;;  %v4598_v33 = vld [vmem:[#allocation23 + $0x70] sm:$0xff] }
 0xb98   : > { %v2811_v34 = vpop.f32.mrf.mxu1 }
 0xb99   : > { %v2815_v35 = vadd.f32 %v2811_v34, %v2725_v39  ;;  %v4569_v34 = vld [vmem:[#allocation22 + $0x8c] sm:$0xf]  ;;  %v4278_v39 = vld [vmem:[#allocation22 + $0x60] sm:$0xf] }
 0xba0   : > { %v2813_v36 = vpop.f32.mrf.mxu1 }
 0xba1   : > { %v4304_v36 = vld [vmem:[#allocation22 + $0x98] sm:$0xf0] }
 0xba2   : > { %v4307_v37 = vor.u32 %v4569_v34, %v4304_v36  ;;  %v4605_v34 = vld [vmem:[#allocation23 + $0xa8] sm:$0xff] }
 0xba3   : > { %v4613_v36 = vld [vmem:[#allocation23 + $0xe8] sm:$0xff] }
 0xba4   : > { %3276 = vmatpush.bf16.msra.mxu1 %v4307_v37  ;;  %v4589_v37 = vld [vmem:[#allocation23 + $0x28] sm:$0xff] }
 0xba6   : > { %v2901_v40 = vpop.f32.mrf.mxu2 }
 0xba7   : > { %v2905_v41 = vadd.f32 %v2901_v40, %v2815_v35  ;;  %v4566_v35 = vld [vmem:[#allocation22 + $0x6c] sm:$0xf0]  ;;  %v4564_v40 = vld [vmem:[#allocation22 + $0x64] sm:$0xf] }
 0xba8   : > { %v2991_v22 = vpop.f32.mrf.mxu1 }
 0xba9   : > { %v2995_v43 = vadd.f32 %v2991_v22, %v2905_v41  ;;  %v4279_v41 = vor.u32 %v4566_v35, %v4278_v39  ;;  %v4286_v22 = vld [vmem:[#allocation22 + $0x68] sm:$0xf]  ;;  %v4604_v35 = vld [vmem:[#allocation23 + $0xa0] sm:$0xff] }
 0xbaa   : > { %v4597_v39 = vld [vmem:[#allocation23 + $0x68] sm:$0xff] }
 0xbab   : > { %v2999_v44 = vadd.f32 %v4798_v42, %v2995_v43  ;;  %v4280_v42 = vld [vmem:[#allocation22 + $0x70] sm:$0xf0]  ;;  %v4567_v43 = vld [vmem:[#allocation22 + $0x74] sm:$0xf0]  ;;  %3238 = vmatpush.bf16.msra.mxu2 %v4279_v41 }
 0xbad   : > { %v3000_v45 = vadd.f32 %v2999_v44, %v5950_v14  ;;  %v4283_v44 = vor.u32 %v4564_v40, %v4280_v42  ;;  %v4612_v40 = vld [vmem:[#allocation23 + $0xe0] sm:$0xff] }
 0xbae   : > { %v2903_v46 = vpop.f32.mrf.mxu2  ;;  %v4588_v42 = vld [vmem:[#allocation23 + $0x20] sm:$0xff] }
 0xbaf   : > { %3003 = vadd.xlane.f32.xlu0 %v3000_v45  ;;  %v4565_v46 = vld [vmem:[#allocation22 + $0x6c] sm:$0xf]  ;;  %3251 = vmatpush.bf16.msra.mxu3 %v4283_v44 }
 0xbb0   : > { %v2993_v47 = vpop.f32.mrf.mxu1  ;;  %3239 = vmatpush.bf16.msra.mxu2 %v4263_v52  ;;  %v4610_v52 = vld [vmem:[#allocation23 + $0xd0] sm:$0xff] }
 0xbb1   : > { %v4288_v47 = vld [vmem:[#allocation22 + $0x78] sm:$0xf0] }
 0xbb2   : > { %v4291_v48 = vor.u32 %v4565_v46, %v4288_v47  ;;  %v4611_v46 = vld [vmem:[#allocation23 + $0xd8] sm:$0xff] }
 0xbb3   : > { %3252 = vmatpush.bf16.msra.mxu3 %v4267_v56  ;;  %v4587_v47 = vld [vmem:[#allocation23 + $0x18] sm:$0xff] }
 0xbb4   : > { %3277 = vmatpush.bf16.msra.mxu1 %v4291_v48  ;;  %v4595_v48 = vld [vmem:[#allocation23 + $0x58] sm:$0xff] }
 0xbb7   : > { %3253 = vmatpush.bf16.msra.mxu3 %v4251_v2  ;;  %v4584_v2 = vld [vmem:[#allocation23] sm:$0xff] }
 0xbbb   : > { %3254 = vmatpush.bf16.msra.mxu3 %v4235_v11  ;;  %v3067_v11 = vperm.slane %v3064_v21, 1 }
 0xbbf   : > { %3567 = vmatpush.bf16.msrb.mxu3 %v4599_v26 }
 0xbc3   : > { %3568 = vmatpush.bf16.msrb.mxu3 %v4598_v33 }
 0xbc7   : > { %3569 = vmatpush.bf16.msrb.mxu3 %v4597_v39  ;;  %v4801_v39 = vld [vmem:[%s6216_s16] ss:$0 sm:$0xff] }
 0xc22   : > { %v3004_v14 = vpop.xlane.xlu0 %3003 }
 0xc23   : > { %v3005_v38 = vmul.f32 %v3004_v14, %v5931_v50  ;;  %v4275_v14 = vor.u32 %v4561_v58, %v4272_v17 }
 0xc25   : > { %v6045_v59 = vsub.f32 %v3000_v45, %v3005_v38  ;;  %v4287_v45 = vor.u32 %v4567_v43, %v4286_v22  ;;  %v4246_v38 = vld [vmem:[#allocation22 + $0x20] sm:$0xf]  ;;  %3278 = vmatpush.bf16.msra.mxu1 %v4275_v14 }
 0xc26   : > { %v4596_v22 = vld [vmem:[#allocation23 + $0x60] sm:$0xff] }
 0xc27   : > { %v3007_v60 = vmul.f32 %v6045_v59, %v6045_v59  ;;  %3264 = vmatpush.bf16.msra.mxu0 %v4287_v45  ;;  %v4603_v45 = vld [vmem:[#allocation23 + $0x98] sm:$0xff]  ;;  %3570 = vmatpush.bf16.msrb.mxu3 %v4596_v22 }
 0xc29   : > { %3008 = vadd.xlane.f32.xlu1 %v3007_v60  ;;  %v4558_v60 = vld [vmem:[#allocation22 + $0x2c] sm:$0xf0]  ;;  %3279 = vmatpush.bf16.msra.mxu1 %v4259_v6 }
 0xc2a   : > { %v4247_v62 = vor.u32 %v4558_v60, %v4246_v38  ;;  %v4601_v38 = vld [vmem:[#allocation23 + $0x88] sm:$0xff] }
 0xc2b   : > { %3265 = vmatpush.bf16.msra.mxu0 %v4271_v57  ;;  %3571 = vmatpush.bf16.msrb.mxu3 %v4595_v48  ;;  %v4800_v57 = vld [vmem:[%s6214_s8] ss:$0 sm:$0xff]  ;;  %s3651_s8 = sshll.u32 %s1009_s7, 4  ;;  %s3652_s8 = int_to_ptr.vmem [resolvable:$true] %s3651_s8 }
 0xc2c   : > { %3240 = vmatpush.bf16.msra.mxu2 %v4247_v62  ;;  %v4609_v60 = vld [vmem:[#allocation23 + $0xc8] sm:$0xff]  ;;  %v4600_v62 = vld [vmem:[#allocation23 + $0x80] sm:$0xff] }
 0xc2d   : > { %3280 = vmatpush.bf16.msra.mxu1 %v4243_v18 }
 0xc2f   : > { %3266 = vmatpush.bf16.msra.mxu0 %v4255_v3  ;;  %v4592_v3 = vld [vmem:[#allocation23 + $0x40] sm:$0xff] }
 0xc30   : > { %3241 = vmatpush.bf16.msra.mxu2 %v4231_v10  ;;  %v3066_v10 = vperm.slane %v3064_v21, 0 }
 0xc31   : > { %3593 = vmatpush.bf16.msrb.mxu1 %v4615_v23 }
 0xc33   : > { %3267 = vmatpush.bf16.msra.mxu0 %v4239_v30 }
 0xc34   : > { %3554 = vmatpush.bf16.msrb.mxu2 %v4591_v25 }
 0xc35   : > { %3594 = vmatpush.bf16.msrb.mxu1 %v4614_v28 }
 0xc37   : > { %3580 = vmatpush.bf16.msrb.mxu0 %v4607_v20 }
 0xc38   : > { %3555 = vmatpush.bf16.msrb.mxu2 %v4590_v31 }
 0xc39   : > { %3595 = vmatpush.bf16.msrb.mxu1 %v4613_v36 }
 0xc3b   : > { %3581 = vmatpush.bf16.msrb.mxu0 %v4606_v27 }
 0xc3c   : > { %3556 = vmatpush.bf16.msrb.mxu2 %v4589_v37 }
 0xc3d   : > { %3596 = vmatpush.bf16.msrb.mxu1 %v4612_v40 }
 0xc3f   : > { %3582 = vmatpush.bf16.msrb.mxu0 %v4605_v34 }
 0xc40   : > { %3557 = vmatpush.bf16.msrb.mxu2 %v4588_v42 }
 0xc41   : > { %3597 = vmatpush.bf16.msrb.mxu1 %v4611_v46 }
 0xc43   : > { %3583 = vmatpush.bf16.msrb.mxu0 %v4604_v35 }
 0xc44   : > { %3558 = vmatpush.bf16.msrb.mxu2 %v4587_v47 }
 0xc45   : > { %3598 = vmatpush.bf16.msrb.mxu1 %v4610_v52 }
 0xc47   : > { %3584 = vmatpush.bf16.msrb.mxu0 %v4603_v45 }
 0xc48   : > { %3559 = vmatpush.bf16.msrb.mxu2 %v4586_v61 }
 0xc49   : > { %3599 = vmatpush.bf16.msrb.mxu1 %v4609_v60  ;;  %v4803_v60 = vld [vmem:[%s6220_s12] ss:$0 sm:$0xff] }
 0xc4b   : > { %3585 = vmatpush.bf16.msrb.mxu0 %v4602_v32 }
 0xc4c   : > { %3560 = vmatpush.bf16.msrb.mxu2 %v4585_v0 }
 0xc4d   : > { %3600 = vmatpush.bf16.msrb.mxu1 %v4608_v63 }
 0xc4f   : > { %3586 = vmatpush.bf16.msrb.mxu0 %v4601_v38 }
 0xc50   : > { %3561 = vmatpush.bf16.msrb.mxu2 %v4584_v2 }
 0xc53   : > { %3587 = vmatpush.bf16.msrb.mxu0 %v4600_v62 }
 0xc9c   : > { %v3009_v19 = vpop.xlane.xlu1 %3008 }
 0xc9d   : > { %v3010_v24 = vmul.f32 %v3009_v19, %v5931_v50 }
 0xc9f   : > { %v3011_v29 = vadd.f32 1e-05, %v3010_v24 }
 0xca1   : > { %4872 = vrsqrt.f32 %v3011_v29  ;;  %vm3018_vm8 = vweird.f32 %v3011_v29 }
 0xca7   : > { %v4873_v41 = vpop.eup %4872 }
 0xca8   : > { %v3013_v43 = vmul.f32 %v4873_v41, %v3011_v29  ;;  %vm3019_vm7 = vweird.f32 %v4873_v41 }
 0xca9   : > { %vm3020_vm9 = vmor %vm3018_vm8, %vm3019_vm7 }
 0xcaa   : > { %v3014_v44 = vmul.f32 %v4873_v41, %v3013_v43 }
 0xcac   : > { %v3015_v49 = vmul.f32 0.5, %v3014_v44 }
 0xcae   : > { %v3016_v51 = vsub.f32 1.5, %v3015_v49 }
 0xcb0   : > { %v3017_v53 = vmul.f32 %v4873_v41, %v3016_v51 }
 0xcb2   : > { %v3021_v55 = vsel %vm3020_vm9, %v4873_v41, %v3017_v53 }
 0xcb3   : > { %v3022_v56 = vmul.f32 %v3021_v55, %v6045_v59  ;;  %v4594_v59 = vld [vmem:[#allocation23 + $0x50] sm:$0xff] }
 0xcb4   : > { %3572 = vmatpush.bf16.msrb.mxu3 %v4594_v59 }
 0xcb5   : > { %v3026_v58 = vmul.f32 %v4799_v54, %v3022_v56 }
 0xcb7   : > { %v6057_v17 = vadd.f32 %v4800_v57, %v3026_v58 }
 0xcb8   : > { %3573 = vmatpush.bf16.msrb.mxu3 %v4593_v1 }
 0xcb9   : > { %v3031_v14 = vpack.c.bf16 %v6057_v17, %v6057_v17 }
 0xcbb   : > { %3242 = vmatmul.bf16.vlgmr.msra.gmra.mxu2 %v3031_v14  ;;  %3255 = vmatmul.bf16.vlgmr.msra.gmra.mxu3 %v3031_v14 }
 0xcbc   : > { %3268 = vmatmul.bf16.vlgmr.msra.gmra.mxu0 %v3031_v14  ;;  %3281 = vmatmul.bf16.vlgmr.msra.gmra.mxu1 %v3031_v14  ;;  %v4802_v14 = vld [vmem:[%s6217_s25] ss:$0 sm:$0xff] }
 0xcbd   : > { %3574 = vmatpush.bf16.msrb.mxu3 %v4592_v3 }
 0xd39   : > { %v3269_v6 = vpop.f32.mrf.mxu0  ;;  %v3282_v7 = vpop.f32.mrf.mxu1 }
 0xd3a   : > { %v3270_v8 = vadd.f32 %v3269_v6, %v3068_v4  ;;  %v3283_v9 = vadd.f32 %v3282_v7, %v3069_v5 }
 0xd3c   : > { %v3288_v12 = vmax.f32 %v3270_v8, 0.0  ;;  %v3289_v13 = vmax.f32 %v3283_v9, 0.0 }
 0xd3e   : > { %v3292_v15 = vpack.c.bf16 %v3288_v12, %v3288_v12  ;;  %v3293_v30 = vpack.c.bf16 %v3289_v13, %v3289_v13  ;;  %v3243_v16 = vpop.f32.mrf.mxu2  ;;  %v3256_v18 = vpop.f32.mrf.mxu3 }
 0xd3f   : > { %v3244_v19 = vadd.f32 %v3243_v16, %v3066_v10  ;;  %v3257_v20 = vadd.f32 %v3256_v18, %v3067_v11 }
 0xd40   : > { %3588 = vmatmul.bf16.vlgmr.msrb.gmra.mxu0 %v3292_v15  ;;  %3601 = vmatmul.bf16.vlgmr.msrb.gmra.mxu1 %v3293_v30 }
 0xd41   : > { %v3286_v23 = vmax.f32 %v3244_v19, 0.0  ;;  %v3287_v24 = vmax.f32 %v3257_v20, 0.0  ;;  %v3271_v25 = vpop.f32.mrf.mxu0  ;;  %v3284_v26 = vpop.f32.mrf.mxu1 }
 0xd43   : > { %v3290_v27 = vpack.c.bf16 %v3286_v23, %v3286_v23  ;;  %v3291_v28 = vpack.c.bf16 %v3287_v24, %v3287_v24 }
 0xd45   : > { %3562 = vmatmul.bf16.vlgmr.msrb.gmra.mxu2 %v3290_v27  ;;  %3575 = vmatmul.bf16.vlgmr.msrb.gmra.mxu3 %v3291_v28 }
 0xd46   : > { %v3245_v29 = vpop.f32.mrf.mxu2  ;;  %v3258_v31 = vpop.f32.mrf.mxu3 }
 0xdbd   : > { %v3589_v33 = vpop.f32.mrf.mxu0  ;;  %v3602_v34 = vpop.f32.mrf.mxu1 }
 0xdc5   : > { %v3591_v36 = vpop.f32.mrf.mxu0  ;;  %v3604_v37 = vpop.f32.mrf.mxu1 }
 0xdc8   : > { %v3563_v35 = vpop.f32.mrf.mxu2  ;;  %v3576_v40 = vpop.f32.mrf.mxu3 }
 0xdc9   : > { %v3564_v41 = vadd.f32 %v4801_v39, %v3563_v35 }
 0xdcb   : > { %v3577_v42 = vadd.f32 %v3576_v40, %v3564_v41 }
 0xdcd   : > { %v3590_v22 = vadd.f32 %v3589_v33, %v3577_v42 }
 0xdcf   : > { %v3603_v43 = vadd.f32 %v3602_v34, %v3590_v22 }
 0xdd0   : > { %v3565_v44 = vpop.f32.mrf.mxu2  ;;  %v3578_v45 = vpop.f32.mrf.mxu3 }
 0xdd1   : > { %v3606_v46 = vadd.f32 %v3603_v43, %v6057_v17 }
 0xdd3   : > { %3609 = vadd.xlane.f32.xlu2 %v3606_v46 }
 0xe46   : > { %v3610_v47 = vpop.xlane.xlu2 %3609 }
 0xe47   : > { %v3611_v48 = vmul.f32 %v3610_v47, %v5931_v50 }
 0xe49   : > { %v3612_v49 = vsub.f32 %v3606_v46, %v3611_v48 }
 0xe4b   : > { %v3613_v51 = vmul.f32 %v3612_v49, %v3612_v49 }
 0xe4d   : > { %3614 = vadd.xlane.f32.xlu2 %v3613_v51 }
 0xec0   : > { %v3615_v32 = vpop.xlane.xlu2 %3614 }
 0xec1   : > { %v3616_v52 = vmul.f32 %v3615_v32, %v5931_v50 }
 0xec3   : > { %v3617_v53 = vadd.f32 1e-05, %v3616_v52 }
 0xec5   : > { %4874 = vrsqrt.f32 %v3617_v53  ;;  %vm3624_vm11 = vweird.f32 %v3617_v53 }
 0xecb   : > { %v4875_v54 = vpop.eup %4874 }
 0xecc   : > { %v3619_v55 = vmul.f32 %v4875_v54, %v3617_v53  ;;  %vm3625_vm10 = vweird.f32 %v4875_v54 }
 0xecd   : > { %vm3626_vm12 = vmor %vm3624_vm11, %vm3625_vm10 }
 0xece   : > { %v3620_v56 = vmul.f32 %v4875_v54, %v3619_v55 }
 0xed0   : > { %v3621_v57 = vmul.f32 0.5, %v3620_v56 }
 0xed2   : > { %v3622_v58 = vsub.f32 1.5, %v3621_v57 }
 0xed4   : > { %v3623_v17 = vmul.f32 %v4875_v54, %v3622_v58 }
 0xed6   : > { %v3627_v50 = vsel %vm3626_vm12, %v4875_v54, %v3623_v17 }
 0xed7   : > { %v3628_v38 = vmul.f32 %v3627_v50, %v3612_v49 }
 0xed9   : > { %v3632_v61 = vmul.f32 %v4802_v14, %v3628_v38 }
 0xedb   : > { %v3636_v59 = vadd.f32 %v4803_v60, %v3632_v61 }
 0xedd   : > { %3637 = vst [vmem:[%s1009_s7] sm:$0xff] %v3636_v59 }
 0xede   : > { %5323 = shalt.err (!%p5320_p13)
}
 0xedf   : > { %4666 = dma.vmem_to_hbm [thread:$0]  (%p5638_p0), %s3652_s8, 128, %s3654_s21, %s3639_s2  }
 0xee0 PF: > { %s6221_s24 = sld [smem:[#allocation35_spill]] }
 0xee1   : > { %s6223_s25 = sld [smem:[#allocation36_spill]] }
 0xee6   : > { %s3665_s4 = sand.u32 1, %s6221_s24  }
 0xee7   : > { %p6224_p7 = scmp.ge.s32.totalorder %s6223_s25, 2  ;;  %s3666_s17 = scalar_lea.sflag [#allocation4], %s3665_s4 }
 0xee9   : > { %p4713_p10 = pnand %p6224_p7, %p5644_p4 }
 0xeeb   : > { %p4714_p6 = pneg %p4713_p10 }
 0xeed   : > { %5373 = dma.done.wait (%p4714_p6), %s3666_s17, 128  }
 0xeee   : > { %5375 = vsyncadd (%p4714_p6), %s3666_s17, 4294967168  ;;  %s6225_s28 = sld [smem:[#allocation37_spill]]  ;;  %s6227_s5 = smov %s5382_s26 }
 0xeef   : > { %s6226_s22 = sld [smem:[#allocation38_spill]]  ;;  %s6228_s26 = smov %s5386_s27 }
 0xef4   : > { %p46_p11 = scmp.ge.s32.totalorder %s6225_s28, 4  }
 0xef5   : > { %s6229_s27 = smov %s6226_s22 }
 0xef6   :  { %48 = sbr.rel (!%p46_p11) target bundleno = 34 (0x22), region = 229 }
 0xefb   :  { %3672 = vsyncpa [#allocation3], 1 }
 0xefc   :  { %3674 = vsyncpa [#allocation3 + $0x1], 1 }
 0xefd   :  { %3675 = vsyncpa [#allocation6], 1 }
 0xefe   :  { %3677 = vsyncpa [#allocation6 + $0x1], 1 }
 0xeff   :  { %3678 = vsyncpa [#allocation9], 1 }
 0xf00   :  { %3679 = vsyncpa [#allocation12], 1 }
 0xf01   :  { %3680 = vsyncpa [#allocation15], 1 }
 0xf02   :  { %3681 = vsyncpa [#allocation18], 1 }
 0xf03   :  { %3682 = vsyncpa [#allocation21], 1 }
 0xf04   :  { %3683 = vsyncpa [#allocation24], 1 }
 0xf05   :  { %3684 = vsyncpa [#allocation4], 1 }
 0xf06   :  { %3686 = vsyncpa [#allocation4 + $0x1], 1 }

</bundles_post_ra>
